<compile_context>
chip_gen: v7x
topology: tpu7x:2x2x1
jax: 0.10.0
libtpu: 0.0.40
codegen_flags: <defaults>
</compile_context>

<pallas_src>
import math

import jax
import jax.numpy as jnp
from jax.experimental import pallas as pl
from jax.experimental.pallas import tpu as pltpu


_EMB = 12       # embedding dim after the h < 12 zero-pad in forward()
_FC_HID = 120   # fc hidden width in the PyTorch module
_FC_PAD = 128   # padded to a full 128-lane tile


def _full_spec(shape):
    n = len(shape)
    return pl.BlockSpec(shape, lambda *_: (0,) * n)


# --------------------------- fused forward kernel ---------------------------
def _make_forward_kernel(T, B, H, n_layers):
    D = 2 * H                       # bidirectional feature width per timestep
    inv_sqrt_d = 1.0 / math.sqrt(D)

    def kernel(*refs):
        x_ref = refs[0]
        layer_refs = refs[1:1 + 4 * n_layers]
        fw1_ref, fb1_ref, fw2_ref, fb2_ref, mask_ref = refs[1 + 4 * n_layers:
                                                            1 + 4 * n_layers + 5]
        out_ref = refs[1 + 4 * n_layers + 5]
        seq_scr = refs[1 + 4 * n_layers + 6:]          # one VMEM scratch per layer

        def bilstm_layer(x2d, wf, wb, bias, whh, out_scr):
            # Hoisted input projection: one big matmul per direction (bias folded
            # into the forward projection; each column gets it exactly once).
            gxf = jnp.dot(x2d, wf, preferred_element_type=jnp.float32) + bias
            gxb = jnp.dot(x2d, wb, preferred_element_type=jnp.float32)
            h = jnp.zeros((B, D), jnp.float32)          # [h_fwd | h_bwd]
            c = jnp.zeros((B, D), jnp.float32)          # [c_fwd | c_bwd]
            for t in range(T):                          # fully unrolled recurrence
                rt = T - 1 - t                          # backward-direction time index
                gates = (gxf[t * B:(t + 1) * B, :]
                         + gxb[rt * B:(rt + 1) * B, :]
                         + jnp.dot(h, whh, preferred_element_type=jnp.float32))
                sg = jax.nn.sigmoid(gates)              # one EUP pass over all 8H lanes
                gi = sg[:, 0:D]                         # [i_f | i_b]
                gf = sg[:, D:2 * D]                     # [f_f | f_b]
                gg = jnp.tanh(gates[:, 2 * D:3 * D])    # [g_f | g_b]
                go = sg[:, 3 * D:4 * D]                 # [o_f | o_b]
                c = gf * c + gi * gg
                h = go * jnp.tanh(c)
                out_scr[t * B:(t + 1) * B, 0:H] = h[:, 0:H]      # fwd half -> time t
                out_scr[rt * B:(rt + 1) * B, H:D] = h[:, H:D]    # bwd half -> time rt

        seq = x_ref[...]                                # (T*B, E), rows = t*B + b
        for layer in range(n_layers):
            wf, wb, bias, whh = (r[...] for r in layer_refs[4 * layer:4 * layer + 4])
            bilstm_layer(seq, wf, wb, bias, whh, seq_scr[layer])
            seq = seq_scr[layer][...]                   # (T*B, 2H)
            # inter-layer LSTM dropout(0.5) is identity in eval mode

        # ---- self-attention: query == output (Dropout(1) is identity in eval) ----
        scores = jnp.dot(seq, seq.T, preferred_element_type=jnp.float32) * inv_sqrt_d
        scores = scores + mask_ref[...]                 # -1e30 on cross-batch pairs
        scores = scores - jnp.max(scores, axis=-1, keepdims=True)
        e = jnp.exp(scores)
        p = e / jnp.sum(e, axis=-1, keepdims=True)      # block-diag softmax over keys
        # context[b] = sum_q sum_k p[(q,b),(k,b)] * seq[(k,b)]  (reduce p first)
        p_sum = jnp.zeros((B, T * B), jnp.float32)
        for q in range(T):
            p_sum = p_sum + p[q * B:(q + 1) * B, :]
        ctx = jnp.dot(p_sum, seq, preferred_element_type=jnp.float32)   # (B, 2H)

        # ---- fc head: Linear (BatchNorm folded) -> ReLU -> Linear -> softmax ----
        h1 = jnp.dot(ctx, fw1_ref[...], preferred_element_type=jnp.float32) + fb1_ref[...]
        h1 = jnp.maximum(h1, 0.0)
        logit = jnp.dot(h1, fw2_ref[...], preferred_element_type=jnp.float32) + fb2_ref[...]
        logit = logit - jnp.max(logit, axis=-1, keepdims=True)
        le = jnp.exp(logit)
        out_ref[...] = (le / jnp.sum(le, axis=-1, keepdims=True)).astype(out_ref.dtype)

    return kernel


# --------------------------------- wrapper ----------------------------------
def bilstm_attention1_forward(x, params):
    """x: (b, c, h, l) with c == 1 and b, l > 1 (matches the module's squeeze)."""
    b, c, h, l = x.shape
    if h < _EMB:
        x = jnp.concatenate([x, jnp.zeros((b, c, _EMB - h, l), x.dtype)], axis=2)
    x = jnp.transpose(x, (0, 1, 3, 2))[:, 0]        # (b, l, E)  -- squeeze channel
    seq = jnp.transpose(x, (1, 0, 2))               # (T, B, E)  time-major
    T, B, E = seq.shape
    x2d = seq.reshape(T * B, E).astype(jnp.float32)  # row index = t*B + b

    lstm_layers = params["lstm"]                    # [(wf, wb, bias, whh), ...]
    n_layers = len(lstm_layers)
    H = lstm_layers[0][3].shape[0] // 2

    # additive attention mask: 0 if row/col belong to the same batch element
    r = jnp.arange(T * B)
    same = (r[:, None] % B) == (r[None, :] % B)
    attn_mask = jnp.where(same, 0.0, -1e30).astype(jnp.float32)

    flat = [x2d]
    for layer in lstm_layers:
        flat.extend(layer)
    flat.extend(params["fc"])
    flat.append(attn_mask)

    kernel = _make_forward_kernel(T, B, H, n_layers)
    return pl.pallas_call(
        kernel,
        out_shape=jax.ShapeDtypeStruct((B, 2), jnp.float32),
        in_specs=[_full_spec(a.shape) for a in flat],
        out_specs=_full_spec((B, 2)),
        scratch_shapes=[pltpu.VMEM((T * B, 2 * H), jnp.float32)
                        for _ in range(n_layers)],
    )(*flat)


# --------------------- parameter init (PyTorch defaults) ---------------------
def init_raw_params(key, embedding_dim, hidden_dim, n_layers):
    H = hidden_dim
    k = 1.0 / math.sqrt(H)
    raw = {"lstm": [], "fc": None}
    for layer in range(n_layers):
        in_dim = embedding_dim if layer == 0 else 2 * H
        layer_p = {}
        for dname in ("fwd", "bwd"):
            key, k1, k2, k3, k4 = jax.random.split(key, 5)
            layer_p[dname] = dict(
                w_ih=jax.random.uniform(k1, (in_dim, 4 * H), jnp.float32, -k, k),
                w_hh=jax.random.uniform(k2, (H, 4 * H), jnp.float32, -k, k),
                b_ih=jax.random.uniform(k3, (4 * H,), jnp.float32, -k, k),
                b_hh=jax.random.uniform(k4, (4 * H,), jnp.float32, -k, k),
            )
        raw["lstm"].append(layer_p)

    D = 2 * H
    key, k1, k2, k3, k4 = jax.random.split(key, 5)
    s1 = 1.0 / math.sqrt(D)
    s2 = 1.0 / math.sqrt(_FC_HID)
    raw["fc"] = dict(
        w1=jax.random.uniform(k1, (D, _FC_HID), jnp.float32, -s1, s1),
        b1=jax.random.uniform(k2, (_FC_HID,), jnp.float32, -s1, s1),
        gamma=jnp.ones((_FC_HID,), jnp.float32),   # BatchNorm1d defaults (eval mode)
        beta=jnp.zeros((_FC_HID,), jnp.float32),
        mean=jnp.zeros((_FC_HID,), jnp.float32),
        var=jnp.ones((_FC_HID,), jnp.float32),
        w2=jax.random.uniform(k3, (_FC_HID, 2), jnp.float32, -s2, s2),
        b2=jax.random.uniform(k4, (2,), jnp.float32, -s2, s2),
    )
    return raw


def _scatter_gates(w4h, H, side):
    """Place (rows, 4H) gate columns [i|f|g|o] into the fused interleaved layout
    [i_f i_b | f_f f_b | g_f g_b | o_f o_b] (side 0 = fwd, 1 = bwd)."""
    rows = w4h.shape[0]
    out = jnp.zeros((rows, 8 * H), w4h.dtype)
    for g in range(4):
        out = out.at[:, (2 * g + side) * H:(2 * g + side + 1) * H].set(
            w4h[:, g * H:(g + 1) * H])
    return out


def pack_params(raw, hidden_dim):
    """Repack PyTorch-style parameters into the fused-kernel layout."""
    H = hidden_dim
    packed = {"lstm": [], "fc": None}
    for layer_p in raw["lstm"]:
        f, bw = layer_p["fwd"], layer_p["bwd"]
        wf = _scatter_gates(f["w_ih"], H, 0)                         # (E, 8H)
        wb = _scatter_gates(bw["w_ih"], H, 1)                        # (E, 8H)
        bias = (_scatter_gates((f["b_ih"] + f["b_hh"])[None, :], H, 0)
                + _scatter_gates((bw["b_ih"] + bw["b_hh"])[None, :], H, 1))  # (1, 8H)
        whh = jnp.concatenate([_scatter_gates(f["w_hh"], H, 0),
                               _scatter_gates(bw["w_hh"], H, 1)], axis=0)    # block-diag (2H, 8H)
        packed["lstm"].append((wf, wb, bias, whh))

    fc = raw["fc"]
    scale = fc["gamma"] / jnp.sqrt(fc["var"] + 1e-5)                 # fold eval-mode BN
    w1_eff = fc["w1"] * scale[None, :]
    b1_eff = (fc["b1"] - fc["mean"]) * scale + fc["beta"]
    fw1 = jnp.zeros((2 * H, _FC_PAD), jnp.float32).at[:, :_FC_HID].set(w1_eff)
    fb1 = jnp.zeros((1, _FC_PAD), jnp.float32).at[:, :_FC_HID].set(b1_eff)
    fw2 = jnp.zeros((_FC_PAD, 2), jnp.float32).at[:_FC_HID, :].set(fc["w2"])
    fb2 = fc["b2"][None, :]
    packed["fc"] = (fw1, fb1, fw2, fb2)
    return packed


if __name__ == "__main__":
    EMBEDDING_DIM = 12   # forward() pads the spatial dim h up to 12
    HIDDEN_DIM = 32
    N_LAYERS = 2
    B, C, Hs, L = 4, 1, 8, 8     # c must be 1 (squeeze); h < 12 exercises the pad

    key = jax.random.PRNGKey(0)
    key, kx, kp = jax.random.split(key, 3)
    x = jax.random.normal(kx, (B, C, Hs, L), jnp.float32)
    raw = init_raw_params(kp, EMBEDDING_DIM, HIDDEN_DIM, N_LAYERS)
    packed = pack_params(raw, HIDDEN_DIM)

    fwd = jax.jit(bilstm_attention1_forward)
    logit = jax.block_until_ready(fwd(x, packed))

    assert logit.shape == (B, 2)
    assert bool(jnp.all(jnp.isfinite(logit)))
    assert bool(jnp.allclose(jnp.sum(logit, axis=1), 1.0, atol=1e-5))
    print("KERNEL_OK")
</pallas_src>

<mosaic_0001>
module attributes {stable_mosaic.version = 11 : i64} {
  func.func @kernel(%arg0: memref<32x12xf32, #tpu.memory_space<vmem>>, %arg1: memref<12x256xf32, #tpu.memory_space<vmem>>, %arg2: memref<12x256xf32, #tpu.memory_space<vmem>>, %arg3: memref<1x256xf32, #tpu.memory_space<vmem>>, %arg4: memref<64x256xf32, #tpu.memory_space<vmem>>, %arg5: memref<64x256xf32, #tpu.memory_space<vmem>>, %arg6: memref<64x256xf32, #tpu.memory_space<vmem>>, %arg7: memref<1x256xf32, #tpu.memory_space<vmem>>, %arg8: memref<64x256xf32, #tpu.memory_space<vmem>>, %arg9: memref<64x128xf32, #tpu.memory_space<vmem>>, %arg10: memref<1x128xf32, #tpu.memory_space<vmem>>, %arg11: memref<128x2xf32, #tpu.memory_space<vmem>>, %arg12: memref<1x2xf32, #tpu.memory_space<vmem>>, %arg13: memref<32x32xf32, #tpu.memory_space<vmem>>, %arg14: memref<4x2xf32, #tpu.memory_space<vmem>>, %arg15: memref<32x64xf32, #tpu.memory_space<vmem>>, %arg16: memref<32x64xf32, #tpu.memory_space<vmem>>) attributes {dimension_semantics = [], scalar_prefetch = 0 : i64, scratch_operands = 2 : i64, tpu.core_type = #tpu.core_type<tc>} {
    %c0 = arith.constant 0 : index
    %c0_0 = arith.constant 0 : index
    %0 = vector.load %arg0[%c0, %c0_0] : memref<32x12xf32, #tpu.memory_space<vmem>>, vector<32x12xf32>
    %c0_1 = arith.constant 0 : index
    %c0_2 = arith.constant 0 : index
    %1 = vector.load %arg1[%c0_1, %c0_2] : memref<12x256xf32, #tpu.memory_space<vmem>>, vector<12x256xf32>
    %c0_3 = arith.constant 0 : index
    %c0_4 = arith.constant 0 : index
    %2 = vector.load %arg2[%c0_3, %c0_4] : memref<12x256xf32, #tpu.memory_space<vmem>>, vector<12x256xf32>
    %c0_5 = arith.constant 0 : index
    %c0_6 = arith.constant 0 : index
    %3 = vector.load %arg3[%c0_5, %c0_6] : memref<1x256xf32, #tpu.memory_space<vmem>>, vector<1x256xf32>
    %c0_7 = arith.constant 0 : index
    %c0_8 = arith.constant 0 : index
    %4 = vector.load %arg4[%c0_7, %c0_8] : memref<64x256xf32, #tpu.memory_space<vmem>>, vector<64x256xf32>
    %cst = arith.constant dense<0.000000e+00> : vector<32x256xf32>
    %5 = tpu.matmul %0, %1, %cst {dimension_numbers = #tpu.dot_dimension_numbers<[1], [0], [0], [1], [0, 0, 1, 1], [], []>} : vector<32x12xf32>, vector<12x256xf32>, vector<32x256xf32> -> vector<32x256xf32>
    %6 = vector.broadcast %3 : vector<1x256xf32> to vector<32x256xf32>
    %7 = arith.addf %5, %6 : vector<32x256xf32>
    %cst_9 = arith.constant dense<0.000000e+00> : vector<32x256xf32>
    %8 = tpu.matmul %0, %2, %cst_9 {dimension_numbers = #tpu.dot_dimension_numbers<[1], [0], [0], [1], [0, 0, 1, 1], [], []>} : vector<32x12xf32>, vector<12x256xf32>, vector<32x256xf32> -> vector<32x256xf32>
    %cst_10 = arith.constant 0.000000e+00 : f32
    %9 = vector.broadcast %cst_10 : f32 to vector<4x64xf32>
    %cst_11 = arith.constant 0.000000e+00 : f32
    %10 = vector.broadcast %cst_11 : f32 to vector<4x64xf32>
    %11 = vector.extract_strided_slice %7 {offsets = [0, 0], sizes = [4, 256], strides = [1, 1]} : vector<32x256xf32> to vector<4x256xf32>
    %12 = vector.extract_strided_slice %8 {offsets = [28, 0], sizes = [4, 256], strides = [1, 1]} : vector<32x256xf32> to vector<4x256xf32>
    %13 = arith.addf %11, %12 : vector<4x256xf32>
    %cst_12 = arith.constant dense<0.000000e+00> : vector<4x256xf32>
    %14 = tpu.matmul %9, %4, %cst_12 {dimension_numbers = #tpu.dot_dimension_numbers<[1], [0], [0], [1], [0, 0, 1, 1], [], []>} : vector<4x64xf32>, vector<64x256xf32>, vector<4x256xf32> -> vector<4x256xf32>
    %15 = arith.addf %13, %14 : vector<4x256xf32>
    %16 = arith.negf %15 : vector<4x256xf32>
    %17 = math.exp %16 : vector<4x256xf32>
    %cst_13 = arith.constant 1.000000e+00 : f32
    %18 = vector.broadcast %cst_13 : f32 to vector<4x256xf32>
    %19 = arith.addf %18, %17 : vector<4x256xf32>
    %20 = arith.divf %18, %19 : vector<4x256xf32>
    %21 = vector.extract_strided_slice %20 {offsets = [0, 0], sizes = [4, 64], strides = [1, 1]} : vector<4x256xf32> to vector<4x64xf32>
    %22 = vector.extract_strided_slice %20 {offsets = [0, 64], sizes = [4, 64], strides = [1, 1]} : vector<4x256xf32> to vector<4x64xf32>
    %23 = vector.extract_strided_slice %15 {offsets = [0, 128], sizes = [4, 64], strides = [1, 1]} : vector<4x256xf32> to vector<4x64xf32>
    %24 = math.tanh %23 : vector<4x64xf32>
    %25 = vector.extract_strided_slice %20 {offsets = [0, 192], sizes = [4, 64], strides = [1, 1]} : vector<4x256xf32> to vector<4x64xf32>
    %26 = arith.mulf %22, %10 : vector<4x64xf32>
    %27 = arith.mulf %21, %24 : vector<4x64xf32>
    %28 = arith.addf %26, %27 : vector<4x64xf32>
    %29 = math.tanh %28 : vector<4x64xf32>
    %30 = arith.mulf %25, %29 : vector<4x64xf32>
    %31 = vector.extract_strided_slice %30 {offsets = [0, 0], sizes = [4, 32], strides = [1, 1]} : vector<4x64xf32> to vector<4x32xf32>
    %c0_14 = arith.constant 0 : index
    %c0_15 = arith.constant 0 : index
    %32 = vector.load %arg15[%c0_14, %c0_15] : memref<32x64xf32, #tpu.memory_space<vmem>>, vector<4x32xf32>
    tpu.vector_store %arg15[%c0_14, %c0_15], %31 {strides = array<i32>} : memref<32x64xf32, #tpu.memory_space<vmem>>, vector<4x32xf32>,
    %33 = vector.extract_strided_slice %30 {offsets = [0, 32], sizes = [4, 32], strides = [1, 1]} : vector<4x64xf32> to vector<4x32xf32>
    %c28 = arith.constant 28 : index
    %c32 = arith.constant 32 : index
    %34 = vector.load %arg15[%c28, %c32] : memref<32x64xf32, #tpu.memory_space<vmem>>, vector<4x32xf32>
    tpu.vector_store %arg15[%c28, %c32], %33 {strides = array<i32>} : memref<32x64xf32, #tpu.memory_space<vmem>>, vector<4x32xf32>,
    %35 = vector.extract_strided_slice %7 {offsets = [4, 0], sizes = [4, 256], strides = [1, 1]} : vector<32x256xf32> to vector<4x256xf32>
    %36 = vector.extract_strided_slice %8 {offsets = [24, 0], sizes = [4, 256], strides = [1, 1]} : vector<32x256xf32> to vector<4x256xf32>
    %37 = arith.addf %35, %36 : vector<4x256xf32>
    %cst_16 = arith.constant dense<0.000000e+00> : vector<4x256xf32>
    %38 = tpu.matmul %30, %4, %cst_16 {dimension_numbers = #tpu.dot_dimension_numbers<[1], [0], [0], [1], [0, 0, 1, 1], [], []>} : vector<4x64xf32>, vector<64x256xf32>, vector<4x256xf32> -> vector<4x256xf32>
    %39 = arith.addf %37, %38 : vector<4x256xf32>
    %40 = arith.negf %39 : vector<4x256xf32>
    %41 = math.exp %40 : vector<4x256xf32>
    %cst_17 = arith.constant 1.000000e+00 : f32
    %42 = vector.broadcast %cst_17 : f32 to vector<4x256xf32>
    %43 = arith.addf %42, %41 : vector<4x256xf32>
    %44 = arith.divf %42, %43 : vector<4x256xf32>
    %45 = vector.extract_strided_slice %44 {offsets = [0, 0], sizes = [4, 64], strides = [1, 1]} : vector<4x256xf32> to vector<4x64xf32>
    %46 = vector.extract_strided_slice %44 {offsets = [0, 64], sizes = [4, 64], strides = [1, 1]} : vector<4x256xf32> to vector<4x64xf32>
    %47 = vector.extract_strided_slice %39 {offsets = [0, 128], sizes = [4, 64], strides = [1, 1]} : vector<4x256xf32> to vector<4x64xf32>
    %48 = math.tanh %47 : vector<4x64xf32>
    %49 = vector.extract_strided_slice %44 {offsets = [0, 192], sizes = [4, 64], strides = [1, 1]} : vector<4x256xf32> to vector<4x64xf32>
    %50 = arith.mulf %46, %28 : vector<4x64xf32>
    %51 = arith.mulf %45, %48 : vector<4x64xf32>
    %52 = arith.addf %50, %51 : vector<4x64xf32>
    %53 = math.tanh %52 : vector<4x64xf32>
    %54 = arith.mulf %49, %53 : vector<4x64xf32>
    %55 = vector.extract_strided_slice %54 {offsets = [0, 0], sizes = [4, 32], strides = [1, 1]} : vector<4x64xf32> to vector<4x32xf32>
    %c4 = arith.constant 4 : index
    %c0_18 = arith.constant 0 : index
    %56 = vector.load %arg15[%c4, %c0_18] : memref<32x64xf32, #tpu.memory_space<vmem>>, vector<4x32xf32>
    tpu.vector_store %arg15[%c4, %c0_18], %55 {strides = array<i32>} : memref<32x64xf32, #tpu.memory_space<vmem>>, vector<4x32xf32>,
    %57 = vector.extract_strided_slice %54 {offsets = [0, 32], sizes = [4, 32], strides = [1, 1]} : vector<4x64xf32> to vector<4x32xf32>
    %c24 = arith.constant 24 : index
    %c32_19 = arith.constant 32 : index
    %58 = vector.load %arg15[%c24, %c32_19] : memref<32x64xf32, #tpu.memory_space<vmem>>, vector<4x32xf32>
    tpu.vector_store %arg15[%c24, %c32_19], %57 {strides = array<i32>} : memref<32x64xf32, #tpu.memory_space<vmem>>, vector<4x32xf32>,
    %59 = vector.extract_strided_slice %7 {offsets = [8, 0], sizes = [4, 256], strides = [1, 1]} : vector<32x256xf32> to vector<4x256xf32>
    %60 = vector.extract_strided_slice %8 {offsets = [20, 0], sizes = [4, 256], strides = [1, 1]} : vector<32x256xf32> to vector<4x256xf32>
    %61 = arith.addf %59, %60 : vector<4x256xf32>
    %cst_20 = arith.constant dense<0.000000e+00> : vector<4x256xf32>
    %62 = tpu.matmul %54, %4, %cst_20 {dimension_numbers = #tpu.dot_dimension_numbers<[1], [0], [0], [1], [0, 0, 1, 1], [], []>} : vector<4x64xf32>, vector<64x256xf32>, vector<4x256xf32> -> vector<4x256xf32>
    %63 = arith.addf %61, %62 : vector<4x256xf32>
    %64 = arith.negf %63 : vector<4x256xf32>
    %65 = math.exp %64 : vector<4x256xf32>
    %cst_21 = arith.constant 1.000000e+00 : f32
    %66 = vector.broadcast %cst_21 : f32 to vector<4x256xf32>
    %67 = arith.addf %66, %65 : vector<4x256xf32>
    %68 = arith.divf %66, %67 : vector<4x256xf32>
    %69 = vector.extract_strided_slice %68 {offsets = [0, 0], sizes = [4, 64], strides = [1, 1]} : vector<4x256xf32> to vector<4x64xf32>
    %70 = vector.extract_strided_slice %68 {offsets = [0, 64], sizes = [4, 64], strides = [1, 1]} : vector<4x256xf32> to vector<4x64xf32>
    %71 = vector.extract_strided_slice %63 {offsets = [0, 128], sizes = [4, 64], strides = [1, 1]} : vector<4x256xf32> to vector<4x64xf32>
    %72 = math.tanh %71 : vector<4x64xf32>
    %73 = vector.extract_strided_slice %68 {offsets = [0, 192], sizes = [4, 64], strides = [1, 1]} : vector<4x256xf32> to vector<4x64xf32>
    %74 = arith.mulf %70, %52 : vector<4x64xf32>
    %75 = arith.mulf %69, %72 : vector<4x64xf32>
    %76 = arith.addf %74, %75 : vector<4x64xf32>
    %77 = math.tanh %76 : vector<4x64xf32>
    %78 = arith.mulf %73, %77 : vector<4x64xf32>
    %79 = vector.extract_strided_slice %78 {offsets = [0, 0], sizes = [4, 32], strides = [1, 1]} : vector<4x64xf32> to vector<4x32xf32>
    %c8 = arith.constant 8 : index
    %c0_22 = arith.constant 0 : index
    %80 = vector.load %arg15[%c8, %c0_22] : memref<32x64xf32, #tpu.memory_space<vmem>>, vector<4x32xf32>
    tpu.vector_store %arg15[%c8, %c0_22], %79 {strides = array<i32>} : memref<32x64xf32, #tpu.memory_space<vmem>>, vector<4x32xf32>,
    %81 = vector.extract_strided_slice %78 {offsets = [0, 32], sizes = [4, 32], strides = [1, 1]} : vector<4x64xf32> to vector<4x32xf32>
    %c20 = arith.constant 20 : index
    %c32_23 = arith.constant 32 : index
    %82 = vector.load %arg15[%c20, %c32_23] : memref<32x64xf32, #tpu.memory_space<vmem>>, vector<4x32xf32>
    tpu.vector_store %arg15[%c20, %c32_23], %81 {strides = array<i32>} : memref<32x64xf32, #tpu.memory_space<vmem>>, vector<4x32xf32>,
    %83 = vector.extract_strided_slice %7 {offsets = [12, 0], sizes = [4, 256], strides = [1, 1]} : vector<32x256xf32> to vector<4x256xf32>
    %84 = vector.extract_strided_slice %8 {offsets = [16, 0], sizes = [4, 256], strides = [1, 1]} : vector<32x256xf32> to vector<4x256xf32>
    %85 = arith.addf %83, %84 : vector<4x256xf32>
    %cst_24 = arith.constant dense<0.000000e+00> : vector<4x256xf32>
    %86 = tpu.matmul %78, %4, %cst_24 {dimension_numbers = #tpu.dot_dimension_numbers<[1], [0], [0], [1], [0, 0, 1, 1], [], []>} : vector<4x64xf32>, vector<64x256xf32>, vector<4x256xf32> -> vector<4x256xf32>
    %87 = arith.addf %85, %86 : vector<4x256xf32>
    %88 = arith.negf %87 : vector<4x256xf32>
    %89 = math.exp %88 : vector<4x256xf32>
    %cst_25 = arith.constant 1.000000e+00 : f32
    %90 = vector.broadcast %cst_25 : f32 to vector<4x256xf32>
    %91 = arith.addf %90, %89 : vector<4x256xf32>
    %92 = arith.divf %90, %91 : vector<4x256xf32>
    %93 = vector.extract_strided_slice %92 {offsets = [0, 0], sizes = [4, 64], strides = [1, 1]} : vector<4x256xf32> to vector<4x64xf32>
    %94 = vector.extract_strided_slice %92 {offsets = [0, 64], sizes = [4, 64], strides = [1, 1]} : vector<4x256xf32> to vector<4x64xf32>
    %95 = vector.extract_strided_slice %87 {offsets = [0, 128], sizes = [4, 64], strides = [1, 1]} : vector<4x256xf32> to vector<4x64xf32>
    %96 = math.tanh %95 : vector<4x64xf32>
    %97 = vector.extract_strided_slice %92 {offsets = [0, 192], sizes = [4, 64], strides = [1, 1]} : vector<4x256xf32> to vector<4x64xf32>
    %98 = arith.mulf %94, %76 : vector<4x64xf32>
    %99 = arith.mulf %93, %96 : vector<4x64xf32>
    %100 = arith.addf %98, %99 : vector<4x64xf32>
    %101 = math.tanh %100 : vector<4x64xf32>
    %102 = arith.mulf %97, %101 : vector<4x64xf32>
    %103 = vector.extract_strided_slice %102 {offsets = [0, 0], sizes = [4, 32], strides = [1, 1]} : vector<4x64xf32> to vector<4x32xf32>
    %c12 = arith.constant 12 : index
    %c0_26 = arith.constant 0 : index
    %104 = vector.load %arg15[%c12, %c0_26] : memref<32x64xf32, #tpu.memory_space<vmem>>, vector<4x32xf32>
    tpu.vector_store %arg15[%c12, %c0_26], %103 {strides = array<i32>} : memref<32x64xf32, #tpu.memory_space<vmem>>, vector<4x32xf32>,
    %105 = vector.extract_strided_slice %102 {offsets = [0, 32], sizes = [4, 32], strides = [1, 1]} : vector<4x64xf32> to vector<4x32xf32>
    %c16 = arith.constant 16 : index
    %c32_27 = arith.constant 32 : index
    %106 = vector.load %arg15[%c16, %c32_27] : memref<32x64xf32, #tpu.memory_space<vmem>>, vector<4x32xf32>
    tpu.vector_store %arg15[%c16, %c32_27], %105 {strides = array<i32>} : memref<32x64xf32, #tpu.memory_space<vmem>>, vector<4x32xf32>,
    %107 = vector.extract_strided_slice %7 {offsets = [16, 0], sizes = [4, 256], strides = [1, 1]} : vector<32x256xf32> to vector<4x256xf32>
    %108 = vector.extract_strided_slice %8 {offsets = [12, 0], sizes = [4, 256], strides = [1, 1]} : vector<32x256xf32> to vector<4x256xf32>
    %109 = arith.addf %107, %108 : vector<4x256xf32>
    %cst_28 = arith.constant dense<0.000000e+00> : vector<4x256xf32>
    %110 = tpu.matmul %102, %4, %cst_28 {dimension_numbers = #tpu.dot_dimension_numbers<[1], [0], [0], [1], [0, 0, 1, 1], [], []>} : vector<4x64xf32>, vector<64x256xf32>, vector<4x256xf32> -> vector<4x256xf32>
    %111 = arith.addf %109, %110 : vector<4x256xf32>
    %112 = arith.negf %111 : vector<4x256xf32>
    %113 = math.exp %112 : vector<4x256xf32>
    %cst_29 = arith.constant 1.000000e+00 : f32
    %114 = vector.broadcast %cst_29 : f32 to vector<4x256xf32>
    %115 = arith.addf %114, %113 : vector<4x256xf32>
    %116 = arith.divf %114, %115 : vector<4x256xf32>
    %117 = vector.extract_strided_slice %116 {offsets = [0, 0], sizes = [4, 64], strides = [1, 1]} : vector<4x256xf32> to vector<4x64xf32>
    %118 = vector.extract_strided_slice %116 {offsets = [0, 64], sizes = [4, 64], strides = [1, 1]} : vector<4x256xf32> to vector<4x64xf32>
    %119 = vector.extract_strided_slice %111 {offsets = [0, 128], sizes = [4, 64], strides = [1, 1]} : vector<4x256xf32> to vector<4x64xf32>
    %120 = math.tanh %119 : vector<4x64xf32>
    %121 = vector.extract_strided_slice %116 {offsets = [0, 192], sizes = [4, 64], strides = [1, 1]} : vector<4x256xf32> to vector<4x64xf32>
    %122 = arith.mulf %118, %100 : vector<4x64xf32>
    %123 = arith.mulf %117, %120 : vector<4x64xf32>
    %124 = arith.addf %122, %123 : vector<4x64xf32>
    %125 = math.tanh %124 : vector<4x64xf32>
    %126 = arith.mulf %121, %125 : vector<4x64xf32>
    %127 = vector.extract_strided_slice %126 {offsets = [0, 0], sizes = [4, 32], strides = [1, 1]} : vector<4x64xf32> to vector<4x32xf32>
    %c16_30 = arith.constant 16 : index
    %c0_31 = arith.constant 0 : index
    %128 = vector.load %arg15[%c16_30, %c0_31] : memref<32x64xf32, #tpu.memory_space<vmem>>, vector<4x32xf32>
    tpu.vector_store %arg15[%c16_30, %c0_31], %127 {strides = array<i32>} : memref<32x64xf32, #tpu.memory_space<vmem>>, vector<4x32xf32>,
    %129 = vector.extract_strided_slice %126 {offsets = [0, 32], sizes = [4, 32], strides = [1, 1]} : vector<4x64xf32> to vector<4x32xf32>
    %c12_32 = arith.constant 12 : index
    %c32_33 = arith.constant 32 : index
    %130 = vector.load %arg15[%c12_32, %c32_33] : memref<32x64xf32, #tpu.memory_space<vmem>>, vector<4x32xf32>
    tpu.vector_store %arg15[%c12_32, %c32_33], %129 {strides = array<i32>} : memref<32x64xf32, #tpu.memory_space<vmem>>, vector<4x32xf32>,
    %131 = vector.extract_strided_slice %7 {offsets = [20, 0], sizes = [4, 256], strides = [1, 1]} : vector<32x256xf32> to vector<4x256xf32>
    %132 = vector.extract_strided_slice %8 {offsets = [8, 0], sizes = [4, 256], strides = [1, 1]} : vector<32x256xf32> to vector<4x256xf32>
    %133 = arith.addf %131, %132 : vector<4x256xf32>
    %cst_34 = arith.constant dense<0.000000e+00> : vector<4x256xf32>
    %134 = tpu.matmul %126, %4, %cst_34 {dimension_numbers = #tpu.dot_dimension_numbers<[1], [0], [0], [1], [0, 0, 1, 1], [], []>} : vector<4x64xf32>, vector<64x256xf32>, vector<4x256xf32> -> vector<4x256xf32>
    %135 = arith.addf %133, %134 : vector<4x256xf32>
    %136 = arith.negf %135 : vector<4x256xf32>
    %137 = math.exp %136 : vector<4x256xf32>
    %cst_35 = arith.constant 1.000000e+00 : f32
    %138 = vector.broadcast %cst_35 : f32 to vector<4x256xf32>
    %139 = arith.addf %138, %137 : vector<4x256xf32>
    %140 = arith.divf %138, %139 : vector<4x256xf32>
    %141 = vector.extract_strided_slice %140 {offsets = [0, 0], sizes = [4, 64], strides = [1, 1]} : vector<4x256xf32> to vector<4x64xf32>
    %142 = vector.extract_strided_slice %140 {offsets = [0, 64], sizes = [4, 64], strides = [1, 1]} : vector<4x256xf32> to vector<4x64xf32>
    %143 = vector.extract_strided_slice %135 {offsets = [0, 128], sizes = [4, 64], strides = [1, 1]} : vector<4x256xf32> to vector<4x64xf32>
    %144 = math.tanh %143 : vector<4x64xf32>
    %145 = vector.extract_strided_slice %140 {offsets = [0, 192], sizes = [4, 64], strides = [1, 1]} : vector<4x256xf32> to vector<4x64xf32>
    %146 = arith.mulf %142, %124 : vector<4x64xf32>
    %147 = arith.mulf %141, %144 : vector<4x64xf32>
    %148 = arith.addf %146, %147 : vector<4x64xf32>
    %149 = math.tanh %148 : vector<4x64xf32>
    %150 = arith.mulf %145, %149 : vector<4x64xf32>
    %151 = vector.extract_strided_slice %150 {offsets = [0, 0], sizes = [4, 32], strides = [1, 1]} : vector<4x64xf32> to vector<4x32xf32>
    %c20_36 = arith.constant 20 : index
    %c0_37 = arith.constant 0 : index
    %152 = vector.load %arg15[%c20_36, %c0_37] : memref<32x64xf32, #tpu.memory_space<vmem>>, vector<4x32xf32>
    tpu.vector_store %arg15[%c20_36, %c0_37], %151 {strides = array<i32>} : memref<32x64xf32, #tpu.memory_space<vmem>>, vector<4x32xf32>,
    %153 = vector.extract_strided_slice %150 {offsets = [0, 32], sizes = [4, 32], strides = [1, 1]} : vector<4x64xf32> to vector<4x32xf32>
    %c8_38 = arith.constant 8 : index
    %c32_39 = arith.constant 32 : index
    %154 = vector.load %arg15[%c8_38, %c32_39] : memref<32x64xf32, #tpu.memory_space<vmem>>, vector<4x32xf32>
    tpu.vector_store %arg15[%c8_38, %c32_39], %153 {strides = array<i32>} : memref<32x64xf32, #tpu.memory_space<vmem>>, vector<4x32xf32>,
    %155 = vector.extract_strided_slice %7 {offsets = [24, 0], sizes = [4, 256], strides = [1, 1]} : vector<32x256xf32> to vector<4x256xf32>
    %156 = vector.extract_strided_slice %8 {offsets = [4, 0], sizes = [4, 256], strides = [1, 1]} : vector<32x256xf32> to vector<4x256xf32>
    %157 = arith.addf %155, %156 : vector<4x256xf32>
    %cst_40 = arith.constant dense<0.000000e+00> : vector<4x256xf32>
    %158 = tpu.matmul %150, %4, %cst_40 {dimension_numbers = #tpu.dot_dimension_numbers<[1], [0], [0], [1], [0, 0, 1, 1], [], []>} : vector<4x64xf32>, vector<64x256xf32>, vector<4x256xf32> -> vector<4x256xf32>
    %159 = arith.addf %157, %158 : vector<4x256xf32>
    %160 = arith.negf %159 : vector<4x256xf32>
    %161 = math.exp %160 : vector<4x256xf32>
    %cst_41 = arith.constant 1.000000e+00 : f32
    %162 = vector.broadcast %cst_41 : f32 to vector<4x256xf32>
    %163 = arith.addf %162, %161 : vector<4x256xf32>
    %164 = arith.divf %162, %163 : vector<4x256xf32>
    %165 = vector.extract_strided_slice %164 {offsets = [0, 0], sizes = [4, 64], strides = [1, 1]} : vector<4x256xf32> to vector<4x64xf32>
    %166 = vector.extract_strided_slice %164 {offsets = [0, 64], sizes = [4, 64], strides = [1, 1]} : vector<4x256xf32> to vector<4x64xf32>
    %167 = vector.extract_strided_slice %159 {offsets = [0, 128], sizes = [4, 64], strides = [1, 1]} : vector<4x256xf32> to vector<4x64xf32>
    %168 = math.tanh %167 : vector<4x64xf32>
    %169 = vector.extract_strided_slice %164 {offsets = [0, 192], sizes = [4, 64], strides = [1, 1]} : vector<4x256xf32> to vector<4x64xf32>
    %170 = arith.mulf %166, %148 : vector<4x64xf32>
    %171 = arith.mulf %165, %168 : vector<4x64xf32>
    %172 = arith.addf %170, %171 : vector<4x64xf32>
    %173 = math.tanh %172 : vector<4x64xf32>
    %174 = arith.mulf %169, %173 : vector<4x64xf32>
    %175 = vector.extract_strided_slice %174 {offsets = [0, 0], sizes = [4, 32], strides = [1, 1]} : vector<4x64xf32> to vector<4x32xf32>
    %c24_42 = arith.constant 24 : index
    %c0_43 = arith.constant 0 : index
    %176 = vector.load %arg15[%c24_42, %c0_43] : memref<32x64xf32, #tpu.memory_space<vmem>>, vector<4x32xf32>
    tpu.vector_store %arg15[%c24_42, %c0_43], %175 {strides = array<i32>} : memref<32x64xf32, #tpu.memory_space<vmem>>, vector<4x32xf32>,
    %177 = vector.extract_strided_slice %174 {offsets = [0, 32], sizes = [4, 32], strides = [1, 1]} : vector<4x64xf32> to vector<4x32xf32>
    %c4_44 = arith.constant 4 : index
    %c32_45 = arith.constant 32 : index
    %178 = vector.load %arg15[%c4_44, %c32_45] : memref<32x64xf32, #tpu.memory_space<vmem>>, vector<4x32xf32>
    tpu.vector_store %arg15[%c4_44, %c32_45], %177 {strides = array<i32>} : memref<32x64xf32, #tpu.memory_space<vmem>>, vector<4x32xf32>,
    %179 = vector.extract_strided_slice %7 {offsets = [28, 0], sizes = [4, 256], strides = [1, 1]} : vector<32x256xf32> to vector<4x256xf32>
    %180 = vector.extract_strided_slice %8 {offsets = [0, 0], sizes = [4, 256], strides = [1, 1]} : vector<32x256xf32> to vector<4x256xf32>
    %181 = arith.addf %179, %180 : vector<4x256xf32>
    %cst_46 = arith.constant dense<0.000000e+00> : vector<4x256xf32>
    %182 = tpu.matmul %174, %4, %cst_46 {dimension_numbers = #tpu.dot_dimension_numbers<[1], [0], [0], [1], [0, 0, 1, 1], [], []>} : vector<4x64xf32>, vector<64x256xf32>, vector<4x256xf32> -> vector<4x256xf32>
    %183 = arith.addf %181, %182 : vector<4x256xf32>
    %184 = arith.negf %183 : vector<4x256xf32>
    %185 = math.exp %184 : vector<4x256xf32>
    %cst_47 = arith.constant 1.000000e+00 : f32
    %186 = vector.broadcast %cst_47 : f32 to vector<4x256xf32>
    %187 = arith.addf %186, %185 : vector<4x256xf32>
    %188 = arith.divf %186, %187 : vector<4x256xf32>
    %189 = vector.extract_strided_slice %188 {offsets = [0, 0], sizes = [4, 64], strides = [1, 1]} : vector<4x256xf32> to vector<4x64xf32>
    %190 = vector.extract_strided_slice %188 {offsets = [0, 64], sizes = [4, 64], strides = [1, 1]} : vector<4x256xf32> to vector<4x64xf32>
    %191 = vector.extract_strided_slice %183 {offsets = [0, 128], sizes = [4, 64], strides = [1, 1]} : vector<4x256xf32> to vector<4x64xf32>
    %192 = math.tanh %191 : vector<4x64xf32>
    %193 = vector.extract_strided_slice %188 {offsets = [0, 192], sizes = [4, 64], strides = [1, 1]} : vector<4x256xf32> to vector<4x64xf32>
    %194 = arith.mulf %190, %172 : vector<4x64xf32>
    %195 = arith.mulf %189, %192 : vector<4x64xf32>
    %196 = arith.addf %194, %195 : vector<4x64xf32>
    %197 = math.tanh %196 : vector<4x64xf32>
    %198 = arith.mulf %193, %197 : vector<4x64xf32>
    %199 = vector.extract_strided_slice %198 {offsets = [0, 0], sizes = [4, 32], strides = [1, 1]} : vector<4x64xf32> to vector<4x32xf32>
    %c28_48 = arith.constant 28 : index
    %c0_49 = arith.constant 0 : index
    %200 = vector.load %arg15[%c28_48, %c0_49] : memref<32x64xf32, #tpu.memory_space<vmem>>, vector<4x32xf32>
    tpu.vector_store %arg15[%c28_48, %c0_49], %199 {strides = array<i32>} : memref<32x64xf32, #tpu.memory_space<vmem>>, vector<4x32xf32>,
    %201 = vector.extract_strided_slice %198 {offsets = [0, 32], sizes = [4, 32], strides = [1, 1]} : vector<4x64xf32> to vector<4x32xf32>
    %c0_50 = arith.constant 0 : index
    %c32_51 = arith.constant 32 : index
    %202 = vector.load %arg15[%c0_50, %c32_51] : memref<32x64xf32, #tpu.memory_space<vmem>>, vector<4x32xf32>
    tpu.vector_store %arg15[%c0_50, %c32_51], %201 {strides = array<i32>} : memref<32x64xf32, #tpu.memory_space<vmem>>, vector<4x32xf32>,
    %c0_52 = arith.constant 0 : index
    %c0_53 = arith.constant 0 : index
    %203 = vector.load %arg15[%c0_52, %c0_53] : memref<32x64xf32, #tpu.memory_space<vmem>>, vector<32x64xf32>
    %c0_54 = arith.constant 0 : index
    %c0_55 = arith.constant 0 : index
    %204 = vector.load %arg5[%c0_54, %c0_55] : memref<64x256xf32, #tpu.memory_space<vmem>>, vector<64x256xf32>
    %c0_56 = arith.constant 0 : index
    %c0_57 = arith.constant 0 : index
    %205 = vector.load %arg6[%c0_56, %c0_57] : memref<64x256xf32, #tpu.memory_space<vmem>>, vector<64x256xf32>
    %c0_58 = arith.constant 0 : index
    %c0_59 = arith.constant 0 : index
    %206 = vector.load %arg7[%c0_58, %c0_59] : memref<1x256xf32, #tpu.memory_space<vmem>>, vector<1x256xf32>
    %c0_60 = arith.constant 0 : index
    %c0_61 = arith.constant 0 : index
    %207 = vector.load %arg8[%c0_60, %c0_61] : memref<64x256xf32, #tpu.memory_space<vmem>>, vector<64x256xf32>
    %cst_62 = arith.constant dense<0.000000e+00> : vector<32x256xf32>
    %208 = tpu.matmul %203, %204, %cst_62 {dimension_numbers = #tpu.dot_dimension_numbers<[1], [0], [0], [1], [0, 0, 1, 1], [], []>} : vector<32x64xf32>, vector<64x256xf32>, vector<32x256xf32> -> vector<32x256xf32>
    %209 = vector.broadcast %206 : vector<1x256xf32> to vector<32x256xf32>
    %210 = arith.addf %208, %209 : vector<32x256xf32>
    %cst_63 = arith.constant dense<0.000000e+00> : vector<32x256xf32>
    %211 = tpu.matmul %203, %205, %cst_63 {dimension_numbers = #tpu.dot_dimension_numbers<[1], [0], [0], [1], [0, 0, 1, 1], [], []>} : vector<32x64xf32>, vector<64x256xf32>, vector<32x256xf32> -> vector<32x256xf32>
    %cst_64 = arith.constant 0.000000e+00 : f32
    %212 = vector.broadcast %cst_64 : f32 to vector<4x64xf32>
    %cst_65 = arith.constant 0.000000e+00 : f32
    %213 = vector.broadcast %cst_65 : f32 to vector<4x64xf32>
    %214 = vector.extract_strided_slice %210 {offsets = [0, 0], sizes = [4, 256], strides = [1, 1]} : vector<32x256xf32> to vector<4x256xf32>
    %215 = vector.extract_strided_slice %211 {offsets = [28, 0], sizes = [4, 256], strides = [1, 1]} : vector<32x256xf32> to vector<4x256xf32>
    %216 = arith.addf %214, %215 : vector<4x256xf32>
    %cst_66 = arith.constant dense<0.000000e+00> : vector<4x256xf32>
    %217 = tpu.matmul %212, %207, %cst_66 {dimension_numbers = #tpu.dot_dimension_numbers<[1], [0], [0], [1], [0, 0, 1, 1], [], []>} : vector<4x64xf32>, vector<64x256xf32>, vector<4x256xf32> -> vector<4x256xf32>
    %218 = arith.addf %216, %217 : vector<4x256xf32>
    %219 = arith.negf %218 : vector<4x256xf32>
    %220 = math.exp %219 : vector<4x256xf32>
    %cst_67 = arith.constant 1.000000e+00 : f32
    %221 = vector.broadcast %cst_67 : f32 to vector<4x256xf32>
    %222 = arith.addf %221, %220 : vector<4x256xf32>
    %223 = arith.divf %221, %222 : vector<4x256xf32>
    %224 = vector.extract_strided_slice %223 {offsets = [0, 0], sizes = [4, 64], strides = [1, 1]} : vector<4x256xf32> to vector<4x64xf32>
    %225 = vector.extract_strided_slice %223 {offsets = [0, 64], sizes = [4, 64], strides = [1, 1]} : vector<4x256xf32> to vector<4x64xf32>
    %226 = vector.extract_strided_slice %218 {offsets = [0, 128], sizes = [4, 64], strides = [1, 1]} : vector<4x256xf32> to vector<4x64xf32>
    %227 = math.tanh %226 : vector<4x64xf32>
    %228 = vector.extract_strided_slice %223 {offsets = [0, 192], sizes = [4, 64], strides = [1, 1]} : vector<4x256xf32> to vector<4x64xf32>
    %229 = arith.mulf %225, %213 : vector<4x64xf32>
    %230 = arith.mulf %224, %227 : vector<4x64xf32>
    %231 = arith.addf %229, %230 : vector<4x64xf32>
    %232 = math.tanh %231 : vector<4x64xf32>
    %233 = arith.mulf %228, %232 : vector<4x64xf32>
    %234 = vector.extract_strided_slice %233 {offsets = [0, 0], sizes = [4, 32], strides = [1, 1]} : vector<4x64xf32> to vector<4x32xf32>
    %c0_68 = arith.constant 0 : index
    %c0_69 = arith.constant 0 : index
    %235 = vector.load %arg16[%c0_68, %c0_69] : memref<32x64xf32, #tpu.memory_space<vmem>>, vector<4x32xf32>
    tpu.vector_store %arg16[%c0_68, %c0_69], %234 {strides = array<i32>} : memref<32x64xf32, #tpu.memory_space<vmem>>, vector<4x32xf32>,
    %236 = vector.extract_strided_slice %233 {offsets = [0, 32], sizes = [4, 32], strides = [1, 1]} : vector<4x64xf32> to vector<4x32xf32>
    %c28_70 = arith.constant 28 : index
    %c32_71 = arith.constant 32 : index
    %237 = vector.load %arg16[%c28_70, %c32_71] : memref<32x64xf32, #tpu.memory_space<vmem>>, vector<4x32xf32>
    tpu.vector_store %arg16[%c28_70, %c32_71], %236 {strides = array<i32>} : memref<32x64xf32, #tpu.memory_space<vmem>>, vector<4x32xf32>,
    %238 = vector.extract_strided_slice %210 {offsets = [4, 0], sizes = [4, 256], strides = [1, 1]} : vector<32x256xf32> to vector<4x256xf32>
    %239 = vector.extract_strided_slice %211 {offsets = [24, 0], sizes = [4, 256], strides = [1, 1]} : vector<32x256xf32> to vector<4x256xf32>
    %240 = arith.addf %238, %239 : vector<4x256xf32>
    %cst_72 = arith.constant dense<0.000000e+00> : vector<4x256xf32>
    %241 = tpu.matmul %233, %207, %cst_72 {dimension_numbers = #tpu.dot_dimension_numbers<[1], [0], [0], [1], [0, 0, 1, 1], [], []>} : vector<4x64xf32>, vector<64x256xf32>, vector<4x256xf32> -> vector<4x256xf32>
    %242 = arith.addf %240, %241 : vector<4x256xf32>
    %243 = arith.negf %242 : vector<4x256xf32>
    %244 = math.exp %243 : vector<4x256xf32>
    %cst_73 = arith.constant 1.000000e+00 : f32
    %245 = vector.broadcast %cst_73 : f32 to vector<4x256xf32>
    %246 = arith.addf %245, %244 : vector<4x256xf32>
    %247 = arith.divf %245, %246 : vector<4x256xf32>
    %248 = vector.extract_strided_slice %247 {offsets = [0, 0], sizes = [4, 64], strides = [1, 1]} : vector<4x256xf32> to vector<4x64xf32>
    %249 = vector.extract_strided_slice %247 {offsets = [0, 64], sizes = [4, 64], strides = [1, 1]} : vector<4x256xf32> to vector<4x64xf32>
    %250 = vector.extract_strided_slice %242 {offsets = [0, 128], sizes = [4, 64], strides = [1, 1]} : vector<4x256xf32> to vector<4x64xf32>
    %251 = math.tanh %250 : vector<4x64xf32>
    %252 = vector.extract_strided_slice %247 {offsets = [0, 192], sizes = [4, 64], strides = [1, 1]} : vector<4x256xf32> to vector<4x64xf32>
    %253 = arith.mulf %249, %231 : vector<4x64xf32>
    %254 = arith.mulf %248, %251 : vector<4x64xf32>
    %255 = arith.addf %253, %254 : vector<4x64xf32>
    %256 = math.tanh %255 : vector<4x64xf32>
    %257 = arith.mulf %252, %256 : vector<4x64xf32>
    %258 = vector.extract_strided_slice %257 {offsets = [0, 0], sizes = [4, 32], strides = [1, 1]} : vector<4x64xf32> to vector<4x32xf32>
    %c4_74 = arith.constant 4 : index
    %c0_75 = arith.constant 0 : index
    %259 = vector.load %arg16[%c4_74, %c0_75] : memref<32x64xf32, #tpu.memory_space<vmem>>, vector<4x32xf32>
    tpu.vector_store %arg16[%c4_74, %c0_75], %258 {strides = array<i32>} : memref<32x64xf32, #tpu.memory_space<vmem>>, vector<4x32xf32>,
    %260 = vector.extract_strided_slice %257 {offsets = [0, 32], sizes = [4, 32], strides = [1, 1]} : vector<4x64xf32> to vector<4x32xf32>
    %c24_76 = arith.constant 24 : index
    %c32_77 = arith.constant 32 : index
    %261 = vector.load %arg16[%c24_76, %c32_77] : memref<32x64xf32, #tpu.memory_space<vmem>>, vector<4x32xf32>
    tpu.vector_store %arg16[%c24_76, %c32_77], %260 {strides = array<i32>} : memref<32x64xf32, #tpu.memory_space<vmem>>, vector<4x32xf32>,
    %262 = vector.extract_strided_slice %210 {offsets = [8, 0], sizes = [4, 256], strides = [1, 1]} : vector<32x256xf32> to vector<4x256xf32>
    %263 = vector.extract_strided_slice %211 {offsets = [20, 0], sizes = [4, 256], strides = [1, 1]} : vector<32x256xf32> to vector<4x256xf32>
    %264 = arith.addf %262, %263 : vector<4x256xf32>
    %cst_78 = arith.constant dense<0.000000e+00> : vector<4x256xf32>
    %265 = tpu.matmul %257, %207, %cst_78 {dimension_numbers = #tpu.dot_dimension_numbers<[1], [0], [0], [1], [0, 0, 1, 1], [], []>} : vector<4x64xf32>, vector<64x256xf32>, vector<4x256xf32> -> vector<4x256xf32>
    %266 = arith.addf %264, %265 : vector<4x256xf32>
    %267 = arith.negf %266 : vector<4x256xf32>
    %268 = math.exp %267 : vector<4x256xf32>
    %cst_79 = arith.constant 1.000000e+00 : f32
    %269 = vector.broadcast %cst_79 : f32 to vector<4x256xf32>
    %270 = arith.addf %269, %268 : vector<4x256xf32>
    %271 = arith.divf %269, %270 : vector<4x256xf32>
    %272 = vector.extract_strided_slice %271 {offsets = [0, 0], sizes = [4, 64], strides = [1, 1]} : vector<4x256xf32> to vector<4x64xf32>
    %273 = vector.extract_strided_slice %271 {offsets = [0, 64], sizes = [4, 64], strides = [1, 1]} : vector<4x256xf32> to vector<4x64xf32>
    %274 = vector.extract_strided_slice %266 {offsets = [0, 128], sizes = [4, 64], strides = [1, 1]} : vector<4x256xf32> to vector<4x64xf32>
    %275 = math.tanh %274 : vector<4x64xf32>
    %276 = vector.extract_strided_slice %271 {offsets = [0, 192], sizes = [4, 64], strides = [1, 1]} : vector<4x256xf32> to vector<4x64xf32>
    %277 = arith.mulf %273, %255 : vector<4x64xf32>
    %278 = arith.mulf %272, %275 : vector<4x64xf32>
    %279 = arith.addf %277, %278 : vector<4x64xf32>
    %280 = math.tanh %279 : vector<4x64xf32>
    %281 = arith.mulf %276, %280 : vector<4x64xf32>
    %282 = vector.extract_strided_slice %281 {offsets = [0, 0], sizes = [4, 32], strides = [1, 1]} : vector<4x64xf32> to vector<4x32xf32>
    %c8_80 = arith.constant 8 : index
    %c0_81 = arith.constant 0 : index
    %283 = vector.load %arg16[%c8_80, %c0_81] : memref<32x64xf32, #tpu.memory_space<vmem>>, vector<4x32xf32>
    tpu.vector_store %arg16[%c8_80, %c0_81], %282 {strides = array<i32>} : memref<32x64xf32, #tpu.memory_space<vmem>>, vector<4x32xf32>,
    %284 = vector.extract_strided_slice %281 {offsets = [0, 32], sizes = [4, 32], strides = [1, 1]} : vector<4x64xf32> to vector<4x32xf32>
    %c20_82 = arith.constant 20 : index
    %c32_83 = arith.constant 32 : index
    %285 = vector.load %arg16[%c20_82, %c32_83] : memref<32x64xf32, #tpu.memory_space<vmem>>, vector<4x32xf32>
    tpu.vector_store %arg16[%c20_82, %c32_83], %284 {strides = array<i32>} : memref<32x64xf32, #tpu.memory_space<vmem>>, vector<4x32xf32>,
    %286 = vector.extract_strided_slice %210 {offsets = [12, 0], sizes = [4, 256], strides = [1, 1]} : vector<32x256xf32> to vector<4x256xf32>
    %287 = vector.extract_strided_slice %211 {offsets = [16, 0], sizes = [4, 256], strides = [1, 1]} : vector<32x256xf32> to vector<4x256xf32>
    %288 = arith.addf %286, %287 : vector<4x256xf32>
    %cst_84 = arith.constant dense<0.000000e+00> : vector<4x256xf32>
    %289 = tpu.matmul %281, %207, %cst_84 {dimension_numbers = #tpu.dot_dimension_numbers<[1], [0], [0], [1], [0, 0, 1, 1], [], []>} : vector<4x64xf32>, vector<64x256xf32>, vector<4x256xf32> -> vector<4x256xf32>
    %290 = arith.addf %288, %289 : vector<4x256xf32>
    %291 = arith.negf %290 : vector<4x256xf32>
    %292 = math.exp %291 : vector<4x256xf32>
    %cst_85 = arith.constant 1.000000e+00 : f32
    %293 = vector.broadcast %cst_85 : f32 to vector<4x256xf32>
    %294 = arith.addf %293, %292 : vector<4x256xf32>
    %295 = arith.divf %293, %294 : vector<4x256xf32>
    %296 = vector.extract_strided_slice %295 {offsets = [0, 0], sizes = [4, 64], strides = [1, 1]} : vector<4x256xf32> to vector<4x64xf32>
    %297 = vector.extract_strided_slice %295 {offsets = [0, 64], sizes = [4, 64], strides = [1, 1]} : vector<4x256xf32> to vector<4x64xf32>
    %298 = vector.extract_strided_slice %290 {offsets = [0, 128], sizes = [4, 64], strides = [1, 1]} : vector<4x256xf32> to vector<4x64xf32>
    %299 = math.tanh %298 : vector<4x64xf32>
    %300 = vector.extract_strided_slice %295 {offsets = [0, 192], sizes = [4, 64], strides = [1, 1]} : vector<4x256xf32> to vector<4x64xf32>
    %301 = arith.mulf %297, %279 : vector<4x64xf32>
    %302 = arith.mulf %296, %299 : vector<4x64xf32>
    %303 = arith.addf %301, %302 : vector<4x64xf32>
    %304 = math.tanh %303 : vector<4x64xf32>
    %305 = arith.mulf %300, %304 : vector<4x64xf32>
    %306 = vector.extract_strided_slice %305 {offsets = [0, 0], sizes = [4, 32], strides = [1, 1]} : vector<4x64xf32> to vector<4x32xf32>
    %c12_86 = arith.constant 12 : index
    %c0_87 = arith.constant 0 : index
    %307 = vector.load %arg16[%c12_86, %c0_87] : memref<32x64xf32, #tpu.memory_space<vmem>>, vector<4x32xf32>
    tpu.vector_store %arg16[%c12_86, %c0_87], %306 {strides = array<i32>} : memref<32x64xf32, #tpu.memory_space<vmem>>, vector<4x32xf32>,
    %308 = vector.extract_strided_slice %305 {offsets = [0, 32], sizes = [4, 32], strides = [1, 1]} : vector<4x64xf32> to vector<4x32xf32>
    %c16_88 = arith.constant 16 : index
    %c32_89 = arith.constant 32 : index
    %309 = vector.load %arg16[%c16_88, %c32_89] : memref<32x64xf32, #tpu.memory_space<vmem>>, vector<4x32xf32>
    tpu.vector_store %arg16[%c16_88, %c32_89], %308 {strides = array<i32>} : memref<32x64xf32, #tpu.memory_space<vmem>>, vector<4x32xf32>,
    %310 = vector.extract_strided_slice %210 {offsets = [16, 0], sizes = [4, 256], strides = [1, 1]} : vector<32x256xf32> to vector<4x256xf32>
    %311 = vector.extract_strided_slice %211 {offsets = [12, 0], sizes = [4, 256], strides = [1, 1]} : vector<32x256xf32> to vector<4x256xf32>
    %312 = arith.addf %310, %311 : vector<4x256xf32>
    %cst_90 = arith.constant dense<0.000000e+00> : vector<4x256xf32>
    %313 = tpu.matmul %305, %207, %cst_90 {dimension_numbers = #tpu.dot_dimension_numbers<[1], [0], [0], [1], [0, 0, 1, 1], [], []>} : vector<4x64xf32>, vector<64x256xf32>, vector<4x256xf32> -> vector<4x256xf32>
    %314 = arith.addf %312, %313 : vector<4x256xf32>
    %315 = arith.negf %314 : vector<4x256xf32>
    %316 = math.exp %315 : vector<4x256xf32>
    %cst_91 = arith.constant 1.000000e+00 : f32
    %317 = vector.broadcast %cst_91 : f32 to vector<4x256xf32>
    %318 = arith.addf %317, %316 : vector<4x256xf32>
    %319 = arith.divf %317, %318 : vector<4x256xf32>
    %320 = vector.extract_strided_slice %319 {offsets = [0, 0], sizes = [4, 64], strides = [1, 1]} : vector<4x256xf32> to vector<4x64xf32>
    %321 = vector.extract_strided_slice %319 {offsets = [0, 64], sizes = [4, 64], strides = [1, 1]} : vector<4x256xf32> to vector<4x64xf32>
    %322 = vector.extract_strided_slice %314 {offsets = [0, 128], sizes = [4, 64], strides = [1, 1]} : vector<4x256xf32> to vector<4x64xf32>
    %323 = math.tanh %322 : vector<4x64xf32>
    %324 = vector.extract_strided_slice %319 {offsets = [0, 192], sizes = [4, 64], strides = [1, 1]} : vector<4x256xf32> to vector<4x64xf32>
    %325 = arith.mulf %321, %303 : vector<4x64xf32>
    %326 = arith.mulf %320, %323 : vector<4x64xf32>
    %327 = arith.addf %325, %326 : vector<4x64xf32>
    %328 = math.tanh %327 : vector<4x64xf32>
    %329 = arith.mulf %324, %328 : vector<4x64xf32>
    %330 = vector.extract_strided_slice %329 {offsets = [0, 0], sizes = [4, 32], strides = [1, 1]} : vector<4x64xf32> to vector<4x32xf32>
    %c16_92 = arith.constant 16 : index
    %c0_93 = arith.constant 0 : index
    %331 = vector.load %arg16[%c16_92, %c0_93] : memref<32x64xf32, #tpu.memory_space<vmem>>, vector<4x32xf32>
    tpu.vector_store %arg16[%c16_92, %c0_93], %330 {strides = array<i32>} : memref<32x64xf32, #tpu.memory_space<vmem>>, vector<4x32xf32>,
    %332 = vector.extract_strided_slice %329 {offsets = [0, 32], sizes = [4, 32], strides = [1, 1]} : vector<4x64xf32> to vector<4x32xf32>
    %c12_94 = arith.constant 12 : index
    %c32_95 = arith.constant 32 : index
    %333 = vector.load %arg16[%c12_94, %c32_95] : memref<32x64xf32, #tpu.memory_space<vmem>>, vector<4x32xf32>
    tpu.vector_store %arg16[%c12_94, %c32_95], %332 {strides = array<i32>} : memref<32x64xf32, #tpu.memory_space<vmem>>, vector<4x32xf32>,
    %334 = vector.extract_strided_slice %210 {offsets = [20, 0], sizes = [4, 256], strides = [1, 1]} : vector<32x256xf32> to vector<4x256xf32>
    %335 = vector.extract_strided_slice %211 {offsets = [8, 0], sizes = [4, 256], strides = [1, 1]} : vector<32x256xf32> to vector<4x256xf32>
    %336 = arith.addf %334, %335 : vector<4x256xf32>
    %cst_96 = arith.constant dense<0.000000e+00> : vector<4x256xf32>
    %337 = tpu.matmul %329, %207, %cst_96 {dimension_numbers = #tpu.dot_dimension_numbers<[1], [0], [0], [1], [0, 0, 1, 1], [], []>} : vector<4x64xf32>, vector<64x256xf32>, vector<4x256xf32> -> vector<4x256xf32>
    %338 = arith.addf %336, %337 : vector<4x256xf32>
    %339 = arith.negf %338 : vector<4x256xf32>
    %340 = math.exp %339 : vector<4x256xf32>
    %cst_97 = arith.constant 1.000000e+00 : f32
    %341 = vector.broadcast %cst_97 : f32 to vector<4x256xf32>
    %342 = arith.addf %341, %340 : vector<4x256xf32>
    %343 = arith.divf %341, %342 : vector<4x256xf32>
    %344 = vector.extract_strided_slice %343 {offsets = [0, 0], sizes = [4, 64], strides = [1, 1]} : vector<4x256xf32> to vector<4x64xf32>
    %345 = vector.extract_strided_slice %343 {offsets = [0, 64], sizes = [4, 64], strides = [1, 1]} : vector<4x256xf32> to vector<4x64xf32>
    %346 = vector.extract_strided_slice %338 {offsets = [0, 128], sizes = [4, 64], strides = [1, 1]} : vector<4x256xf32> to vector<4x64xf32>
    %347 = math.tanh %346 : vector<4x64xf32>
    %348 = vector.extract_strided_slice %343 {offsets = [0, 192], sizes = [4, 64], strides = [1, 1]} : vector<4x256xf32> to vector<4x64xf32>
    %349 = arith.mulf %345, %327 : vector<4x64xf32>
    %350 = arith.mulf %344, %347 : vector<4x64xf32>
    %351 = arith.addf %349, %350 : vector<4x64xf32>
    %352 = math.tanh %351 : vector<4x64xf32>
    %353 = arith.mulf %348, %352 : vector<4x64xf32>
    %354 = vector.extract_strided_slice %353 {offsets = [0, 0], sizes = [4, 32], strides = [1, 1]} : vector<4x64xf32> to vector<4x32xf32>
    %c20_98 = arith.constant 20 : index
    %c0_99 = arith.constant 0 : index
    %355 = vector.load %arg16[%c20_98, %c0_99] : memref<32x64xf32, #tpu.memory_space<vmem>>, vector<4x32xf32>
    tpu.vector_store %arg16[%c20_98, %c0_99], %354 {strides = array<i32>} : memref<32x64xf32, #tpu.memory_space<vmem>>, vector<4x32xf32>,
    %356 = vector.extract_strided_slice %353 {offsets = [0, 32], sizes = [4, 32], strides = [1, 1]} : vector<4x64xf32> to vector<4x32xf32>
    %c8_100 = arith.constant 8 : index
    %c32_101 = arith.constant 32 : index
    %357 = vector.load %arg16[%c8_100, %c32_101] : memref<32x64xf32, #tpu.memory_space<vmem>>, vector<4x32xf32>
    tpu.vector_store %arg16[%c8_100, %c32_101], %356 {strides = array<i32>} : memref<32x64xf32, #tpu.memory_space<vmem>>, vector<4x32xf32>,
    %358 = vector.extract_strided_slice %210 {offsets = [24, 0], sizes = [4, 256], strides = [1, 1]} : vector<32x256xf32> to vector<4x256xf32>
    %359 = vector.extract_strided_slice %211 {offsets = [4, 0], sizes = [4, 256], strides = [1, 1]} : vector<32x256xf32> to vector<4x256xf32>
    %360 = arith.addf %358, %359 : vector<4x256xf32>
    %cst_102 = arith.constant dense<0.000000e+00> : vector<4x256xf32>
    %361 = tpu.matmul %353, %207, %cst_102 {dimension_numbers = #tpu.dot_dimension_numbers<[1], [0], [0], [1], [0, 0, 1, 1], [], []>} : vector<4x64xf32>, vector<64x256xf32>, vector<4x256xf32> -> vector<4x256xf32>
    %362 = arith.addf %360, %361 : vector<4x256xf32>
    %363 = arith.negf %362 : vector<4x256xf32>
    %364 = math.exp %363 : vector<4x256xf32>
    %cst_103 = arith.constant 1.000000e+00 : f32
    %365 = vector.broadcast %cst_103 : f32 to vector<4x256xf32>
    %366 = arith.addf %365, %364 : vector<4x256xf32>
    %367 = arith.divf %365, %366 : vector<4x256xf32>
    %368 = vector.extract_strided_slice %367 {offsets = [0, 0], sizes = [4, 64], strides = [1, 1]} : vector<4x256xf32> to vector<4x64xf32>
    %369 = vector.extract_strided_slice %367 {offsets = [0, 64], sizes = [4, 64], strides = [1, 1]} : vector<4x256xf32> to vector<4x64xf32>
    %370 = vector.extract_strided_slice %362 {offsets = [0, 128], sizes = [4, 64], strides = [1, 1]} : vector<4x256xf32> to vector<4x64xf32>
    %371 = math.tanh %370 : vector<4x64xf32>
    %372 = vector.extract_strided_slice %367 {offsets = [0, 192], sizes = [4, 64], strides = [1, 1]} : vector<4x256xf32> to vector<4x64xf32>
    %373 = arith.mulf %369, %351 : vector<4x64xf32>
    %374 = arith.mulf %368, %371 : vector<4x64xf32>
    %375 = arith.addf %373, %374 : vector<4x64xf32>
    %376 = math.tanh %375 : vector<4x64xf32>
    %377 = arith.mulf %372, %376 : vector<4x64xf32>
    %378 = vector.extract_strided_slice %377 {offsets = [0, 0], sizes = [4, 32], strides = [1, 1]} : vector<4x64xf32> to vector<4x32xf32>
    %c24_104 = arith.constant 24 : index
    %c0_105 = arith.constant 0 : index
    %379 = vector.load %arg16[%c24_104, %c0_105] : memref<32x64xf32, #tpu.memory_space<vmem>>, vector<4x32xf32>
    tpu.vector_store %arg16[%c24_104, %c0_105], %378 {strides = array<i32>} : memref<32x64xf32, #tpu.memory_space<vmem>>, vector<4x32xf32>,
    %380 = vector.extract_strided_slice %377 {offsets = [0, 32], sizes = [4, 32], strides = [1, 1]} : vector<4x64xf32> to vector<4x32xf32>
    %c4_106 = arith.constant 4 : index
    %c32_107 = arith.constant 32 : index
    %381 = vector.load %arg16[%c4_106, %c32_107] : memref<32x64xf32, #tpu.memory_space<vmem>>, vector<4x32xf32>
    tpu.vector_store %arg16[%c4_106, %c32_107], %380 {strides = array<i32>} : memref<32x64xf32, #tpu.memory_space<vmem>>, vector<4x32xf32>,
    %382 = vector.extract_strided_slice %210 {offsets = [28, 0], sizes = [4, 256], strides = [1, 1]} : vector<32x256xf32> to vector<4x256xf32>
    %383 = vector.extract_strided_slice %211 {offsets = [0, 0], sizes = [4, 256], strides = [1, 1]} : vector<32x256xf32> to vector<4x256xf32>
    %384 = arith.addf %382, %383 : vector<4x256xf32>
    %cst_108 = arith.constant dense<0.000000e+00> : vector<4x256xf32>
    %385 = tpu.matmul %377, %207, %cst_108 {dimension_numbers = #tpu.dot_dimension_numbers<[1], [0], [0], [1], [0, 0, 1, 1], [], []>} : vector<4x64xf32>, vector<64x256xf32>, vector<4x256xf32> -> vector<4x256xf32>
    %386 = arith.addf %384, %385 : vector<4x256xf32>
    %387 = arith.negf %386 : vector<4x256xf32>
    %388 = math.exp %387 : vector<4x256xf32>
    %cst_109 = arith.constant 1.000000e+00 : f32
    %389 = vector.broadcast %cst_109 : f32 to vector<4x256xf32>
    %390 = arith.addf %389, %388 : vector<4x256xf32>
    %391 = arith.divf %389, %390 : vector<4x256xf32>
    %392 = vector.extract_strided_slice %391 {offsets = [0, 0], sizes = [4, 64], strides = [1, 1]} : vector<4x256xf32> to vector<4x64xf32>
    %393 = vector.extract_strided_slice %391 {offsets = [0, 64], sizes = [4, 64], strides = [1, 1]} : vector<4x256xf32> to vector<4x64xf32>
    %394 = vector.extract_strided_slice %386 {offsets = [0, 128], sizes = [4, 64], strides = [1, 1]} : vector<4x256xf32> to vector<4x64xf32>
    %395 = math.tanh %394 : vector<4x64xf32>
    %396 = vector.extract_strided_slice %391 {offsets = [0, 192], sizes = [4, 64], strides = [1, 1]} : vector<4x256xf32> to vector<4x64xf32>
    %397 = arith.mulf %393, %375 : vector<4x64xf32>
    %398 = arith.mulf %392, %395 : vector<4x64xf32>
    %399 = arith.addf %397, %398 : vector<4x64xf32>
    %400 = math.tanh %399 : vector<4x64xf32>
    %401 = arith.mulf %396, %400 : vector<4x64xf32>
    %402 = vector.extract_strided_slice %401 {offsets = [0, 0], sizes = [4, 32], strides = [1, 1]} : vector<4x64xf32> to vector<4x32xf32>
    %c28_110 = arith.constant 28 : index
    %c0_111 = arith.constant 0 : index
    %403 = vector.load %arg16[%c28_110, %c0_111] : memref<32x64xf32, #tpu.memory_space<vmem>>, vector<4x32xf32>
    tpu.vector_store %arg16[%c28_110, %c0_111], %402 {strides = array<i32>} : memref<32x64xf32, #tpu.memory_space<vmem>>, vector<4x32xf32>,
    %404 = vector.extract_strided_slice %401 {offsets = [0, 32], sizes = [4, 32], strides = [1, 1]} : vector<4x64xf32> to vector<4x32xf32>
    %c0_112 = arith.constant 0 : index
    %c32_113 = arith.constant 32 : index
    %405 = vector.load %arg16[%c0_112, %c32_113] : memref<32x64xf32, #tpu.memory_space<vmem>>, vector<4x32xf32>
    tpu.vector_store %arg16[%c0_112, %c32_113], %404 {strides = array<i32>} : memref<32x64xf32, #tpu.memory_space<vmem>>, vector<4x32xf32>,
    %c0_114 = arith.constant 0 : index
    %c0_115 = arith.constant 0 : index
    %406 = vector.load %arg16[%c0_114, %c0_115] : memref<32x64xf32, #tpu.memory_space<vmem>>, vector<32x64xf32>
    %407 = tpu.transpose %406, [1, 0] : vector<32x64xf32> -> vector<64x32xf32>
    %cst_116 = arith.constant dense<0.000000e+00> : vector<32x32xf32>
    %408 = tpu.matmul %406, %407, %cst_116 {dimension_numbers = #tpu.dot_dimension_numbers<[1], [0], [0], [1], [0, 0, 1, 1], [], []>} : vector<32x64xf32>, vector<64x32xf32>, vector<32x32xf32> -> vector<32x32xf32>
    %cst_117 = arith.constant 1.250000e-01 : f32
    %409 = vector.broadcast %cst_117 : f32 to vector<32x32xf32>
    %410 = arith.mulf %408, %409 : vector<32x32xf32>
    %c0_118 = arith.constant 0 : index
    %c0_119 = arith.constant 0 : index
    %411 = vector.load %arg13[%c0_118, %c0_119] : memref<32x32xf32, #tpu.memory_space<vmem>>, vector<32x32xf32>
    %412 = arith.addf %410, %411 : vector<32x32xf32>
    %cst_120 = arith.constant dense<0xFF800000> : vector<32xf32>
    %413 = vector.multi_reduction <maximumf>, %412, %cst_120 [1] : vector<32x32xf32> to vector<32xf32>
    %414 = vector.shape_cast %413 : vector<32xf32> to vector<32x1xf32>
    %415 = vector.broadcast %414 : vector<32x1xf32> to vector<32x32xf32>
    %416 = arith.subf %412, %415 : vector<32x32xf32>
    %417 = math.exp %416 : vector<32x32xf32>
    %cst_121 = arith.constant dense<0.000000e+00> : vector<32xf32>
    %418 = vector.multi_reduction <add>, %417, %cst_121 [1] : vector<32x32xf32> to vector<32xf32>
    %419 = vector.shape_cast %418 : vector<32xf32> to vector<32x1xf32>
    %420 = vector.broadcast %419 : vector<32x1xf32> to vector<32x32xf32>
    %421 = arith.divf %417, %420 : vector<32x32xf32>
    %cst_122 = arith.constant 0.000000e+00 : f32
    %422 = vector.broadcast %cst_122 : f32 to vector<4x32xf32>
    %423 = vector.extract_strided_slice %421 {offsets = [0, 0], sizes = [4, 32], strides = [1, 1]} : vector<32x32xf32> to vector<4x32xf32>
    %424 = arith.addf %422, %423 : vector<4x32xf32>
    %425 = vector.extract_strided_slice %421 {offsets = [4, 0], sizes = [4, 32], strides = [1, 1]} : vector<32x32xf32> to vector<4x32xf32>
    %426 = arith.addf %424, %425 : vector<4x32xf32>
    %427 = vector.extract_strided_slice %421 {offsets = [8, 0], sizes = [4, 32], strides = [1, 1]} : vector<32x32xf32> to vector<4x32xf32>
    %428 = arith.addf %426, %427 : vector<4x32xf32>
    %429 = vector.extract_strided_slice %421 {offsets = [12, 0], sizes = [4, 32], strides = [1, 1]} : vector<32x32xf32> to vector<4x32xf32>
    %430 = arith.addf %428, %429 : vector<4x32xf32>
    %431 = vector.extract_strided_slice %421 {offsets = [16, 0], sizes = [4, 32], strides = [1, 1]} : vector<32x32xf32> to vector<4x32xf32>
    %432 = arith.addf %430, %431 : vector<4x32xf32>
    %433 = vector.extract_strided_slice %421 {offsets = [20, 0], sizes = [4, 32], strides = [1, 1]} : vector<32x32xf32> to vector<4x32xf32>
    %434 = arith.addf %432, %433 : vector<4x32xf32>
    %435 = vector.extract_strided_slice %421 {offsets = [24, 0], sizes = [4, 32], strides = [1, 1]} : vector<32x32xf32> to vector<4x32xf32>
    %436 = arith.addf %434, %435 : vector<4x32xf32>
    %437 = vector.extract_strided_slice %421 {offsets = [28, 0], sizes = [4, 32], strides = [1, 1]} : vector<32x32xf32> to vector<4x32xf32>
    %438 = arith.addf %436, %437 : vector<4x32xf32>
    %cst_123 = arith.constant dense<0.000000e+00> : vector<4x64xf32>
    %439 = tpu.matmul %438, %406, %cst_123 {dimension_numbers = #tpu.dot_dimension_numbers<[1], [0], [0], [1], [0, 0, 1, 1], [], []>} : vector<4x32xf32>, vector<32x64xf32>, vector<4x64xf32> -> vector<4x64xf32>
    %c0_124 = arith.constant 0 : index
    %c0_125 = arith.constant 0 : index
    %440 = vector.load %arg9[%c0_124, %c0_125] : memref<64x128xf32, #tpu.memory_space<vmem>>, vector<64x128xf32>
    %cst_126 = arith.constant dense<0.000000e+00> : vector<4x128xf32>
    %441 = tpu.matmul %439, %440, %cst_126 {dimension_numbers = #tpu.dot_dimension_numbers<[1], [0], [0], [1], [0, 0, 1, 1], [], []>} : vector<4x64xf32>, vector<64x128xf32>, vector<4x128xf32> -> vector<4x128xf32>
    %c0_127 = arith.constant 0 : index
    %c0_128 = arith.constant 0 : index
    %442 = vector.load %arg10[%c0_127, %c0_128] : memref<1x128xf32, #tpu.memory_space<vmem>>, vector<1x128xf32>
    %443 = vector.broadcast %442 : vector<1x128xf32> to vector<4x128xf32>
    %444 = arith.addf %441, %443 : vector<4x128xf32>
    %cst_129 = arith.constant 0.000000e+00 : f32
    %445 = vector.broadcast %cst_129 : f32 to vector<4x128xf32>
    %446 = arith.maximumf %444, %445 : vector<4x128xf32>
    %c0_130 = arith.constant 0 : index
    %c0_131 = arith.constant 0 : index
    %447 = vector.load %arg11[%c0_130, %c0_131] : memref<128x2xf32, #tpu.memory_space<vmem>>, vector<128x2xf32>
    %cst_132 = arith.constant dense<0.000000e+00> : vector<4x2xf32>
    %448 = tpu.matmul %446, %447, %cst_132 {dimension_numbers = #tpu.dot_dimension_numbers<[1], [0], [0], [1], [0, 0, 1, 1], [], []>} : vector<4x128xf32>, vector<128x2xf32>, vector<4x2xf32> -> vector<4x2xf32>
    %c0_133 = arith.constant 0 : index
    %c0_134 = arith.constant 0 : index
    %449 = vector.load %arg12[%c0_133, %c0_134] : memref<1x2xf32, #tpu.memory_space<vmem>>, vector<1x2xf32>
    %450 = vector.broadcast %449 : vector<1x2xf32> to vector<4x2xf32>
    %451 = arith.addf %448, %450 : vector<4x2xf32>
    %cst_135 = arith.constant dense<0xFF800000> : vector<4xf32>
    %452 = vector.multi_reduction <maximumf>, %451, %cst_135 [1] : vector<4x2xf32> to vector<4xf32>
    %453 = vector.shape_cast %452 : vector<4xf32> to vector<4x1xf32>
    %454 = vector.broadcast %453 : vector<4x1xf32> to vector<4x2xf32>
    %455 = arith.subf %451, %454 : vector<4x2xf32>
    %456 = math.exp %455 : vector<4x2xf32>
    %cst_136 = arith.constant dense<0.000000e+00> : vector<4xf32>
    %457 = vector.multi_reduction <add>, %456, %cst_136 [1] : vector<4x2xf32> to vector<4xf32>
    %458 = vector.shape_cast %457 : vector<4xf32> to vector<4x1xf32>
    %459 = vector.broadcast %458 : vector<4x1xf32> to vector<4x2xf32>
    %460 = arith.divf %456, %459 : vector<4x2xf32>
    %c0_137 = arith.constant 0 : index
    %c0_138 = arith.constant 0 : index
    %461 = vector.load %arg14[%c0_137, %c0_138] : memref<4x2xf32, #tpu.memory_space<vmem>>, vector<4x2xf32>
    tpu.vector_store %arg14[%c0_137, %c0_138], %460 {strides = array<i32>} : memref<4x2xf32, #tpu.memory_space<vmem>>, vector<4x2xf32>,
    return
  }
}

</mosaic_0001>

<bundles_post_ra>
// kernel: bilstm_attention1_forward.1
= control target key start
LH: loop header
LB: loop body
LE: loop exit
PB: predicated region body
PF: predicated region fallthrough
CT: control target
= control target key end

     0   :  { %19 = vsyncpa [#allocation5], 0  ;;  %s4663_s0 = inlined_call_operand.vmem [shape: f32[32,12], index: 0, kind: input, shape index: {}]   ;;  %s4664_s1 = inlined_call_operand.hbm [shape: f32[12,256], index: 1, kind: input, shape index: {}]   ;;  %s4665_s2 = inlined_call_operand.hbm [shape: f32[12,256], index: 2, kind: input, shape index: {}]   ;;  %s4666_s3 = inlined_call_operand.vmem [shape: f32[1,256], index: 3, kind: input, shape index: {}]   ;;  %s4667_s4 = inlined_call_operand.vmem [shape: f32[64,256], index: 4, kind: input, shape index: {}]   ;;  %s4668_s5 = inlined_call_operand.vmem [shape: f32[64,256], index: 5, kind: input, shape index: {}]   ;;  %s4669_s6 = inlined_call_operand.vmem [shape: f32[64,256], index: 6, kind: input, shape index: {}]   ;;  %s4670_s7 = inlined_call_operand.vmem [shape: f32[1,256], index: 7, kind: input, shape index: {}]   ;;  %s4671_s8 = inlined_call_operand.hbm [shape: f32[64,256], index: 8, kind: input, shape index: {}]   ;;  %s4672_s9 = inlined_call_operand.hbm [shape: f32[64,128], index: 9, kind: input, shape index: {}]   ;;  %s4673_s10 = inlined_call_operand.hbm [shape: f32[1,128], index: 10, kind: input, shape index: {}]   ;;  %s4674_s11 = inlined_call_operand.vmem [shape: f32[128,2], index: 11, kind: input, shape index: {}]   ;;  %s4675_s12 = inlined_call_operand.hbm [shape: f32[1,2], index: 12, kind: input, shape index: {}]   ;;  %s4676_s13 = inlined_call_operand.vmem [shape: f32[32,32], index: 13, kind: input, shape index: {}]   ;;  %s4677_s14 = inlined_call_operand.vmem [shape: f32[4,2], index: 14, kind: output, shape index: {}]  }
   0x1   :  { %20 = vsyncpa [#allocation7], 0 }
   0x2   :  { %21 = vsyncpa [#allocation10], 0 }
   0x3   :  { %22 = vsyncpa [#allocation13], 0  ;;  %s3818_s29 = smov [#allocation6]   ;;  %s3819_s15 = smov [#allocation9]  }
   0x4   :  { %s42_s30 = sshll.u32 %s3818_s29, 4  ;;  %s76_s16 = sshll.u32 %s3819_s15, 4  ;;  %s43_s30 = int_to_ptr.vmem [resolvable:$true] %s42_s30  ;;  %s3908_s16 = int_to_ptr.vmem [resolvable:$true] %s76_s16 }
   0x5   :  { %s3678_s19 = scalar_lea.hbm %s4665_s2, 512 }
   0x6   :  { %p3679_p0 = scmp.ne.s32.totalorder %s4665_s2, %s3678_s19  ;;  %p3682_p1 = scmp.lt.u32.totalorder %s3678_s19, %s4665_s2 }
   0x8   :  { %p3684_p2 = pnand %p3682_p1, %p3679_p0 }
   0xa   :  { %3687 = shalt.err (!%p3684_p2)
}
   0xb   :  { %s3688_s24 = scalar_lea.vmem %s43_s30, 512  ;;  %p3693_p4 = scmp.lt.s32.totalorder %s43_s30, %s43_s30 }
   0xc   :  { %p3689_p3 = scmp.ne.s32.totalorder %s43_s30, %s3688_s24  ;;  %p3694_p5 = scmp.lt.s32.totalorder %s3688_s24, %s3688_s24 }
   0xe   :  { %p3695_p6 = por %p3694_p5, %p3693_p4 }
  0x10   :  { %p3696_p7 = pnand %p3695_p6, %p3689_p3 }
  0x12   :  { %3699 = shalt.err (!%p3696_p7)
}
  0x13   :  { %s4678_s25 = smov 256   ;;  %s3821_s26 = smov 16  }
  0x14   :  { %48 = dma.hbm_to_vmem [thread:$0]  %s4665_s2, 512, %s43_s30, [#allocation7], %s4678_s25, %s4678_s25, %s3821_s26  }
  0x15   :  { %s3700_s17 = scalar_lea.hbm %s4672_s9, 1024 }
  0x16   :  { %p3701_p8 = scmp.ne.s32.totalorder %s4672_s9, %s3700_s17  ;;  %p3704_p9 = scmp.lt.u32.totalorder %s3700_s17, %s4672_s9 }
  0x18   :  { %p3706_p10 = pnand %p3704_p9, %p3701_p8 }
  0x1a   :  { %3709 = shalt.err (!%p3706_p10)
}
  0x1b   :  { %s3710_s22 = scalar_lea.vmem %s3908_s16, 1024  ;;  %p3715_p12 = scmp.lt.s32.totalorder %s3908_s16, %s3908_s16 }
  0x1c   :  { %p3711_p11 = scmp.ne.s32.totalorder %s3908_s16, %s3710_s22  ;;  %p3716_p13 = scmp.lt.s32.totalorder %s3710_s22, %s3710_s22 }
  0x1e   :  { %p3717_p0 = por %p3716_p13, %p3715_p12 }
  0x20   :  { %p3718_p1 = pnand %p3717_p0, %p3711_p11 }
  0x22   :  { %3721 = shalt.err (!%p3718_p1)
}
  0x23   :  { %s3822_s2 = smov 128   ;;  %s3823_s30 = smov 8  }
  0x24   :  { %82 = dma.hbm_to_vmem [thread:$0]  %s4672_s9, 1024, %s3908_s16, [#allocation10], %s3822_s2, %s3822_s2, %s3823_s30  }
  0x25   :  { %s3824_s27 = smov [#allocation4]   ;;  %s3825_s29 = smov [#allocation8]  }
  0x26   :  { %s30_s28 = sshll.u32 %s3824_s27, 4  ;;  %s64_s15 = sshll.u32 %s3825_s29, 4  ;;  %s31_s28 = int_to_ptr.vmem [resolvable:$true] %s30_s28  ;;  %s3942_s15 = int_to_ptr.vmem [resolvable:$true] %s64_s15 }
  0x27   :  { %s3722_s19 = scalar_lea.hbm %s4664_s1, 512 }
  0x28   :  { %p3723_p2 = scmp.ne.s32.totalorder %s4664_s1, %s3722_s19  ;;  %p3726_p3 = scmp.lt.u32.totalorder %s3722_s19, %s4664_s1 }
  0x2a   :  { %p3728_p4 = pnand %p3726_p3, %p3723_p2 }
  0x2c   :  { %3731 = shalt.err (!%p3728_p4)
}
  0x2d   :  { %s3732_s9 = scalar_lea.vmem %s31_s28, 512  ;;  %p3737_p6 = scmp.lt.s32.totalorder %s31_s28, %s31_s28 }
  0x2e   :  { %p3733_p5 = scmp.ne.s32.totalorder %s31_s28, %s3732_s9  ;;  %p3738_p7 = scmp.lt.s32.totalorder %s3732_s9, %s3732_s9 }
  0x30   :  { %p3739_p8 = por %p3738_p7, %p3737_p6 }
  0x32   :  { %p3740_p9 = pnand %p3739_p8, %p3733_p5 }
  0x34   :  { %3743 = shalt.err (!%p3740_p9)
}
  0x35   :  { %s4680_s16 = smov 256   ;;  %s3744_s25 = scalar_lea.hbm %s4671_s8, 2048 }
  0x36   :  { %36 = dma.hbm_to_vmem [thread:$0]  %s4664_s1, 512, %s31_s28, [#allocation5], %s4680_s16, %s4680_s16, %s3821_s26  }
  0x37   :  { %p3745_p10 = scmp.ne.s32.totalorder %s4671_s8, %s3744_s25  ;;  %p3748_p11 = scmp.lt.u32.totalorder %s3744_s25, %s4671_s8 }
  0x39   :  { %p3750_p12 = pnand %p3748_p11, %p3745_p10 }
  0x3b   :  { %3753 = shalt.err (!%p3750_p12)
}
  0x3c   :  { %s3754_s19 = scalar_lea.vmem %s3942_s15, 2048  ;;  %p3759_p0 = scmp.lt.s32.totalorder %s3942_s15, %s3942_s15 }
  0x3d   :  { %p3755_p13 = scmp.ne.s32.totalorder %s3942_s15, %s3754_s19  ;;  %p3760_p1 = scmp.lt.s32.totalorder %s3754_s19, %s3754_s19 }
  0x3f   :  { %p3761_p2 = por %p3760_p1, %p3759_p0 }
  0x41   :  { %p3762_p3 = pnand %p3761_p2, %p3755_p13 }
  0x43   :  { %3765 = shalt.err (!%p3762_p3)
}
  0x44   :  { %70 = dma.hbm_to_vmem [thread:$0]  %s4671_s8, 2048, %s3942_s15, [#allocation7], %s4680_s16, %s4680_s16, %s3821_s26  }
  0x45   :  { %s3826_s20 = smov [#allocation11]   ;;  %s3827_s22 = smov [#allocation12]  }
  0x46   :  { %s89_s21 = sshll.u32 %s3826_s20, 4  ;;  %s101_s9 = sshll.u32 %s3827_s22, 4  ;;  %s90_s21 = int_to_ptr.vmem [resolvable:$true] %s89_s21  ;;  %s102_s9 = int_to_ptr.vmem [resolvable:$true] %s101_s9 }
  0x47   :  { %s3766_s23 = scalar_lea.hbm %s4673_s10, 16 }
  0x48   :  { %p3767_p4 = scmp.ne.s32.totalorder %s4673_s10, %s3766_s23  ;;  %p3770_p5 = scmp.lt.u32.totalorder %s3766_s23, %s4673_s10 }
  0x4a   :  { %p3772_p6 = pnand %p3770_p5, %p3767_p4 }
  0x4c   :  { %3775 = shalt.err (!%p3772_p6)
}
  0x4d   :  { %s3776_s8 = scalar_lea.vmem %s90_s21, 16  ;;  %s3780_s26 = scalar_lea.vmem %s90_s21, 32 }
  0x4e   :  { %p3777_p7 = scmp.ne.s32.totalorder %s90_s21, %s3776_s8  ;;  %p3781_p8 = scmp.lt.s32.totalorder %s90_s21, %s90_s21 }
  0x4f   :  { %p3782_p9 = scmp.lt.s32.totalorder %s3780_s26, %s3776_s8 }
  0x51   :  { %p3783_p10 = por %p3782_p9, %p3781_p8 }
  0x53   :  { %p3784_p11 = pnand %p3783_p10, %p3777_p7 }
  0x55   :  { %3787 = shalt.err (!%p3784_p11)
}
  0x56   :  { %92 = dma.hbm_to_vmem [thread:$0]  %s4673_s10, 16, %s90_s21, [#allocation10]  }
  0x57   :  { %s3788_s19 = scalar_lea.hbm %s4675_s12, 16 }
  0x58   :  { %p3789_p12 = scmp.ne.s32.totalorder %s4675_s12, %s3788_s19  ;;  %p3792_p13 = scmp.lt.u32.totalorder %s3788_s19, %s4675_s12 }
  0x5a   :  { %p3794_p0 = pnand %p3792_p13, %p3789_p12 }
  0x5c   :  { %3797 = shalt.err (!%p3794_p0)
}
  0x5d   :  { %s3798_s2 = scalar_lea.vmem %s102_s9, 16  ;;  %s3802_s30 = scalar_lea.vmem %s102_s9, 32 }
  0x5e   :  { %p3799_p1 = scmp.ne.s32.totalorder %s102_s9, %s3798_s2  ;;  %p3803_p2 = scmp.lt.s32.totalorder %s102_s9, %s102_s9 }
  0x5f   :  { %p3804_p3 = scmp.lt.s32.totalorder %s3802_s30, %s3798_s2 }
  0x61   :  { %p3805_p4 = por %p3804_p3, %p3803_p2 }
  0x63   :  { %p3806_p5 = pnand %p3805_p4, %p3799_p1 }
  0x65   :  { %3809 = shalt.err (!%p3806_p5)
}
  0x66   :  { %104 = dma.hbm_to_vmem [thread:$0]  %s4675_s12, 16, %s102_s9, [#allocation13]  }
  0x67   :  { %3810 = dma.done.wait [#allocation5], 512  }
  0x68   :  { %3811 = vsyncadd [#allocation5], 4294966784 }
  0x69   :  { %3812 = dma.done.wait [#allocation7], 2560  }
  0x6a   :  { %3813 = vsyncadd [#allocation7], 4294964736 }
  0x6b   :  { %3814 = dma.done.wait [#allocation10], 1040  }
  0x6c   :  { %3815 = vsyncadd [#allocation10], 4294966256 }
  0x6d   :  { %3816 = dma.done.wait [#allocation13], 16  }
  0x6e   :  { %3817 = vsyncadd [#allocation13], 4294967280  ;;  %v3828_v0 = vmov 0.0   ;;  %vm178_vm0 = vcmask 1043456   ;;  %vm3829_vm1 = vmmov 1   ;;  %v130_v2 = vld [vmem:[#allocation4 + $0x8] sm:$0xff]  ;;  %v155_v42 = vlaneseq }
  0x6f   :  { %249 = vmatprep.mubr.f32.mxu0 %v3828_v0  ;;  %344 = vmatprep.mubr.f32.mxu1 %v3828_v0  ;;  %vm4005_vm2 = vmpackc.low %vm178_vm0, %vm3829_vm1  ;;  %v132_v3 = vld [vmem:[#allocation4 + $0x18] sm:$0xf]  ;;  %v134_v4 = vld [vmem:[#allocation6 + $0x8] sm:$0xff]  ;;  %vm165_vm3 = vcmask 97280   ;;  %vm480_vm4 = vcmask 257024   ;;  %vm482_vm5 = vcmask 519424  }
  0x70   :  { %v3097_v5 = vpack.c.bf16 %v132_v3, %v130_v2  ;;  %v136_v6 = vld [vmem:[#allocation6 + $0x18] sm:$0xf]  ;;  %v129_v7 = vld [vmem:[#allocation4] sm:$0xff]  ;;  %v131_v8 = vld [vmem:[#allocation4 + $0x10] sm:$0xf]  ;;  %v4137_v43 = vshrl.u32 %v155_v42, 7 }
  0x71   :  { %v3103_v9 = vpack.c.bf16 %v136_v6, %v134_v4  ;;  %v3100_v10 = vpack.c.bf16 %v131_v8, %v129_v7  ;;  %v133_v11 = vld [vmem:[#allocation6] sm:$0xff]  ;;  %v135_v12 = vld [vmem:[#allocation6 + $0x10] sm:$0xf]  ;;  %v139_v14 = vld [vmem:[%s4667_s4 + $0x8] sm:$0xff]  ;;  %vm377_vm6 = vcmask 523264   ;;  %vm594_vm7 = vcmask 261124  }
  0x72   :  { %3099 = vmatprep.subr.msk.bf16.mxu0 %vm4005_vm2, %v3097_v5  ;;  %v3106_v13 = vpack.c.bf16 %v135_v12, %v133_v11  ;;  %v141_v15 = vld [vmem:[%s4667_s4 + $0x18] sm:$0xff]  ;;  %v138_v16 = vld [vmem:[%s4667_s4] sm:$0xff]  ;;  %v140_v19 = vld [vmem:[%s4667_s4 + $0x10] sm:$0xff]  ;;  %v157_v44 = vsub.s32 0, %v4137_v43  ;;  %v161_v46 = vsub.s32 1, %v4137_v43  ;;  %vm596_vm8 = vcmask 523524  }
  0x73   :  { %3105 = vmatprep.subr.msk.bf16.mxu1 %vm4005_vm2, %v3103_v9  ;;  %3102 = vmatpush1.bf16.msk.msra.mxu0 %vm4005_vm2, %v3100_v10  ;;  %v125_v17 = vld [vmem:[%s4663_s0] sm:$0xff]  ;;  %v4027_v18 = vpack.c.bf16 %v141_v15, %v139_v14  ;;  %v143_v20 = vld [vmem:[%s4667_s4 + $0x28] sm:$0xff]  ;;  %v4037_v21 = vpack.c.bf16 %v140_v19, %v138_v16  ;;  %v145_v22 = vld [vmem:[%s4667_s4 + $0x38] sm:$0xff]  ;;  %vm2560_vm10 = vcmask 261120   ;;  %vm3832_vm11 = vmmov 0  }
  0x74   :  { %3108 = vmatpush1.bf16.msk.msra.mxu1 %vm4005_vm2, %v3106_v13  ;;  %v4043_v23 = vpack.c.bf16 %v145_v22, %v143_v20  ;;  %v142_v24 = vld [vmem:[%s4667_s4 + $0x20] sm:$0xff]  ;;  %v144_v25 = vld [vmem:[%s4667_s4 + $0x30] sm:$0xff]  ;;  %v147_v26 = vld [vmem:[%s4667_s4 + $0x48] sm:$0xff]  ;;  %vm2880_vm12 = vcmask 11264  }
  0x75   :  { %3110 = vmatprep.subr.bf16.mxu1 %v4027_v18  ;;  %3142 = vmatprep.subr.bf16.mxu0 %v4027_v18  ;;  %v149_v27 = vld [vmem:[%s4667_s4 + $0x58] sm:$0xff]  ;;  %v126_v28 = vld [vmem:[%s4663_s0 + $0x8] sm:$0xff]  ;;  %v4066_v29 = vpack.c.bf16 %v144_v25, %v142_v24  ;;  %v146_v31 = vld [vmem:[%s4667_s4 + $0x40] sm:$0xff] }
  0x76   :  { %2903 = vmatmul.mubr.msk.f32.vlgmr.msra.gmra.mrb[0].mxu0 %vm165_vm3, %v125_v17  ;;  %v4069_v30 = vpack.c.bf16 %v149_v27, %v147_v26  ;;  %v148_v32 = vld [vmem:[%s4667_s4 + $0x50] sm:$0xff]  ;;  %v151_v33 = vld [vmem:[%s4667_s4 + $0x68] sm:$0xff]  ;;  %v153_v34 = vld [vmem:[%s4667_s4 + $0x78] sm:$0xff] }
  0x77   :  { %2909 = vmatmul.mubr.msk.f32.vlgmr.msra.gmra.mrb[0].mxu1 %vm165_vm3, %v125_v17  ;;  %255 = vmatprep.mubr.f32.mxu0 %v3828_v0  ;;  %v127_v35 = vld [vmem:[%s4663_s0 + $0x10] sm:$0xff]  ;;  %v4093_v36 = vpack.c.bf16 %v148_v32, %v146_v31  ;;  %v4096_v37 = vpack.c.bf16 %v153_v34, %v151_v33  ;;  %v150_v38 = vld [vmem:[%s4667_s4 + $0x60] sm:$0xff]  ;;  %v128_v40 = vld [vmem:[%s4663_s0 + $0x18] sm:$0xff] }
  0x78   :  { %3112 = vmatpush1.bf16.msra.mxu1 %v4037_v21  ;;  %350 = vmatprep.mubr.f32.mxu1 %v3828_v0  ;;  %v152_v39 = vld [vmem:[%s4667_s4 + $0x70] sm:$0xff]  ;;  %v137_v45 = vld [vmem:[%s4666_s3] sm:$0x3]  ;;  %s3830_s3 = smov 64   ;;  %vm3398_vm9 = vmpackc.low %vm377_vm6, %vm377_vm6 }
  0x79   :  { %3114 = vmatprep.subr.bf16.mxu1 %v4043_v23  ;;  %3144 = vmatpush1.bf16.msra.mxu0 %v4037_v21  ;;  %v4114_v41 = vpack.c.bf16 %v152_v39, %v150_v38  ;;  %v158_v49 = vrot.slane %v137_v45, %v157_v44  ;;  %v162_v52 = vrot.slane %v137_v45, %v161_v46 }
  0x7a   :  { %2904 = vmatmul.mubr.msk.f32.gmra.mrb[2].mxu0 %vm165_vm3, %v126_v28  ;;  %3146 = vmatprep.subr.bf16.mxu0 %v4043_v23 }
  0x7b   :  { %2910 = vmatmul.mubr.msk.f32.gmra.mrb[2].mxu1 %vm165_vm3, %v126_v28  ;;  %261 = vmatprep.mubr.f32.mxu0 %v3828_v0 }
  0x7c   :  { %3116 = vmatpush1.bf16.msra.mxu1 %v4066_v29  ;;  %356 = vmatprep.mubr.f32.mxu1 %v3828_v0 }
  0x7d   :  { %3118 = vmatprep.subr.bf16.mxu1 %v4069_v30  ;;  %3148 = vmatpush1.bf16.msra.mxu0 %v4066_v29 }
  0x7e   :  { %2905 = vmatmul.mubr.msk.f32.gmra.mrb[4].mxu0 %vm165_vm3, %v127_v35  ;;  %3150 = vmatprep.subr.bf16.mxu0 %v4069_v30 }
  0x7f   :  { %2911 = vmatmul.mubr.msk.f32.gmra.mrb[4].mxu1 %vm165_vm3, %v127_v35  ;;  %267 = vmatprep.mubr.f32.mxu0 %v3828_v0 }
  0x80   :  { %3120 = vmatpush1.bf16.msra.mxu1 %v4093_v36  ;;  %362 = vmatprep.mubr.f32.mxu1 %v3828_v0 }
  0x81   :  { %3122 = vmatprep.subr.bf16.mxu1 %v4096_v37  ;;  %3152 = vmatpush1.bf16.msra.mxu0 %v4093_v36 }
  0x82   :  { %2906 = vmatmul.mubr.msk.f32.gmra.mrb[6].mxu0 %vm165_vm3, %v128_v40  ;;  %3154 = vmatprep.subr.bf16.mxu0 %v4096_v37 }
  0x83   :  { %2912 = vmatmul.mubr.msk.f32.gmra.mrb[6].mxu1 %vm165_vm3, %v128_v40  ;;  %675 = vmatprep.mubr.f32.mxu0 %v3828_v0 }
  0x84   :  { %3124 = vmatpush1.bf16.msra.mxu1 %v4114_v41  ;;  %445 = vmatprep.mubr.f32.mxu1 %v3828_v0 }
  0x85   :  { %3126 = vmatprep.subr.bf16.mxu1 %v4027_v18  ;;  %3156 = vmatpush1.bf16.msra.mxu0 %v4114_v41 }
  0x86   :  { %3174 = vmatprep.subr.bf16.mxu0 %v4027_v18 }
  0x87   :  { %446 = vmatmul.mubr.f32.vlgmr.msra.gmra.mrb[8].mxu1 %v3828_v0 }
  0x88   :  { %3128 = vmatpush1.bf16.msra.mxu1 %v4037_v21  ;;  %550 = vmatprep.mubr.f32.mxu1 %v3828_v0 }
  0x89   :  { %3130 = vmatprep.subr.bf16.mxu1 %v4043_v23 }
  0x8c   :  { %3132 = vmatpush1.bf16.msra.mxu1 %v4066_v29 }
  0x8d   :  { %3134 = vmatprep.subr.bf16.mxu1 %v4069_v30 }
  0x90   :  { %3136 = vmatpush1.bf16.msra.mxu1 %v4093_v36 }
  0x91   :  { %3138 = vmatprep.subr.bf16.mxu1 %v4096_v37 }
  0x94   :  { %3140 = vmatpush1.bf16.msra.mxu1 %v4114_v41 }
  0x95   :  { %3158 = vmatprep.subr.bf16.mxu1 %v4027_v18 }
 0x149   :  { %v251_v47 = vpop.f32.mrb[0].mxu0 }
 0x14a   :  { %v346_v48 = vpop.f32.mrb[0].mxu1  ;;  %v253_v50 = vpop.f32.mrb[1].mxu0  ;;  %v252_v7 = vadd.f32 %v251_v47, %v158_v49 }
 0x14b   :  { %v348_v51 = vpop.f32.mrb[1].mxu1  ;;  %v1058_v11 = vrot.slane %v346_v48, 4  ;;  %v254_v12 = vadd.f32 %v253_v50, %v162_v52 }
 0x14c   :  { %v1059_v17 = vrot.slane %v348_v51, 4 }
 0x14d   :  { %v257_v53 = vpop.f32.mrb[2].mxu0 }
 0x14e   :  { %v352_v54 = vpop.f32.mrb[2].mxu1  ;;  %v258_v55 = vadd.f32 %v257_v53, %v158_v49  ;;  %v259_v56 = vpop.f32.mrb[3].mxu0 }
 0x14f   :  { %v354_v57 = vpop.f32.mrb[3].mxu1  ;;  %v260_v58 = vadd.f32 %v259_v56, %v162_v52  ;;  %v829_v60 = vrot.slane %v352_v54, 4 }
 0x150   :  { %v830_v1 = vrot.slane %v354_v57, 4 }
 0x151   :  { %v263_v59 = vpop.f32.mrb[4].mxu0 }
 0x152   :  { %v264_v61 = vadd.f32 %v263_v59, %v158_v49  ;;  %v358_v62 = vpop.f32.mrb[4].mxu1  ;;  %v265_v63 = vpop.f32.mrb[5].mxu0 }
 0x153   :  { %v600_v2 = vrot.slane %v358_v62, 4  ;;  %v266_v3 = vadd.f32 %v265_v63, %v162_v52  ;;  %v360_v4 = vpop.f32.mrb[5].mxu1 }
 0x154   :  { %v601_v5 = vrot.slane %v360_v4, 4  ;;  %v4148_v6 = vadd.f32 %v829_v60, %v264_v61 }
 0x155   :  { %v269_v8 = vpop.f32.mrb[6].mxu0  ;;  %v4150_v9 = vadd.f32 %v600_v2, %v258_v55  ;;  %v4152_v10 = vadd.f32 %v830_v1, %v266_v3 }
 0x156   :  { %v270_v13 = vadd.f32 %v269_v8, %v158_v49  ;;  %v364_v14 = vpop.f32.mrb[6].mxu1  ;;  %v271_v15 = vpop.f32.mrb[7].mxu0  ;;  %v4154_v16 = vadd.f32 %v601_v5, %v260_v58 }
 0x157   :  { %v371_v19 = vrot.slane %v364_v14, 4  ;;  %v272_v20 = vadd.f32 %v271_v15, %v162_v52  ;;  %v366_v22 = vpop.f32.mrb[7].mxu1 }
 0x158   :  { %v372_v24 = vrot.slane %v366_v22, 4  ;;  %v4156_v25 = vadd.f32 %v1058_v11, %v270_v13 }
 0x159   :  { %v375_v26 = vadd.f32 %v371_v19, %v252_v7  ;;  %v4158_v27 = vadd.f32 %v1059_v17, %v272_v20 }
 0x15a   :  { %v447_v28 = vpop.f32.mrb[8].mxu1  ;;  %v376_v31 = vadd.f32 %v372_v24, %v254_v12 }
 0x15b   :  { %v452_v32 = vadd.f32 %v447_v28, %v375_v26  ;;  %v449_v33 = vpop.f32.mrb[9].mxu1 }
 0x15c   :  { %v453_v35 = vadd.f32 %v449_v33, %v376_v31 }
 0x15d   :  { %v2913_v34 = vmul.f32 -1.442695, %v452_v32 }
 0x15e   :  { %v2914_v47 = vmul.f32 -1.442695, %v453_v35 }
 0x15f   :  { %3466 = vpow2.f32 %v2913_v34 }
 0x160   :  { %3468 = vtanh.f32 %v453_v35 }
 0x169   :  { %v3467_v38 = vpop.eup %3466 }
 0x16a   :  { %v460_v39 = vadd.f32 1.0, %v3467_v38  ;;  %v3469_v40 = vpop.eup %3468 }
 0x16c   :  { %3470 = vrcp.f32 %v460_v39 }
 0x16d   :  { %3472 = vpow2.f32 %v2914_v47 }
 0x176   :  { %v3471_v42 = vpop.eup %3470 }
 0x177   :  { %v468_v45 = vmul.f32 %v3471_v42, %v3469_v40  ;;  %v3473_v48 = vpop.eup %3472  ;;  %v467_v50 = vmul.f32 0.0, %v3471_v42 }
 0x178   :  { %v461_v49 = vadd.f32 1.0, %v3473_v48 }
 0x179   :  { %470 = vrot.lane.b32.xlu0 %v468_v45, %s3830_s3 }
 0x17a   :  { %3474 = vrcp.f32 %v461_v49 }
 0x184   :  { %v3475_v53 = vpop.eup %3474 }
 0x1eb   :  { %v471_v51 = vpop.permute.xlu0 %470 }
 0x1ec   :  { %v473_v52 = vadd.f32 %v471_v51, %v467_v50 }
 0x1ee   :  { %3476 = vtanh.f32 %v473_v52  ;;  %v579_v4 = vrot.slane %v473_v52, 4 }
 0x1f8   :  { %v3477_v54 = vpop.eup %3476 }
 0x1f9   :  { %v475_v55 = vmul.f32 %v3477_v54, %v3475_v53 }
 0x1fb   :  { %477 = vrot.lane.b32.xlu0 %v475_v55, %s3830_s3 }
 0x26d   :  { %v478_v56 = vpop.permute.xlu0 %477 }
 0x26e   :  { %481 = vst.msk [vmem:[#allocation2] sm:$0xf] %vm480_vm4, %v478_v56  ;;  %2915 = vmatmul.mubr.msk.f32.vlgmr.msra.gmra.mrb[10].mxu1 %vm377_vm6, %v478_v56 }
 0x26f   :  { %483 = vst.msk [vmem:[#allocation2 + $0x1c] sm:$0xf] %vm482_vm5, %v478_v56  ;;  %3160 = vmatpush1.bf16.msra.mxu1 %v4037_v21  ;;  %781 = vmatprep.mubr.f32.mxu1 %v3828_v0 }
 0x270   :  { %3162 = vmatprep.subr.bf16.mxu1 %v4043_v23 }
 0x273   :  { %3164 = vmatpush1.bf16.msra.mxu1 %v4066_v29 }
 0x274   :  { %3166 = vmatprep.subr.bf16.mxu1 %v4069_v30 }
 0x277   :  { %3168 = vmatpush1.bf16.msra.mxu1 %v4093_v36 }
 0x278   :  { %3170 = vmatprep.subr.bf16.mxu1 %v4096_v37 }
 0x27b   :  { %3172 = vmatpush1.bf16.msra.mxu1 %v4114_v41 }
 0x27c   :  { %3190 = vmatprep.subr.bf16.mxu1 %v4027_v18 }
 0x341   :  { %v552_v57 = vpop.f32.mrb[10].mxu1 }
 0x342   :  { %v559_v58 = vrot.slane %v552_v57, 4  ;;  %v554_v59 = vpop.f32.mrb[11].mxu1 }
 0x343   :  { %v560_v62 = vrot.slane %v554_v59, 4 }
 0x344   :  { %v563_v60 = vadd.f32 %v559_v58, %v375_v26 }
 0x345   :  { %v564_v63 = vadd.f32 %v560_v62, %v376_v31 }
 0x346   :  { %v2916_v61 = vmul.f32 -1.442695, %v563_v60 }
 0x347   :  { %v2917_v11 = vmul.f32 -1.442695, %v564_v63 }
 0x348   :  { %3478 = vpow2.f32 %v2916_v61 }
 0x349   :  { %3480 = vtanh.f32 %v564_v63 }
 0x352   :  { %v3479_v1 = vpop.eup %3478 }
 0x353   :  { %v571_v2 = vadd.f32 1.0, %v3479_v1  ;;  %v3481_v3 = vpop.eup %3480 }
 0x355   :  { %3482 = vrcp.f32 %v571_v2 }
 0x356   :  { %3484 = vpow2.f32 %v2917_v11 }
 0x35f   :  { %v3483_v5 = vpop.eup %3482 }
 0x360   :  { %v582_v7 = vmul.f32 %v3483_v5, %v3481_v3  ;;  %v581_v8 = vmul.f32 %v3483_v5, %v579_v4  ;;  %v3485_v12 = vpop.eup %3484 }
 0x361   :  { %v572_v13 = vadd.f32 1.0, %v3485_v12 }
 0x362   :  { %584 = vrot.lane.b32.xlu1 %v582_v7, %s3830_s3 }
 0x363   :  { %3486 = vrcp.f32 %v572_v13 }
 0x36d   :  { %v3487_v17 = vpop.eup %3486 }
 0x3d4   :  { %v585_v14 = vpop.permute.xlu1 %584 }
 0x3d5   :  { %v587_v15 = vadd.f32 %v585_v14, %v581_v8 }
 0x3d7   :  { %3488 = vtanh.f32 %v587_v15  ;;  %v698_v39 = vrot.slane %v587_v15, 4 }
 0x3e1   :  { %v3489_v19 = vpop.eup %3488 }
 0x3e2   :  { %v4175_v20 = vmul.f32 %v3489_v19, %v3487_v17 }
 0x3e4   :  { %v606_v22 = vrot.slane %v4175_v20, 4 }
 0x3e6   :  { %607 = vrot.lane.b32.xlu1 %v606_v22, %s3830_s3 }
 0x458   :  { %v608_v24 = vpop.permute.xlu1 %607 }
 0x459   :  { %2918 = vmatmul.mubr.msk.f32.vlgmr.msra.gmra.mrb[8].mxu0 %vm377_vm6, %v608_v24 }
 0x45a   :  { %3176 = vmatpush1.bf16.msra.mxu0 %v4037_v21  ;;  %904 = vmatprep.mubr.f32.mxu0 %v3828_v0 }
 0x45b   :  { %3178 = vmatprep.subr.bf16.mxu0 %v4043_v23 }
 0x45e   :  { %3180 = vmatpush1.bf16.msra.mxu0 %v4066_v29 }
 0x45f   :  { %3182 = vmatprep.subr.bf16.mxu0 %v4069_v30 }
 0x462   :  { %3184 = vmatpush1.bf16.msra.mxu0 %v4093_v36 }
 0x463   :  { %3186 = vmatprep.subr.bf16.mxu0 %v4096_v37 }
 0x466   :  { %3188 = vmatpush1.bf16.msra.mxu0 %v4114_v41 }
 0x467   :  { %3206 = vmatprep.subr.bf16.mxu0 %v4027_v18 }
 0x52c   :  { %v677_v26 = vpop.f32.mrb[8].mxu0 }
 0x52d   :  { %v682_v28 = vadd.f32 %v677_v26, %v4150_v9  ;;  %v679_v31 = vpop.f32.mrb[9].mxu0 }
 0x52e   :  { %v683_v33 = vadd.f32 %v679_v31, %v4154_v16 }
 0x52f   :  { %v2919_v32 = vmul.f32 -1.442695, %v682_v28 }
 0x530   :  { %v2920_v47 = vmul.f32 -1.442695, %v683_v33 }
 0x531   :  { %3490 = vpow2.f32 %v2919_v32 }
 0x532   :  { %3492 = vtanh.f32 %v683_v33 }
 0x53b   :  { %v3491_v34 = vpop.eup %3490 }
 0x53c   :  { %v690_v35 = vadd.f32 1.0, %v3491_v34  ;;  %v3493_v38 = vpop.eup %3492 }
 0x53e   :  { %3494 = vrcp.f32 %v690_v35 }
 0x53f   :  { %3496 = vpow2.f32 %v2920_v47 }
 0x548   :  { %v3495_v40 = vpop.eup %3494 }
 0x549   :  { %v701_v42 = vmul.f32 %v3495_v40, %v3493_v38  ;;  %v700_v45 = vmul.f32 %v3495_v40, %v698_v39  ;;  %v3497_v48 = vpop.eup %3496 }
 0x54a   :  { %v691_v49 = vadd.f32 1.0, %v3497_v48 }
 0x54b   :  { %703 = vrot.lane.b32.xlu0 %v701_v42, %s3830_s3 }
 0x54c   :  { %3498 = vrcp.f32 %v691_v49 }
 0x556   :  { %v3499_v52 = vpop.eup %3498 }
 0x5bd   :  { %v704_v50 = vpop.permute.xlu0 %703 }
 0x5be   :  { %v706_v51 = vadd.f32 %v704_v50, %v700_v45 }
 0x5c0   :  { %3500 = vtanh.f32 %v706_v51  ;;  %v810_v3 = vrot.slane %v706_v51, 4 }
 0x5ca   :  { %v3501_v53 = vpop.eup %3500 }
 0x5cb   :  { %v708_v54 = vmul.f32 %v3501_v53, %v3499_v52 }
 0x5cd   :  { %710 = vrot.lane.b32.xlu1 %v708_v54, %s3830_s3 }
 0x63f   :  { %v711_v55 = vpop.permute.xlu1 %710 }
 0x640   :  { %713 = vst.msk [vmem:[#allocation2 + $0x8] sm:$0xf] %vm480_vm4, %v711_v55  ;;  %2921 = vmatmul.mubr.msk.f32.vlgmr.msra.gmra.mrb[12].mxu1 %vm377_vm6, %v711_v55 }
 0x641   :  { %714 = vst.msk [vmem:[#allocation2 + $0x14] sm:$0xf] %vm482_vm5, %v711_v55  ;;  %3192 = vmatpush1.bf16.msra.mxu1 %v4037_v21  ;;  %1010 = vmatprep.mubr.f32.mxu1 %v3828_v0 }
 0x642   :  { %3194 = vmatprep.subr.bf16.mxu1 %v4043_v23 }
 0x645   :  { %3196 = vmatpush1.bf16.msra.mxu1 %v4066_v29 }
 0x646   :  { %3198 = vmatprep.subr.bf16.mxu1 %v4069_v30 }
 0x649   :  { %3200 = vmatpush1.bf16.msra.mxu1 %v4093_v36 }
 0x64a   :  { %3202 = vmatprep.subr.bf16.mxu1 %v4096_v37 }
 0x64d   :  { %3204 = vmatpush1.bf16.msra.mxu1 %v4114_v41 }
 0x64e   :  { %3222 = vmatprep.subr.bf16.mxu1 %v4027_v18 }
 0x713   :  { %v783_v56 = vpop.f32.mrb[12].mxu1 }
 0x714   :  { %v790_v57 = vrot.slane %v783_v56, 4  ;;  %v785_v58 = vpop.f32.mrb[13].mxu1 }
 0x715   :  { %v791_v61 = vrot.slane %v785_v58, 4 }
 0x716   :  { %v794_v59 = vadd.f32 %v790_v57, %v4150_v9 }
 0x717   :  { %v795_v62 = vadd.f32 %v791_v61, %v4154_v16 }
 0x718   :  { %v2922_v60 = vmul.f32 -1.442695, %v794_v59 }
 0x719   :  { %v2923_v18 = vmul.f32 -1.442695, %v795_v62 }
 0x71a   :  { %3502 = vpow2.f32 %v2922_v60 }
 0x71b   :  { %3504 = vtanh.f32 %v795_v62 }
 0x724   :  { %v3503_v63 = vpop.eup %3502 }
 0x725   :  { %v802_v1 = vadd.f32 1.0, %v3503_v63  ;;  %v3505_v2 = vpop.eup %3504 }
 0x727   :  { %3506 = vrcp.f32 %v802_v1 }
 0x728   :  { %3508 = vpow2.f32 %v2923_v18 }
 0x731   :  { %v3507_v4 = vpop.eup %3506 }
 0x732   :  { %v813_v5 = vmul.f32 %v3507_v4, %v3505_v2  ;;  %v812_v7 = vmul.f32 %v3507_v4, %v810_v3  ;;  %v3509_v8 = vpop.eup %3508 }
 0x733   :  { %v803_v9 = vadd.f32 1.0, %v3509_v8 }
 0x734   :  { %815 = vrot.lane.b32.xlu0 %v813_v5, %s3830_s3 }
 0x735   :  { %3510 = vrcp.f32 %v803_v9 }
 0x73f   :  { %v3511_v16 = vpop.eup %3510 }
 0x7a6   :  { %v816_v11 = vpop.permute.xlu0 %815 }
 0x7a7   :  { %v818_v12 = vadd.f32 %v816_v11, %v812_v7 }
 0x7a9   :  { %3512 = vtanh.f32 %v818_v12  ;;  %v927_v34 = vrot.slane %v818_v12, 4 }
 0x7b3   :  { %v3513_v13 = vpop.eup %3512 }
 0x7b4   :  { %v4208_v14 = vmul.f32 %v3513_v13, %v3511_v16 }
 0x7b6   :  { %v835_v15 = vrot.slane %v4208_v14, 4 }
 0x7b8   :  { %836 = vrot.lane.b32.xlu1 %v835_v15, %s3830_s3 }
 0x82a   :  { %v837_v17 = vpop.permute.xlu1 %836 }
 0x82b   :  { %2924 = vmatmul.mubr.msk.f32.vlgmr.msra.gmra.mrb[10].mxu0 %vm377_vm6, %v837_v17 }
 0x82c   :  { %3208 = vmatpush1.bf16.msra.mxu0 %v4037_v21  ;;  %1133 = vmatprep.mubr.f32.mxu0 %v3828_v0 }
 0x82d   :  { %3210 = vmatprep.subr.bf16.mxu0 %v4043_v23 }
 0x830   :  { %3212 = vmatpush1.bf16.msra.mxu0 %v4066_v29 }
 0x831   :  { %3214 = vmatprep.subr.bf16.mxu0 %v4069_v30 }
 0x834   :  { %3216 = vmatpush1.bf16.msra.mxu0 %v4093_v36 }
 0x835   :  { %3218 = vmatprep.subr.bf16.mxu0 %v4096_v37 }
 0x838   :  { %3220 = vmatpush1.bf16.msra.mxu0 %v4114_v41 }
 0x8fe   :  { %v906_v19 = vpop.f32.mrb[10].mxu0 }
 0x8ff   :  { %v911_v22 = vadd.f32 %v906_v19, %v4148_v6  ;;  %v908_v24 = vpop.f32.mrb[11].mxu0 }
 0x900   :  { %v912_v28 = vadd.f32 %v908_v24, %v4152_v10 }
 0x901   :  { %v2925_v26 = vmul.f32 -1.442695, %v911_v22 }
 0x902   :  { %v2926_v40 = vmul.f32 -1.442695, %v912_v28 }
 0x903   :  { %3514 = vpow2.f32 %v2925_v26 }
 0x904   :  { %3516 = vtanh.f32 %v912_v28 }
 0x90d   :  { %v3515_v31 = vpop.eup %3514 }
 0x90e   :  { %v919_v32 = vadd.f32 1.0, %v3515_v31  ;;  %v3517_v33 = vpop.eup %3516 }
 0x910   :  { %3518 = vrcp.f32 %v919_v32 }
 0x911   :  { %3520 = vpow2.f32 %v2926_v40 }
 0x91a   :  { %v3519_v35 = vpop.eup %3518 }
 0x91b   :  { %v930_v38 = vmul.f32 %v3519_v35, %v3517_v33  ;;  %v929_v39 = vmul.f32 %v3519_v35, %v927_v34  ;;  %v3521_v42 = vpop.eup %3520 }
 0x91c   :  { %v920_v45 = vadd.f32 1.0, %v3521_v42 }
 0x91d   :  { %932 = vrot.lane.b32.xlu0 %v930_v38, %s3830_s3 }
 0x91e   :  { %3522 = vrcp.f32 %v920_v45 }
 0x928   :  { %v3523_v49 = vpop.eup %3522 }
 0x98f   :  { %v933_v47 = vpop.permute.xlu0 %932 }
 0x990   :  { %v935_v48 = vadd.f32 %v933_v47, %v929_v39 }
 0x992   :  { %3524 = vtanh.f32 %v935_v48 }
 0x99c   :  { %v3525_v50 = vpop.eup %3524 }
 0x99d   :  { %v937_v51 = vmul.f32 %v3525_v50, %v3523_v49 }
 0x99f   :  { %939 = vrot.lane.b32.xlu1 %v937_v51, %s3830_s3 }
 0xa11   :  { %v4225_v52 = vpop.permute.xlu1 %939 }
 0xa12   :  { %2927 = vmatmul.mubr.msk.f32.vlgmr.msra.gmra.mrb[14].mxu1 %vm377_vm6, %v4225_v52 }
 0xa13   :  { %3224 = vmatpush1.bf16.msra.mxu1 %v4037_v21  ;;  %1239 = vmatprep.mubr.f32.mxu1 %v3828_v0 }
 0xa14   :  { %3226 = vmatprep.subr.bf16.mxu1 %v4043_v23 }
 0xa17   :  { %3228 = vmatpush1.bf16.msra.mxu1 %v4066_v29 }
 0xa18   :  { %3230 = vmatprep.subr.bf16.mxu1 %v4069_v30 }
 0xa1b   :  { %3232 = vmatpush1.bf16.msra.mxu1 %v4093_v36  ;;  %v1039_v36 = vrot.slane %v935_v48, 4 }
 0xa1c   :  { %3234 = vmatprep.subr.bf16.mxu1 %v4096_v37 }
 0xa1f   :  { %3236 = vmatpush1.bf16.msra.mxu1 %v4114_v41 }
 0xae5   :  { %v1012_v53 = vpop.f32.mrb[14].mxu1 }
 0xae6   :  { %v1019_v54 = vrot.slane %v1012_v53, 4  ;;  %v1014_v55 = vpop.f32.mrb[15].mxu1 }
 0xae7   :  { %v1020_v57 = vrot.slane %v1014_v55, 4 }
 0xae8   :  { %v1023_v56 = vadd.f32 %v1019_v54, %v4148_v6 }
 0xae9   :  { %v1024_v23 = vadd.f32 %v1020_v57, %v4152_v10  ;;  %v1308_v57 = vld [vmem:[%s4669_s6 + $0x18] sm:$0xff] }
 0xaea   :  { %v2928_v21 = vmul.f32 -1.442695, %v1023_v56 }
 0xaeb   :  { %v2929_v41 = vmul.f32 -1.442695, %v1024_v23 }
 0xaec   :  { %3526 = vpow2.f32 %v2928_v21 }
 0xaed   :  { %3528 = vtanh.f32 %v1024_v23  ;;  %v1289_v23 = vld [vmem:[%s4668_s5] sm:$0xff] }
 0xaf6   :  { %v3527_v58 = vpop.eup %3526 }
 0xaf7   :  { %v1031_v29 = vadd.f32 1.0, %v3527_v58  ;;  %v3529_v30 = vpop.eup %3528  ;;  %v1291_v58 = vld [vmem:[%s4668_s5 + $0x10] sm:$0xff] }
 0xaf9   :  { %3530 = vrcp.f32 %v1031_v29 }
 0xafa   :  { %3532 = vpow2.f32 %v2929_v41  ;;  %v1296_v41 = vld [vmem:[%s4668_s5 + $0x38] sm:$0xff] }
 0xb03   :  { %v3531_v59 = vpop.eup %3530 }
 0xb04   :  { %v1042_v37 = vmul.f32 %v3531_v59, %v3529_v30  ;;  %v1041_v60 = vmul.f32 %v3531_v59, %v1039_v36  ;;  %v3533_v61 = vpop.eup %3532  ;;  %v3239_v30 = vpack.c.bf16 %v1291_v58, %v1289_v23  ;;  %v1305_v36 = vld [vmem:[%s4669_s6] sm:$0xff]  ;;  %v1307_v59 = vld [vmem:[%s4669_s6 + $0x10] sm:$0xff]  ;;  %v1329_v23 = vld [vmem:[#allocation8 + $0x38] sm:$0xff] }
 0xb05   :  { %v1032_v6 = vadd.f32 1.0, %v3533_v61  ;;  %v1310_v61 = vld [vmem:[%s4669_s6 + $0x28] sm:$0xff] }
 0xb06   :  { %1044 = vrot.lane.b32.xlu0 %v1042_v37, %s3830_s3  ;;  %v1294_v37 = vld [vmem:[%s4668_s5 + $0x28] sm:$0xff] }
 0xb07   :  { %3534 = vrcp.f32 %v1032_v6  ;;  %v1312_v6 = vld [vmem:[%s4669_s6 + $0x38] sm:$0xff] }
 0xb11   :  { %v3535_v10 = vpop.eup %3534 }
 0xb78   :  { %v1045_v62 = vpop.permute.xlu0 %1044 }
 0xb79   :  { %v1047_v63 = vadd.f32 %v1045_v62, %v1041_v60  ;;  %v3255_v60 = vpack.c.bf16 %v1307_v59, %v1305_v36  ;;  %v3241_v62 = vpack.c.bf16 %v1296_v41, %v1294_v37  ;;  %v1331_v59 = vld [vmem:[#allocation8 + $0x48] sm:$0xff]  ;;  %v1333_v37 = vld [vmem:[#allocation8 + $0x58] sm:$0xff] }
 0xb7a   :  { %v4388_v41 = vpack.c.bf16 %v1333_v37, %v1331_v59 }
 0xb7b   :  { %3536 = vtanh.f32 %v1047_v63  ;;  %v1156_v13 = vrot.slane %v1047_v63, 4  ;;  %v3257_v63 = vpack.c.bf16 %v1312_v6, %v1310_v61  ;;  %v1330_v61 = vld [vmem:[#allocation8 + $0x40] sm:$0xff]  ;;  %v1332_v6 = vld [vmem:[#allocation8 + $0x50] sm:$0xff] }
 0xb85   :  { %v3537_v1 = vpop.eup %3536 }
 0xb86   :  { %v4240_v2 = vmul.f32 %v3537_v1, %v3535_v10  ;;  %v1293_v10 = vld [vmem:[%s4668_s5 + $0x20] sm:$0xff]  ;;  %v1295_v1 = vld [vmem:[%s4668_s5 + $0x30] sm:$0xff] }
 0xb88   :  { %v1064_v3 = vrot.slane %v4240_v2, 4 }
 0xb8a   :  { %1065 = vrot.lane.b32.xlu1 %v1064_v3, %s3830_s3  ;;  %v1309_v3 = vld [vmem:[%s4669_s6 + $0x20] sm:$0xff] }
 0xbfc   :  { %v1066_v4 = vpop.permute.xlu1 %1065 }
 0xbfd   :  { %2930 = vmatmul.mubr.msk.f32.vlgmr.msra.gmra.mrb[12].mxu0 %vm377_vm6, %v1066_v4  ;;  %v3243_v4 = vpack.c.bf16 %v1295_v1, %v1293_v10  ;;  %v1337_v10 = vld [vmem:[#allocation8 + $0x78] sm:$0xff]  ;;  %v4395_v1 = vpack.c.bf16 %v1332_v6, %v1330_v61 }
 0xbfe   :  { %1425 = vmatprep.mubr.f32.mxu0 %v3828_v0 }
 0xcd0   :  { %v1135_v5 = vpop.f32.mrb[12].mxu0 }
 0xcd1   :  { %v1140_v7 = vadd.f32 %v1135_v5, %v4156_v25  ;;  %v1137_v18 = vpop.f32.mrb[13].mxu0  ;;  %v1311_v5 = vld [vmem:[%s4669_s6 + $0x30] sm:$0xff] }
 0xcd2   :  { %v1141_v9 = vadd.f32 %v1137_v18, %v4158_v27 }
 0xcd3   :  { %v2931_v8 = vmul.f32 -1.442695, %v1140_v7  ;;  %v3259_v7 = vpack.c.bf16 %v1311_v5, %v1309_v3  ;;  %v1336_v5 = vld [vmem:[#allocation8 + $0x70] sm:$0xff] }
 0xcd4   :  { %v2932_v22 = vmul.f32 -1.442695, %v1141_v9 }
 0xcd5   :  { %3538 = vpow2.f32 %v2931_v8 }
 0xcd6   :  { %3540 = vtanh.f32 %v1141_v9 }
 0xcdf   :  { %v3539_v11 = vpop.eup %3538 }
 0xce0   :  { %v1148_v12 = vadd.f32 1.0, %v3539_v11  ;;  %v3541_v16 = vpop.eup %3540 }
 0xce2   :  { %3542 = vrcp.f32 %v1148_v12  ;;  %v1298_v12 = vld [vmem:[%s4668_s5 + $0x48] sm:$0xff] }
 0xce3   :  { %3544 = vpow2.f32 %v2932_v22  ;;  %v1297_v22 = vld [vmem:[%s4668_s5 + $0x40] sm:$0xff] }
 0xcec   :  { %v3543_v15 = vpop.eup %3542 }
 0xced   :  { %v1159_v17 = vmul.f32 %v3543_v15, %v3541_v16  ;;  %v1158_v19 = vmul.f32 %v3543_v15, %v1156_v13  ;;  %v3545_v24 = vpop.eup %3544  ;;  %v1300_v16 = vld [vmem:[%s4668_s5 + $0x58] sm:$0xff]  ;;  %v1314_v13 = vld [vmem:[%s4669_s6 + $0x48] sm:$0xff] }
 0xcee   :  { %v1149_v26 = vadd.f32 1.0, %v3545_v24  ;;  %v1299_v24 = vld [vmem:[%s4668_s5 + $0x50] sm:$0xff] }
 0xcef   :  { %1161 = vrot.lane.b32.xlu0 %v1159_v17, %s3830_s3  ;;  %v3245_v17 = vpack.c.bf16 %v1300_v16, %v1298_v12 }
 0xcf0   :  { %3546 = vrcp.f32 %v1149_v26 }
 0xcfa   :  { %v3547_v32 = vpop.eup %3546 }
 0xd61   :  { %v1162_v28 = vpop.permute.xlu0 %1161 }
 0xd62   :  { %v1164_v31 = vadd.f32 %v1162_v28, %v1158_v19  ;;  %v1316_v19 = vld [vmem:[%s4669_s6 + $0x58] sm:$0xff]  ;;  %v3247_v28 = vpack.c.bf16 %v1299_v24, %v1297_v22 }
 0xd63   :  { %v3261_v26 = vpack.c.bf16 %v1316_v19, %v1314_v13 }
 0xd64   :  { %3548 = vtanh.f32 %v1164_v31  ;;  %v1268_v53 = vrot.slane %v1164_v31, 4  ;;  %v1313_v31 = vld [vmem:[%s4669_s6 + $0x40] sm:$0xff] }
 0xd6e   :  { %v3549_v33 = vpop.eup %3548 }
 0xd6f   :  { %v1166_v34 = vmul.f32 %v3549_v33, %v3547_v32  ;;  %v1315_v32 = vld [vmem:[%s4669_s6 + $0x50] sm:$0xff] }
 0xd70   :  { %v3263_v33 = vpack.c.bf16 %v1315_v32, %v1313_v31 }
 0xd71   :  { %1168 = vrot.lane.b32.xlu1 %v1166_v34, %s3830_s3  ;;  %v1302_v34 = vld [vmem:[%s4668_s5 + $0x68] sm:$0xff] }
 0xd75   :  { %591 = vrot.lane.b32.xlu1 %v4175_v20, %s3830_s3 }
 0xd79   :  { %822 = vrot.lane.b32.xlu1 %v4208_v14, %s3830_s3 }
 0xde3   :  { %v1169_v35 = vpop.permute.xlu1 %1168 }
 0xde4   :  { %2933 = vmatmul.mubr.msk.f32.vlgmr.msra.gmra.mrb[16].mxu1 %vm377_vm6, %v1169_v35 }
 0xde5   :  { %1514 = vmatprep.mubr.f32.mxu1 %v3828_v0 }
 0xde7   :  { %v592_v38 = vpop.permute.xlu1 %591 }
 0xde8   :  { %595 = vst.msk [vmem:[#allocation2] sm:$0xf0] %vm594_vm7, %v592_v38 }
 0xde9   :  { %597 = vst.msk [vmem:[#allocation2 + $0x14] sm:$0xf0] %vm596_vm8, %v592_v38  ;;  %v1318_v38 = vld [vmem:[%s4669_s6 + $0x68] sm:$0xff] }
 0xdea   :  { %1171 = vst.msk [vmem:[#allocation2 + $0x18] sm:$0xf] %vm480_vm4, %v1169_v35 }
 0xdeb   :  { %1172 = vst.msk [vmem:[#allocation2 + $0x4] sm:$0xf] %vm482_vm5, %v1169_v35  ;;  %v823_v20 = vpop.permute.xlu1 %822  ;;  %v1304_v35 = vld [vmem:[%s4668_s5 + $0x78] sm:$0xff] }
 0xdec   :  { %825 = vst.msk [vmem:[#allocation2 + $0x8] sm:$0xf0] %vm594_vm7, %v823_v20 }
 0xded   :  { %826 = vst.msk [vmem:[#allocation2 + $0xc] sm:$0xf0] %vm596_vm8, %v823_v20  ;;  %v3249_v20 = vpack.c.bf16 %v1304_v35, %v1302_v34 }
 0xdee   :  { %942 = vst.msk [vmem:[#allocation2 + $0x10] sm:$0xf] %vm480_vm4, %v4225_v52 }
 0xdef   :  { %943 = vst.msk [vmem:[#allocation2 + $0xc] sm:$0xf] %vm482_vm5, %v4225_v52  ;;  %v1292_v52 = vld [vmem:[%s4668_s5 + $0x18] sm:$0xff] }
 0xeb7   :  { %v1241_v14 = vpop.f32.mrb[16].mxu1 }
 0xeb8   :  { %v1248_v39 = vrot.slane %v1241_v14, 4  ;;  %v1243_v40 = vpop.f32.mrb[17].mxu1  ;;  %v1320_v14 = vld [vmem:[%s4669_s6 + $0x78] sm:$0xff] }
 0xeb9   :  { %v1249_v47 = vrot.slane %v1243_v40, 4  ;;  %v1303_v40 = vld [vmem:[%s4668_s5 + $0x70] sm:$0xff] }
 0xeba   :  { %v1252_v42 = vadd.f32 %v1248_v39, %v4156_v25  ;;  %v1290_v25 = vld [vmem:[%s4668_s5 + $0x8] sm:$0xff]  ;;  %v1301_v39 = vld [vmem:[%s4668_s5 + $0x60] sm:$0xff] }
 0xebb   :  { %v1253_v48 = vadd.f32 %v1249_v47, %v4158_v27  ;;  %v1306_v27 = vld [vmem:[%s4669_s6 + $0x8] sm:$0xff]  ;;  %v3237_v21 = vpack.c.bf16 %v1292_v52, %v1290_v25  ;;  %v1317_v47 = vld [vmem:[%s4669_s6 + $0x60] sm:$0xff] }
 0xebc   :  { %v2934_v45 = vmul.f32 -1.442695, %v1252_v42  ;;  %v3253_v29 = vpack.c.bf16 %v1308_v57, %v1306_v27  ;;  %v3265_v42 = vpack.c.bf16 %v1320_v14, %v1318_v38  ;;  %v1322_v52 = vld [vmem:[#allocation8] sm:$0xff]  ;;  %v1324_v27 = vld [vmem:[#allocation8 + $0x10] sm:$0xff]  ;;  %v1327_v57 = vld [vmem:[#allocation8 + $0x28] sm:$0xff] }
 0xebd   :  { %3238 = vmatprep.subr.bf16.mxu0 %v3237_v21  ;;  %v2935_v18 = vmul.f32 -1.442695, %v1253_v48  ;;  %v4376_v58 = vpack.c.bf16 %v1324_v27, %v1322_v52 }
 0xebe   :  { %3550 = vpow2.f32 %v2934_v45  ;;  %3254 = vmatprep.subr.bf16.mxu1 %v3253_v29  ;;  %3240 = vmatpush1.bf16.msra.mxu0 %v3239_v30  ;;  %v3251_v45 = vpack.c.bf16 %v1303_v40, %v1301_v39  ;;  %v4378_v29 = vpack.c.bf16 %v1329_v23, %v1327_v57  ;;  %v1326_v30 = vld [vmem:[#allocation8 + $0x20] sm:$0xff] }
 0xebf   :  { %3552 = vtanh.f32 %v1253_v48  ;;  %3256 = vmatpush1.bf16.msra.mxu1 %v3255_v60  ;;  %3242 = vmatprep.subr.bf16.mxu0 %v3241_v62  ;;  %v1319_v48 = vld [vmem:[%s4669_s6 + $0x70] sm:$0xff] }
 0xec0   :  { %3258 = vmatprep.subr.bf16.mxu1 %v3257_v63  ;;  %v1335_v63 = vld [vmem:[#allocation8 + $0x68] sm:$0xff] }
 0xec1   :  { %v4399_v3 = vpack.c.bf16 %v1337_v10, %v1335_v63 }
 0xec2   :  { %3244 = vmatpush1.bf16.msra.mxu0 %v3243_v4  ;;  %v1334_v4 = vld [vmem:[#allocation8 + $0x60] sm:$0xff] }
 0xec3   :  { %3260 = vmatpush1.bf16.msra.mxu1 %v3259_v7  ;;  %3246 = vmatprep.subr.bf16.mxu0 %v3245_v17 }
 0xec4   :  { %3262 = vmatprep.subr.bf16.mxu1 %v3261_v26 }
 0xec6   :  { %3248 = vmatpush1.bf16.msra.mxu0 %v3247_v28 }
 0xec7   :  { %3264 = vmatpush1.bf16.msra.mxu1 %v3263_v33  ;;  %3250 = vmatprep.subr.bf16.mxu0 %v3249_v20 }
 0xec8   :  { %v3551_v49 = vpop.eup %3550  ;;  %3266 = vmatprep.subr.bf16.mxu1 %v3265_v42 }
 0xec9   :  { %v1260_v50 = vadd.f32 1.0, %v3551_v49  ;;  %v3553_v51 = vpop.eup %3552  ;;  %v3267_v49 = vpack.c.bf16 %v1319_v48, %v1317_v47 }
 0xeca   :  { %3252 = vmatpush1.bf16.msra.mxu0 %v3251_v45 }
 0xecb   :  { %3554 = vrcp.f32 %v1260_v50  ;;  %v1323_v50 = vld [vmem:[#allocation8 + $0x8] sm:$0xff]  ;;  %3268 = vmatpush1.bf16.msra.mxu1 %v3267_v49 }
 0xecc   :  { %3556 = vpow2.f32 %v2935_v18  ;;  %v4406_v18 = vpack.c.bf16 %v1336_v5, %v1334_v4 }
 0xed5   :  { %v3555_v54 = vpop.eup %3554 }
 0xed6   :  { %v1271_v55 = vmul.f32 %v3555_v54, %v3553_v51  ;;  %v1270_v56 = vmul.f32 %v3555_v54, %v1268_v53  ;;  %v3557_v8 = vpop.eup %3556  ;;  %v1325_v51 = vld [vmem:[#allocation8 + $0x18] sm:$0xff] }
 0xed7   :  { %v1261_v9 = vadd.f32 1.0, %v3557_v8  ;;  %v4365_v53 = vpack.c.bf16 %v1325_v51, %v1323_v50 }
 0xed8   :  { %1273 = vrot.lane.b32.xlu0 %v1271_v55, %s3830_s3 }
 0xed9   :  { %3558 = vrcp.f32 %v1261_v9  ;;  %3270 = vmatprep.subr.bf16.mxu0 %v4365_v53  ;;  %3286 = vmatprep.subr.bf16.mxu1 %v4365_v53  ;;  %v1321_v9 = vld [vmem:[%s4670_s7] sm:$0x3] }
 0xeda   :  { %v1346_v17 = vrot.slane %v1321_v9, %v161_v46 }
 0xee3   :  { %v3559_v54 = vpop.eup %3558 }
 0xf4a   :  { %v1274_v11 = vpop.permute.xlu0 %1273 }
 0xf4b   :  { %v1276_v15 = vadd.f32 %v1274_v11, %v1270_v56 }
 0xf4d   :  { %3560 = vtanh.f32 %v1276_v15  ;;  %v1342_v15 = vrot.slane %v1321_v9, %v157_v44 }
 0xf57   :  { %v3561_v55 = vpop.eup %3560 }
 0xf58   :  { %v1278_v56 = vmul.f32 %v3561_v55, %v3559_v54 }
 0xf5a   :  { %1280 = vrot.lane.b32.xlu0 %v1278_v56, %s3830_s3 }
 0xf5e   :  { %1051 = vrot.lane.b32.xlu0 %v4240_v2, %s3830_s3  ;;  %v1328_v2 = vld [vmem:[#allocation8 + $0x30] sm:$0xff] }
 0xf5f   :  { %v4384_v60 = vpack.c.bf16 %v1328_v2, %v1326_v30 }
 0xfcc   :  { %v1281_v25 = vpop.permute.xlu0 %1280 }
 0xfcd   :  { %1283 = vst.msk [vmem:[#allocation2 + $0x18] sm:$0xf0] %vm594_vm7, %v1281_v25 }
 0xfce   :  { %1284 = vst.msk [vmem:[#allocation2 - $0x4] sm:$0xf0] %vm596_vm8, %v1281_v25 }
 0xfd0   :  { %v1052_v21 = vpop.permute.xlu0 %1051 }
 0xfd1   :  { %1054 = vst.msk [vmem:[#allocation2 + $0x10] sm:$0xf0] %vm594_vm7, %v1052_v21 }
 0xfd2   :  { %1055 = vst.msk [vmem:[#allocation2 + $0x4] sm:$0xf0] %vm596_vm8, %v1052_v21 }
 0xfd4   :  { %v1288_v8 = vld [vmem:[#allocation2 + $0x18] sm:$0xff] }
 0xfd5   :  { %v1285_v36 = vld [vmem:[#allocation2] sm:$0xff] }
 0xfd6   :  { %2936 = vmatmul.mubr.msk.f32.vlgmr.msra.gmra.mrb[14].mxu0 %vm377_vm6, %v1285_v36  ;;  %2940 = vmatmul.mubr.msk.f32.vlgmr.msra.gmra.mrb[18].mxu1 %vm377_vm6, %v1285_v36 }
 0xfd7   :  { %3272 = vmatpush1.bf16.msra.mxu0 %v4376_v58  ;;  %1431 = vmatprep.mubr.f32.mxu0 %v3828_v0 }
 0xfd8   :  { %1520 = vmatprep.mubr.f32.mxu1 %v3828_v0  ;;  %3274 = vmatprep.subr.bf16.mxu0 %v4378_v29  ;;  %v1287_v7 = vld [vmem:[#allocation2 + $0x10] sm:$0xff] }
 0xfd9   :  { %v1286_v62 = vld [vmem:[#allocation2 + $0x8] sm:$0xff]  ;;  %3288 = vmatpush1.bf16.msra.mxu1 %v4376_v58 }
 0xfda   :  { %2937 = vmatmul.mubr.msk.f32.gmra.mrb[16].mxu0 %vm377_vm6, %v1286_v62  ;;  %2941 = vmatmul.mubr.msk.f32.gmra.mrb[20].mxu1 %vm377_vm6, %v1286_v62 }
 0xfdb   :  { %3276 = vmatpush1.bf16.msra.mxu0 %v4384_v60  ;;  %1437 = vmatprep.mubr.f32.mxu0 %v3828_v0 }
 0xfdc   :  { %1526 = vmatprep.mubr.f32.mxu1 %v3828_v0  ;;  %3278 = vmatprep.subr.bf16.mxu0 %v4388_v41 }
 0xfdd   :  { %3290 = vmatprep.subr.bf16.mxu1 %v4378_v29 }
 0xfde   :  { %2938 = vmatmul.mubr.msk.f32.gmra.mrb[18].mxu0 %vm377_vm6, %v1287_v7  ;;  %2942 = vmatmul.mubr.msk.f32.gmra.mrb[22].mxu1 %vm377_vm6, %v1287_v7 }
 0xfdf   :  { %3280 = vmatpush1.bf16.msra.mxu0 %v4395_v1  ;;  %1443 = vmatprep.mubr.f32.mxu0 %v3828_v0 }
 0xfe0   :  { %1532 = vmatprep.mubr.f32.mxu1 %v3828_v0  ;;  %3282 = vmatprep.subr.bf16.mxu0 %v4399_v3 }
 0xfe1   :  { %3292 = vmatpush1.bf16.msra.mxu1 %v4384_v60 }
 0xfe2   :  { %2939 = vmatmul.mubr.msk.f32.gmra.mrb[20].mxu0 %vm377_vm6, %v1288_v8  ;;  %2943 = vmatmul.mubr.msk.f32.gmra.mrb[24].mxu1 %vm377_vm6, %v1288_v8 }
 0xfe3   :  { %3284 = vmatpush1.bf16.msra.mxu0 %v4406_v18  ;;  %1611 = vmatprep.mubr.f32.mxu0 %v3828_v0 }
 0xfe4   :  { %3294 = vmatprep.subr.bf16.mxu1 %v4388_v41  ;;  %1714 = vmatprep.mubr.f32.mxu1 %v3828_v0 }
 0xfe5   :  { %3296 = vmatpush1.bf16.msra.mxu1 %v4395_v1  ;;  %3302 = vmatprep.subr.bf16.mxu0 %v4365_v53 }
 0xfe6   :  { %1612 = vmatmul.mubr.f32.vlgmr.msra.gmra.mrb[22].mxu0 %v3828_v0  ;;  %3298 = vmatprep.subr.bf16.mxu1 %v4399_v3 }
 0xfe7   :  { %3304 = vmatpush1.bf16.msra.mxu0 %v4376_v58  ;;  %1837 = vmatprep.mubr.f32.mxu0 %v3828_v0 }
 0xfe8   :  { %3306 = vmatprep.subr.bf16.mxu0 %v4378_v29 }
 0xfe9   :  { %3300 = vmatpush1.bf16.msra.mxu1 %v4406_v18 }
 0xfea   :  { %3318 = vmatprep.subr.bf16.mxu1 %v4365_v53 }
 0xfeb   :  { %3308 = vmatpush1.bf16.msra.mxu0 %v4384_v60 }
 0xfec   :  { %3310 = vmatprep.subr.bf16.mxu0 %v4388_v41 }
 0xfef   :  { %3312 = vmatpush1.bf16.msra.mxu0 %v4395_v1 }
 0xff0   :  { %3314 = vmatprep.subr.bf16.mxu0 %v4399_v3 }
 0xff3   :  { %3316 = vmatpush1.bf16.msra.mxu0 %v4406_v18 }
 0xff4   :  { %3334 = vmatprep.subr.bf16.mxu0 %v4365_v53 }
0x10a9   :  { %v1427_v11 = vpop.f32.mrb[14].mxu0  ;;  %v1516_v12 = vpop.f32.mrb[18].mxu1 }
0x10aa   :  { %v1429_v16 = vpop.f32.mrb[15].mxu0  ;;  %v1518_v13 = vpop.f32.mrb[19].mxu1  ;;  %v1428_v49 = vadd.f32 %v1427_v11, %v1342_v15  ;;  %v2220_v50 = vrot.slane %v1516_v12, 4 }
0x10ab   :  { %v1430_v25 = vadd.f32 %v1429_v16, %v1346_v17  ;;  %v2221_v52 = vrot.slane %v1518_v13, 4 }
0x10ad   :  { %v1433_v19 = vpop.f32.mrb[16].mxu0  ;;  %v1522_v22 = vpop.f32.mrb[20].mxu1 }
0x10ae   :  { %v1434_v24 = vadd.f32 %v1433_v19, %v1342_v15  ;;  %v1435_v26 = vpop.f32.mrb[17].mxu0  ;;  %v1524_v28 = vpop.f32.mrb[21].mxu1  ;;  %v1991_v34 = vrot.slane %v1522_v22, 4 }
0x10af   :  { %v1436_v31 = vadd.f32 %v1435_v26, %v1346_v17  ;;  %v1992_v39 = vrot.slane %v1524_v28, 4 }
0x10b1   :  { %v1439_v32 = vpop.f32.mrb[18].mxu0  ;;  %v1528_v33 = vpop.f32.mrb[22].mxu1 }
0x10b2   :  { %v1440_v35 = vadd.f32 %v1439_v32, %v1342_v15  ;;  %v1762_v38 = vrot.slane %v1528_v33, 4  ;;  %v1441_v20 = vpop.f32.mrb[19].mxu0  ;;  %v1530_v14 = vpop.f32.mrb[23].mxu1 }
0x10b3   :  { %v1442_v40 = vadd.f32 %v1441_v20, %v1346_v17  ;;  %v1763_v42 = vrot.slane %v1530_v14, 4 }
0x10b4   :  { %v4439_v44 = vadd.f32 %v1762_v38, %v1434_v24  ;;  %v4441_v43 = vadd.f32 %v1991_v34, %v1440_v35 }
0x10b5   :  { %v1445_v46 = vpop.f32.mrb[20].mxu0  ;;  %v1534_v45 = vpop.f32.mrb[24].mxu1  ;;  %v4443_v47 = vadd.f32 %v1763_v42, %v1436_v31  ;;  %v4445_v48 = vadd.f32 %v1992_v39, %v1442_v40 }
0x10b6   :  { %v1446_v51 = vadd.f32 %v1445_v46, %v1342_v15  ;;  %v1541_v54 = vrot.slane %v1534_v45, 4  ;;  %v1447_v55 = vpop.f32.mrb[21].mxu0  ;;  %v1536_v56 = vpop.f32.mrb[25].mxu1 }
0x10b7   :  { %v1448_v27 = vadd.f32 %v1447_v55, %v1346_v17  ;;  %v1542_v21 = vrot.slane %v1536_v56, 4 }
0x10b8   :  { %v1545_v57 = vadd.f32 %v1541_v54, %v1428_v49  ;;  %v4447_v23 = vadd.f32 %v2220_v50, %v1446_v51 }
0x10b9   :  { %v1613_v30 = vpop.f32.mrb[22].mxu0  ;;  %v1546_v2 = vadd.f32 %v1542_v21, %v1430_v25  ;;  %v4449_v36 = vadd.f32 %v2221_v52, %v1448_v27 }
0x10ba   :  { %v1618_v59 = vadd.f32 %v1613_v30, %v1545_v57  ;;  %v1615_v37 = vpop.f32.mrb[23].mxu0 }
0x10bb   :  { %v1619_v6 = vadd.f32 %v1615_v37, %v1546_v2 }
0x10bc   :  { %v2944_v61 = vmul.f32 -1.442695, %v1618_v59 }
0x10bd   :  { %v2945_v7 = vmul.f32 -1.442695, %v1619_v6 }
0x10be   :  { %3562 = vpow2.f32 %v2944_v61 }
0x10bf   :  { %3564 = vtanh.f32 %v1619_v6 }
0x10c8   :  { %v3563_v62 = vpop.eup %3562 }
0x10c9   :  { %v1626_v63 = vadd.f32 1.0, %v3563_v62  ;;  %v3565_v10 = vpop.eup %3564 }
0x10cb   :  { %3566 = vrcp.f32 %v1626_v63 }
0x10cc   :  { %3568 = vpow2.f32 %v2945_v7 }
0x10d5   :  { %v3567_v4 = vpop.eup %3566 }
0x10d6   :  { %v1634_v5 = vmul.f32 %v3567_v4, %v3565_v10  ;;  %v3569_v8 = vpop.eup %3568  ;;  %v1633_v11 = vmul.f32 0.0, %v3567_v4 }
0x10d7   :  { %v1627_v9 = vadd.f32 1.0, %v3569_v8 }
0x10d8   :  { %1636 = vrot.lane.b32.xlu1 %v1634_v5, %s3830_s3 }
0x10d9   :  { %3570 = vrcp.f32 %v1627_v9 }
0x10e3   :  { %v3571_v13 = vpop.eup %3570 }
0x114a   :  { %v1637_v12 = vpop.permute.xlu1 %1636 }
0x114b   :  { %v1639_v16 = vadd.f32 %v1637_v12, %v1633_v11 }
0x114d   :  { %3572 = vtanh.f32 %v1639_v16  ;;  %v1743_v20 = vrot.slane %v1639_v16, 4 }
0x1157   :  { %v3573_v15 = vpop.eup %3572 }
0x1158   :  { %v1641_v17 = vmul.f32 %v3573_v15, %v3571_v13 }
0x115a   :  { %1643 = vrot.lane.b32.xlu0 %v1641_v17, %s3830_s3 }
0x11cc   :  { %v1644_v19 = vpop.permute.xlu0 %1643 }
0x11cd   :  { %1646 = vst.msk [vmem:[#allocation3] sm:$0xf] %vm480_vm4, %v1644_v19  ;;  %2946 = vmatmul.mubr.msk.f32.vlgmr.msra.gmra.mrb[26].mxu1 %vm377_vm6, %v1644_v19 }
0x11ce   :  { %1647 = vst.msk [vmem:[#allocation3 + $0x1c] sm:$0xf] %vm482_vm5, %v1644_v19  ;;  %3320 = vmatpush1.bf16.msra.mxu1 %v4376_v58  ;;  %1943 = vmatprep.mubr.f32.mxu1 %v3828_v0 }
0x11cf   :  { %3322 = vmatprep.subr.bf16.mxu1 %v4378_v29 }
0x11d2   :  { %3324 = vmatpush1.bf16.msra.mxu1 %v4384_v60 }
0x11d3   :  { %3326 = vmatprep.subr.bf16.mxu1 %v4388_v41 }
0x11d6   :  { %3328 = vmatpush1.bf16.msra.mxu1 %v4395_v1 }
0x11d7   :  { %3330 = vmatprep.subr.bf16.mxu1 %v4399_v3 }
0x11da   :  { %3332 = vmatpush1.bf16.msra.mxu1 %v4406_v18 }
0x11db   :  { %3350 = vmatprep.subr.bf16.mxu1 %v4365_v53 }
0x12a0   :  { %v1716_v22 = vpop.f32.mrb[26].mxu1 }
0x12a1   :  { %v1723_v24 = vrot.slane %v1716_v22, 4  ;;  %v1718_v26 = vpop.f32.mrb[27].mxu1 }
0x12a2   :  { %v1724_v32 = vrot.slane %v1718_v26, 4 }
0x12a3   :  { %v1727_v28 = vadd.f32 %v1723_v24, %v1545_v57 }
0x12a4   :  { %v1728_v33 = vadd.f32 %v1724_v32, %v1546_v2 }
0x12a5   :  { %v2947_v31 = vmul.f32 -1.442695, %v1727_v28 }
0x12a6   :  { %v2948_v42 = vmul.f32 -1.442695, %v1728_v33 }
0x12a7   :  { %3574 = vpow2.f32 %v2947_v31 }
0x12a8   :  { %3576 = vtanh.f32 %v1728_v33 }
0x12b1   :  { %v3575_v34 = vpop.eup %3574 }
0x12b2   :  { %v1735_v35 = vadd.f32 1.0, %v3575_v34  ;;  %v3577_v38 = vpop.eup %3576 }
0x12b4   :  { %3578 = vrcp.f32 %v1735_v35 }
0x12b5   :  { %3580 = vpow2.f32 %v2948_v42 }
0x12be   :  { %v3579_v14 = vpop.eup %3578 }
0x12bf   :  { %v1746_v39 = vmul.f32 %v3579_v14, %v3577_v38  ;;  %v1745_v40 = vmul.f32 %v3579_v14, %v1743_v20  ;;  %v3581_v46 = vpop.eup %3580 }
0x12c0   :  { %v1736_v45 = vadd.f32 1.0, %v3581_v46 }
0x12c1   :  { %1748 = vrot.lane.b32.xlu1 %v1746_v39, %s3830_s3 }
0x12c2   :  { %3582 = vrcp.f32 %v1736_v45 }
0x12cc   :  { %v3583_v51 = vpop.eup %3582 }
0x1333   :  { %v1749_v49 = vpop.permute.xlu1 %1748 }
0x1334   :  { %v1751_v50 = vadd.f32 %v1749_v49, %v1745_v40 }
0x1336   :  { %3584 = vtanh.f32 %v1751_v50  ;;  %v1860_v61 = vrot.slane %v1751_v50, 4 }
0x1340   :  { %v3585_v54 = vpop.eup %3584 }
0x1341   :  { %v4466_v55 = vmul.f32 %v3585_v54, %v3583_v51 }
0x1343   :  { %v1768_v56 = vrot.slane %v4466_v55, 4 }
0x1345   :  { %1769 = vrot.lane.b32.xlu0 %v1768_v56, %s3830_s3 }
0x13b7   :  { %v1770_v25 = vpop.permute.xlu0 %1769 }
0x13b8   :  { %2949 = vmatmul.mubr.msk.f32.vlgmr.msra.gmra.mrb[24].mxu0 %vm377_vm6, %v1770_v25 }
0x13b9   :  { %3336 = vmatpush1.bf16.msra.mxu0 %v4376_v58  ;;  %2066 = vmatprep.mubr.f32.mxu0 %v3828_v0 }
0x13ba   :  { %3338 = vmatprep.subr.bf16.mxu0 %v4378_v29 }
0x13bd   :  { %3340 = vmatpush1.bf16.msra.mxu0 %v4384_v60 }
0x13be   :  { %3342 = vmatprep.subr.bf16.mxu0 %v4388_v41 }
0x13c1   :  { %3344 = vmatpush1.bf16.msra.mxu0 %v4395_v1 }
0x13c2   :  { %3346 = vmatprep.subr.bf16.mxu0 %v4399_v3 }
0x13c5   :  { %3348 = vmatpush1.bf16.msra.mxu0 %v4406_v18 }
0x13c6   :  { %3366 = vmatprep.subr.bf16.mxu0 %v4365_v53 }
0x148b   :  { %v1839_v52 = vpop.f32.mrb[24].mxu0 }
0x148c   :  { %v1844_v27 = vadd.f32 %v1839_v52, %v4439_v44  ;;  %v1841_v21 = vpop.f32.mrb[25].mxu0 }
0x148d   :  { %v1845_v30 = vadd.f32 %v1841_v21, %v4443_v47 }
0x148e   :  { %v2950_v57 = vmul.f32 -1.442695, %v1844_v27 }
0x148f   :  { %v2951_v10 = vmul.f32 -1.442695, %v1845_v30 }
0x1490   :  { %3586 = vpow2.f32 %v2950_v57 }
0x1491   :  { %3588 = vtanh.f32 %v1845_v30 }
0x149a   :  { %v3587_v2 = vpop.eup %3586 }
0x149b   :  { %v1852_v59 = vadd.f32 1.0, %v3587_v2  ;;  %v3589_v37 = vpop.eup %3588 }
0x149d   :  { %3590 = vrcp.f32 %v1852_v59 }
0x149e   :  { %3592 = vpow2.f32 %v2951_v10 }
0x14a7   :  { %v3591_v6 = vpop.eup %3590 }
0x14a8   :  { %v1863_v62 = vmul.f32 %v3591_v6, %v3589_v37  ;;  %v1862_v63 = vmul.f32 %v3591_v6, %v1860_v61  ;;  %v3593_v4 = vpop.eup %3592 }
0x14a9   :  { %v1853_v5 = vadd.f32 1.0, %v3593_v4 }
0x14aa   :  { %1865 = vrot.lane.b32.xlu1 %v1863_v62, %s3830_s3 }
0x14ab   :  { %3594 = vrcp.f32 %v1853_v5 }
0x14b5   :  { %v3595_v9 = vpop.eup %3594 }
0x151c   :  { %v1866_v7 = vpop.permute.xlu1 %1865 }
0x151d   :  { %v1868_v8 = vadd.f32 %v1866_v7, %v1862_v63 }
0x151f   :  { %3596 = vtanh.f32 %v1868_v8  ;;  %v1972_v33 = vrot.slane %v1868_v8, 4 }
0x1529   :  { %v3597_v11 = vpop.eup %3596 }
0x152a   :  { %v1870_v12 = vmul.f32 %v3597_v11, %v3595_v9 }
0x152c   :  { %1872 = vrot.lane.b32.xlu0 %v1870_v12, %s3830_s3 }
0x159e   :  { %v1873_v16 = vpop.permute.xlu0 %1872 }
0x159f   :  { %1875 = vst.msk [vmem:[#allocation3 + $0x8] sm:$0xf] %vm480_vm4, %v1873_v16  ;;  %2952 = vmatmul.mubr.msk.f32.vlgmr.msra.gmra.mrb[28].mxu1 %vm377_vm6, %v1873_v16 }
0x15a0   :  { %1876 = vst.msk [vmem:[#allocation3 + $0x14] sm:$0xf] %vm482_vm5, %v1873_v16  ;;  %3352 = vmatpush1.bf16.msra.mxu1 %v4376_v58  ;;  %2172 = vmatprep.mubr.f32.mxu1 %v3828_v0 }
0x15a1   :  { %3354 = vmatprep.subr.bf16.mxu1 %v4378_v29 }
0x15a4   :  { %3356 = vmatpush1.bf16.msra.mxu1 %v4384_v60 }
0x15a5   :  { %3358 = vmatprep.subr.bf16.mxu1 %v4388_v41 }
0x15a8   :  { %3360 = vmatpush1.bf16.msra.mxu1 %v4395_v1 }
0x15a9   :  { %3362 = vmatprep.subr.bf16.mxu1 %v4399_v3 }
0x15ac   :  { %3364 = vmatpush1.bf16.msra.mxu1 %v4406_v18 }
0x15ad   :  { %3382 = vmatprep.subr.bf16.mxu1 %v4365_v53 }
0x1672   :  { %v1945_v13 = vpop.f32.mrb[28].mxu1 }
0x1673   :  { %v1952_v15 = vrot.slane %v1945_v13, 4  ;;  %v1947_v17 = vpop.f32.mrb[29].mxu1 }
0x1674   :  { %v1953_v24 = vrot.slane %v1947_v17, 4 }
0x1675   :  { %v1956_v19 = vadd.f32 %v1952_v15, %v4439_v44 }
0x1676   :  { %v1957_v26 = vadd.f32 %v1953_v24, %v4443_v47 }
0x1677   :  { %v2953_v22 = vmul.f32 -1.442695, %v1956_v19 }
0x1678   :  { %v2954_v53 = vmul.f32 -1.442695, %v1957_v26 }
0x1679   :  { %3598 = vpow2.f32 %v2953_v22 }
0x167a   :  { %3600 = vtanh.f32 %v1957_v26 }
0x1683   :  { %v3599_v28 = vpop.eup %3598 }
0x1684   :  { %v1964_v31 = vadd.f32 1.0, %v3599_v28  ;;  %v3601_v32 = vpop.eup %3600 }
0x1686   :  { %3602 = vrcp.f32 %v1964_v31 }
0x1687   :  { %3604 = vpow2.f32 %v2954_v53 }
0x1690   :  { %v3603_v34 = vpop.eup %3602 }
0x1691   :  { %v1975_v35 = vmul.f32 %v3603_v34, %v3601_v32  ;;  %v1974_v38 = vmul.f32 %v3603_v34, %v1972_v33  ;;  %v3605_v20 = vpop.eup %3604 }
0x1692   :  { %v1965_v44 = vadd.f32 1.0, %v3605_v20 }
0x1693   :  { %1977 = vrot.lane.b32.xlu1 %v1975_v35, %s3830_s3 }
0x1694   :  { %3606 = vrcp.f32 %v1965_v44 }
0x169e   :  { %v3607_v47 = vpop.eup %3606 }
0x1705   :  { %v1978_v14 = vpop.permute.xlu1 %1977 }
0x1706   :  { %v1980_v39 = vadd.f32 %v1978_v14, %v1974_v38 }
0x1708   :  { %3608 = vtanh.f32 %v1980_v39  ;;  %v2089_v21 = vrot.slane %v1980_v39, 4 }
0x1712   :  { %v3609_v40 = vpop.eup %3608 }
0x1713   :  { %v4499_v42 = vmul.f32 %v3609_v40, %v3607_v47 }
0x1715   :  { %v1997_v46 = vrot.slane %v4499_v42, 4 }
0x1717   :  { %1998 = vrot.lane.b32.xlu0 %v1997_v46, %s3830_s3 }
0x1789   :  { %v1999_v45 = vpop.permute.xlu0 %1998 }
0x178a   :  { %2955 = vmatmul.mubr.msk.f32.vlgmr.msra.gmra.mrb[26].mxu0 %vm377_vm6, %v1999_v45 }
0x178b   :  { %3368 = vmatpush1.bf16.msra.mxu0 %v4376_v58  ;;  %2295 = vmatprep.mubr.f32.mxu0 %v3828_v0 }
0x178c   :  { %3370 = vmatprep.subr.bf16.mxu0 %v4378_v29 }
0x178f   :  { %3372 = vmatpush1.bf16.msra.mxu0 %v4384_v60 }
0x1790   :  { %3374 = vmatprep.subr.bf16.mxu0 %v4388_v41 }
0x1793   :  { %3376 = vmatpush1.bf16.msra.mxu0 %v4395_v1 }
0x1794   :  { %3378 = vmatprep.subr.bf16.mxu0 %v4399_v3 }
0x1797   :  { %3380 = vmatpush1.bf16.msra.mxu0 %v4406_v18 }
0x185d   :  { %v2068_v49 = vpop.f32.mrb[26].mxu0 }
0x185e   :  { %v2073_v50 = vadd.f32 %v2068_v49, %v4441_v43  ;;  %v2070_v51 = vpop.f32.mrb[27].mxu0 }
0x185f   :  { %v2074_v56 = vadd.f32 %v2070_v51, %v4445_v48 }
0x1860   :  { %v2956_v54 = vmul.f32 -1.442695, %v2073_v50 }
0x1861   :  { %v2957_v59 = vmul.f32 -1.442695, %v2074_v56 }
0x1862   :  { %3610 = vpow2.f32 %v2956_v54 }
0x1863   :  { %3612 = vtanh.f32 %v2074_v56 }
0x186c   :  { %v3611_v25 = vpop.eup %3610 }
0x186d   :  { %v2081_v52 = vadd.f32 1.0, %v3611_v25  ;;  %v3613_v27 = vpop.eup %3612 }
0x186f   :  { %3614 = vrcp.f32 %v2081_v52 }
0x1870   :  { %3616 = vpow2.f32 %v2957_v59 }
0x1879   :  { %v3615_v57 = vpop.eup %3614 }
0x187a   :  { %v2092_v30 = vmul.f32 %v3615_v57, %v3613_v27  ;;  %v2091_v2 = vmul.f32 %v3615_v57, %v2089_v21  ;;  %v3617_v37 = vpop.eup %3616 }
0x187b   :  { %v2082_v61 = vadd.f32 1.0, %v3617_v37 }
0x187c   :  { %2094 = vrot.lane.b32.xlu1 %v2092_v30, %s3830_s3 }
0x187d   :  { %3618 = vrcp.f32 %v2082_v61 }
0x1887   :  { %v3619_v63 = vpop.eup %3618 }
0x18ee   :  { %v2095_v6 = vpop.permute.xlu1 %2094 }
0x18ef   :  { %v2097_v62 = vadd.f32 %v2095_v6, %v2091_v2 }
0x18f1   :  { %3620 = vtanh.f32 %v2097_v62 }
0x18fb   :  { %v3621_v10 = vpop.eup %3620 }
0x18fc   :  { %v2099_v4 = vmul.f32 %v3621_v10, %v3619_v63 }
0x18fe   :  { %2101 = vrot.lane.b32.xlu0 %v2099_v4, %s3830_s3 }
0x1970   :  { %v4516_v5 = vpop.permute.xlu0 %2101 }
0x1971   :  { %2958 = vmatmul.mubr.msk.f32.vlgmr.msra.gmra.mrb[30].mxu1 %vm377_vm6, %v4516_v5 }
0x1972   :  { %3384 = vmatpush1.bf16.msra.mxu1 %v4376_v58  ;;  %2401 = vmatprep.mubr.f32.mxu1 %v3828_v0 }
0x1973   :  { %3386 = vmatprep.subr.bf16.mxu1 %v4378_v29 }
0x1976   :  { %3388 = vmatpush1.bf16.msra.mxu1 %v4384_v60 }
0x1977   :  { %3390 = vmatprep.subr.bf16.mxu1 %v4388_v41 }
0x197a   :  { %3392 = vmatpush1.bf16.msra.mxu1 %v4395_v1  ;;  %v2201_v1 = vrot.slane %v2097_v62, 4 }
0x197b   :  { %3394 = vmatprep.subr.bf16.mxu1 %v4399_v3 }
0x197e   :  { %3396 = vmatpush1.bf16.msra.mxu1 %v4406_v18 }
0x1a44   :  { %v2174_v7 = vpop.f32.mrb[30].mxu1 }
0x1a45   :  { %v2181_v8 = vrot.slane %v2174_v7, 4  ;;  %v2176_v9 = vpop.f32.mrb[31].mxu1 }
0x1a46   :  { %v2182_v12 = vrot.slane %v2176_v9, 4 }
0x1a47   :  { %v2185_v11 = vadd.f32 %v2181_v8, %v4441_v43 }
0x1a48   :  { %v2186_v29 = vadd.f32 %v2182_v12, %v4445_v48 }
0x1a49   :  { %v2959_v58 = vmul.f32 -1.442695, %v2185_v11 }
0x1a4a   :  { %v2960_v18 = vmul.f32 -1.442695, %v2186_v29 }
0x1a4b   :  { %3622 = vpow2.f32 %v2959_v58 }
0x1a4c   :  { %3624 = vtanh.f32 %v2186_v29  ;;  %v3831_v29 = vmov 0.0|0.0  }
0x1a4d   :  { %3409 = vmatprep.subr.bf16.mxu1 %v3831_v29 }
0x1a55   :  { %v3623_v16 = vpop.eup %3622 }
0x1a56   :  { %v2193_v60 = vadd.f32 1.0, %v3623_v16  ;;  %v3625_v41 = vpop.eup %3624 }
0x1a58   :  { %3626 = vrcp.f32 %v2193_v60 }
0x1a59   :  { %3628 = vpow2.f32 %v2960_v18 }
0x1a62   :  { %v3627_v13 = vpop.eup %3626 }
0x1a63   :  { %v2204_v3 = vmul.f32 %v3627_v13, %v3625_v41  ;;  %v2203_v15 = vmul.f32 %v3627_v13, %v2201_v1  ;;  %v3629_v17 = vpop.eup %3628 }
0x1a64   :  { %v2194_v43 = vadd.f32 1.0, %v3629_v17 }
0x1a65   :  { %2206 = vrot.lane.b32.xlu1 %v2204_v3, %s3830_s3 }
0x1a66   :  { %3630 = vrcp.f32 %v2194_v43  ;;  %v2553_v43 = vld [vmem:[%s4676_s13 + $0x8] sm:$0xff] }
0x1a70   :  { %v3631_v48 = vpop.eup %3630 }
0x1ad7   :  { %v2207_v19 = vpop.permute.xlu1 %2206 }
0x1ad8   :  { %v2209_v22 = vadd.f32 %v2207_v19, %v2203_v15 }
0x1ada   :  { %3632 = vtanh.f32 %v2209_v22  ;;  %v2318_v14 = vrot.slane %v2209_v22, 4 }
0x1ae4   :  { %v3633_v24 = vpop.eup %3632 }
0x1ae5   :  { %v2211_v26 = vmul.f32 %v3633_v24, %v3631_v48  ;;  %v2552_v48 = vld [vmem:[%s4676_s13] sm:$0xff] }
0x1ae7   :  { %v2226_v28 = vrot.slane %v2211_v26, 4 }
0x1ae9   :  { %2227 = vrot.lane.b32.xlu0 %v2226_v28, %s3830_s3 }
0x1b5b   :  { %v2228_v31 = vpop.permute.xlu0 %2227 }
0x1b5c   :  { %2961 = vmatmul.mubr.msk.f32.vlgmr.msra.gmra.mrb[28].mxu0 %vm377_vm6, %v2228_v31 }
0x1c2f   :  { %v2297_v32 = vpop.f32.mrb[28].mxu0 }
0x1c30   :  { %v2302_v33 = vadd.f32 %v2297_v32, %v4447_v23  ;;  %v2299_v34 = vpop.f32.mrb[29].mxu0 }
0x1c31   :  { %v2303_v38 = vadd.f32 %v2299_v34, %v4449_v36  ;;  %v2554_v34 = vld [vmem:[%s4676_s13 + $0x10] sm:$0xff] }
0x1c32   :  { %v2962_v35 = vmul.f32 -1.442695, %v2302_v33 }
0x1c33   :  { %v2963_v46 = vmul.f32 -1.442695, %v2303_v38 }
0x1c34   :  { %3634 = vpow2.f32 %v2962_v35 }
0x1c35   :  { %3636 = vtanh.f32 %v2303_v38 }
0x1c3e   :  { %v3635_v53 = vpop.eup %3634 }
0x1c3f   :  { %v2310_v20 = vadd.f32 1.0, %v3635_v53  ;;  %v3637_v44 = vpop.eup %3636 }
0x1c41   :  { %3638 = vrcp.f32 %v2310_v20  ;;  %v2555_v20 = vld [vmem:[%s4676_s13 + $0x18] sm:$0xff] }
0x1c42   :  { %3640 = vpow2.f32 %v2963_v46 }
0x1c4b   :  { %v3639_v39 = vpop.eup %3638 }
0x1c4c   :  { %v2321_v47 = vmul.f32 %v3639_v39, %v3637_v44  ;;  %v2320_v40 = vmul.f32 %v3639_v39, %v2318_v14  ;;  %v3641_v45 = vpop.eup %3640 }
0x1c4d   :  { %v2311_v49 = vadd.f32 1.0, %v3641_v45 }
0x1c4e   :  { %2323 = vrot.lane.b32.xlu1 %v2321_v47, %s3830_s3 }
0x1c4f   :  { %3642 = vrcp.f32 %v2311_v49 }
0x1c59   :  { %v3643_v54 = vpop.eup %3642 }
0x1cc0   :  { %v2324_v50 = vpop.permute.xlu1 %2323 }
0x1cc1   :  { %v2326_v51 = vadd.f32 %v2324_v50, %v2320_v40 }
0x1cc3   :  { %3644 = vtanh.f32 %v2326_v51  ;;  %v2430_v10 = vrot.slane %v2326_v51, 4 }
0x1ccd   :  { %v3645_v56 = vpop.eup %3644 }
0x1cce   :  { %v2328_v25 = vmul.f32 %v3645_v56, %v3643_v54 }
0x1cd0   :  { %2330 = vrot.lane.b32.xlu0 %v2328_v25, %s3830_s3 }
0x1cd4   :  { %1755 = vrot.lane.b32.xlu0 %v4466_v55, %s3830_s3 }
0x1cd8   :  { %2213 = vrot.lane.b32.xlu0 %v2211_v26, %s3830_s3 }
0x1d42   :  { %v2331_v52 = vpop.permute.xlu0 %2330 }
0x1d43   :  { %2964 = vmatmul.mubr.msk.f32.vlgmr.msra.gmra.mrb[32].mxu1 %vm377_vm6, %v2331_v52 }
0x1d44   :  { %3040 = vmatprep.mubr.msk.f32.mxu1 %vm3832_vm11, %v3828_v0 }
0x1d46   :  { %v1756_v27 = vpop.permute.xlu0 %1755 }
0x1d47   :  { %1758 = vst.msk [vmem:[#allocation3] sm:$0xf0] %vm594_vm7, %v1756_v27 }
0x1d48   :  { %1759 = vst.msk [vmem:[#allocation3 + $0x14] sm:$0xf0] %vm596_vm8, %v1756_v27 }
0x1d49   :  { %2333 = vst.msk [vmem:[#allocation3 + $0x18] sm:$0xf] %vm480_vm4, %v2331_v52 }
0x1d4a   :  { %2334 = vst.msk [vmem:[#allocation3 + $0x4] sm:$0xf] %vm482_vm5, %v2331_v52  ;;  %v2214_v21 = vpop.permute.xlu0 %2213 }
0x1d4b   :  { %2216 = vst.msk [vmem:[#allocation3 + $0x10] sm:$0xf0] %vm594_vm7, %v2214_v21 }
0x1d4c   :  { %2217 = vst.msk [vmem:[#allocation3 + $0x4] sm:$0xf0] %vm596_vm8, %v2214_v21 }
0x1e16   :  { %v2403_v55 = vpop.f32.mrb[32].mxu1 }
0x1e17   :  { %v2410_v57 = vrot.slane %v2403_v55, 4  ;;  %v2405_v30 = vpop.f32.mrb[33].mxu1 }
0x1e18   :  { %v2411_v37 = vrot.slane %v2405_v30, 4 }
0x1e19   :  { %v2414_v2 = vadd.f32 %v2410_v57, %v4447_v23 }
0x1e1a   :  { %v2415_v61 = vadd.f32 %v2411_v37, %v4449_v36 }
0x1e1b   :  { %v2965_v59 = vmul.f32 -1.442695, %v2414_v2 }
0x1e1c   :  { %v2966_v23 = vmul.f32 -1.442695, %v2415_v61 }
0x1e1d   :  { %3646 = vpow2.f32 %v2965_v59 }
0x1e1e   :  { %3648 = vtanh.f32 %v2415_v61 }
0x1e27   :  { %v3647_v6 = vpop.eup %3646 }
0x1e28   :  { %v2422_v62 = vadd.f32 1.0, %v3647_v6  ;;  %v3649_v63 = vpop.eup %3648 }
0x1e2a   :  { %3650 = vrcp.f32 %v2422_v62 }
0x1e2b   :  { %3652 = vpow2.f32 %v2966_v23 }
0x1e34   :  { %v3651_v4 = vpop.eup %3650 }
0x1e35   :  { %v2433_v7 = vmul.f32 %v3651_v4, %v3649_v63  ;;  %v2432_v8 = vmul.f32 %v3651_v4, %v2430_v10  ;;  %v3653_v9 = vpop.eup %3652 }
0x1e36   :  { %v2423_v11 = vadd.f32 1.0, %v3653_v9 }
0x1e37   :  { %2435 = vrot.lane.b32.xlu1 %v2433_v7, %s3830_s3 }
0x1e38   :  { %3654 = vrcp.f32 %v2423_v11 }
0x1e3b   :  { %1984 = vrot.lane.b32.xlu1 %v4499_v42, %s3830_s3 }
0x1e42   :  { %v3655_v42 = vpop.eup %3654 }
0x1ea9   :  { %v2436_v58 = vpop.permute.xlu1 %2435 }
0x1eaa   :  { %v2438_v36 = vadd.f32 %v2436_v58, %v2432_v8 }
0x1eac   :  { %3656 = vtanh.f32 %v2438_v36 }
0x1ead   :  { %v1985_v12 = vpop.permute.xlu1 %1984 }
0x1eae   :  { %1987 = vst.msk [vmem:[#allocation3 + $0x8] sm:$0xf0] %vm594_vm7, %v1985_v12 }
0x1eaf   :  { %1988 = vst.msk [vmem:[#allocation3 + $0xc] sm:$0xf0] %vm596_vm8, %v1985_v12 }
0x1eb0   :  { %2104 = vst.msk [vmem:[#allocation3 + $0x10] sm:$0xf] %vm480_vm4, %v4516_v5 }
0x1eb1   :  { %2105 = vst.msk [vmem:[#allocation3 + $0xc] sm:$0xf] %vm482_vm5, %v4516_v5 }
0x1eb6   :  { %v3657_v16 = vpop.eup %3656 }
0x1eb7   :  { %v2440_v60 = vmul.f32 %v3657_v16, %v3655_v42  ;;  %v2449_v15 = vld [vmem:[#allocation3 + $0x10] sm:$0xff] }
0x1eb8   :  { %v2448_v13 = vld [vmem:[#allocation3 + $0x8] sm:$0xff] }
0x1eb9   :  { %2442 = vrot.lane.b32.xlu1 %v2440_v60, %s3830_s3 }
0x1f2b   :  { %v2443_v41 = vpop.permute.xlu1 %2442 }
0x1f2c   :  { %2445 = vst.msk [vmem:[#allocation3 + $0x18] sm:$0xf0] %vm594_vm7, %v2443_v41 }
0x1f2d   :  { %2446 = vst.msk [vmem:[#allocation3 - $0x4] sm:$0xf0] %vm596_vm8, %v2443_v41 }
0x1f33   :  { %v2450_v3 = vld [vmem:[#allocation3 + $0x18] sm:$0xff] }
0x1f34   :  { %v2447_v1 = vld [vmem:[#allocation3] sm:$0xff]  ;;  %v3403_v18 = vpack.c.bf16 %v2450_v3, %v2449_v15 }
0x1f35   :  { %v3397_v5 = vpack.c.bf16 %v2448_v13, %v2447_v1  ;;  %3026 = vmatprep.mubr.msk.f32.mxu0 %vm377_vm6, %v2447_v1 }
0x1f37   :  { %3399 = vmatprep.subr.msk.bf16.mxu0 %vm3398_vm9, %v3397_v5  ;;  %3411 = vmatpush3.bf16.msra.mxu1 %v3397_v5 }
0x1f38   :  { %3402 = vmatpush3.bf16.xpose.msk.msra.mxu0 %vm3398_vm9, %v3397_v5  ;;  %3412 = vmatprep.subr.bf16.mxu1 %v3831_v29 }
0x1f39   :  { %3405 = vmatprep.subr.msk.bf16.mxu0 %vm3398_vm9, %v3403_v18 }
0x1f3b   :  { %3414 = vmatpush3.bf16.msra.mxu1 %v3403_v18 }
0x1f3c   :  { %3415 = vmatprep.subr.bf16.mxu1 %v3831_v29 }
0x1f40   :  { %3408 = vmatpush3.bf16.xpose.msk.msra.mxu0 %vm3398_vm9, %v3403_v18  ;;  %v2699_v18 = vld [vmem:[#allocation9 + $0x8] sm:$0xff] }
0x1f41   :  { %3427 = vmatprep.subr.bf16.mxu0 %v3831_v29 }
0x1f47   :  { %3027 = vmatmul.mubr.msk.f32.vlgmr.msra.gmra.mrb[30].mxu0 %vm377_vm6, %v2448_v13 }
0x1f48   :  { %3029 = vmatprep.mubr.msk.f32.mxu0 %vm377_vm6, %v2449_v15  ;;  %v2698_v15 = vld [vmem:[#allocation9] sm:$0xff] }
0x1f4b   :  { %3030 = vmatmul.mubr.msk.f32.gmra.mrb[32].mxu0 %vm377_vm6, %v2450_v3 }
0x1f4c   :  { %3094 = vmatprep.mubr.msk.f32.mxu0 %vm3832_vm11, %v3828_v0 }
0x201a   :  { %v3028_v17 = vpop.f32.mrb[30].mxu0 }
0x201b   :  { %v2549_v19 = vmul.f32 0.125, %v3028_v17  ;;  %v2529_v22 = vpop.f32.mrb[31].mxu0 }
0x201c   :  { %v2548_v24 = vmul.f32 0.125, %v2529_v22 }
0x201d   :  { %v2557_v26 = vadd.f32 %v2553_v43, %v2549_v19  ;;  %v3416_v19 = vpack.c.bf16 %v2699_v18, %v2698_v15 }
0x201e   :  { %v3031_v28 = vpop.f32.mrb[32].mxu0  ;;  %v2556_v31 = vadd.f32 %v2552_v48, %v2548_v24  ;;  %v2700_v48 = vld [vmem:[#allocation9 + $0x10] sm:$0xff]  ;;  %v2701_v24 = vld [vmem:[#allocation9 + $0x18] sm:$0xff] }
0x201f   :  { %v2539_v32 = vpop.f32.mrb[33].mxu0  ;;  %v2564_v33 = vsel %vm2560_vm10, %v2557_v26, -inf  ;;  %v2551_v35 = vmul.f32 0.125, %v3031_v28  ;;  %v2702_v28 = vld [vmem:[#allocation9 + $0x20] sm:$0xff] }
0x2020   :  { %v2550_v38 = vmul.f32 0.125, %v2539_v32  ;;  %2565 = vmax.xlane.f32.xlu1 %v2564_v33  ;;  %v2561_v53 = vsel %vm2560_vm10, %v2556_v31, -inf  ;;  %v2704_v33 = vld [vmem:[#allocation9 + $0x30] sm:$0xff] }
0x2021   :  { %2562 = vmax.xlane.f32.xlu0 %v2561_v53  ;;  %v2559_v39 = vadd.f32 %v2555_v20, %v2551_v35  ;;  %v2789_v53 = vld [vmem:[%s4674_s11 + $0x10] sm:$0xff] }
0x2022   :  { %v2558_v44 = vadd.f32 %v2554_v34, %v2550_v38  ;;  %v2705_v34 = vld [vmem:[#allocation9 + $0x38] sm:$0xff]  ;;  %v2787_v38 = vld [vmem:[%s4674_s11] sm:$0xff] }
0x2023   :  { %v2570_v47 = vsel %vm2560_vm10, %v2559_v39, -inf  ;;  %v3425_v35 = vpack.c.bf16 %v2705_v34, %v2704_v33 }
0x2024   :  { %v2567_v14 = vsel %vm2560_vm10, %v2558_v44, -inf }
0x2025   :  { %2568 = vmax.xlane.f32.xlu0 %v2567_v14 }
0x2029   :  { %2571 = vmax.xlane.f32.xlu0 %v2570_v47  ;;  %v2792_v47 = vld [vmem:[%s4674_s11 + $0x28] sm:$0xff] }
0x20ad   :  { %v2566_v40 = vpop.xlane.xlu1 %2565 }
0x20ae   :  { %v2574_v46 = vsub.f32 %v2557_v26, %v2566_v40  ;;  %v2563_v45 = vpop.xlane.xlu0 %2562  ;;  %v3419_v26 = vpack.c.bf16 %v2701_v24, %v2700_v48 }
0x20af   :  { %v2573_v49 = vsub.f32 %v2556_v31, %v2563_v45  ;;  %v2703_v31 = vld [vmem:[#allocation9 + $0x28] sm:$0xff]  ;;  %v2794_v45 = vld [vmem:[%s4674_s11 + $0x38] sm:$0xff] }
0x20b0   :  { %v2579_v50 = vmul.f32 1.442695, %v2574_v46  ;;  %v3422_v32 = vpack.c.bf16 %v2703_v31, %v2702_v28  ;;  %v2793_v46 = vld [vmem:[%s4674_s11 + $0x30] sm:$0xff] }
0x20b1   :  { %v2577_v51 = vmul.f32 1.442695, %v2573_v49  ;;  %v3437_v49 = vpack.c.bf16 %v2794_v45, %v2793_v46 }
0x20b2   :  { %3658 = vpow2.f32 %v2579_v50  ;;  %v2569_v54 = vpop.xlane.xlu0 %2568  ;;  %v2795_v50 = vld [vmem:[%s4674_s11 + $0x40] sm:$0xff] }
0x20b3   :  { %3660 = vpow2.f32 %v2577_v51  ;;  %v2575_v56 = vsub.f32 %v2558_v44, %v2569_v54  ;;  %v2790_v44 = vld [vmem:[%s4674_s11 + $0x18] sm:$0xff]  ;;  %v2796_v51 = vld [vmem:[%s4674_s11 + $0x48] sm:$0xff] }
0x20b4   :  { %v3431_v14 = vpack.c.bf16 %v2790_v44, %v2789_v53  ;;  %v3440_v54 = vpack.c.bf16 %v2796_v51, %v2795_v50 }
0x20b5   :  { %v2581_v25 = vmul.f32 1.442695, %v2575_v56  ;;  %v2797_v56 = vld [vmem:[%s4674_s11 + $0x50] sm:$0xff] }
0x20b6   :  { %v2572_v52 = vpop.xlane.xlu0 %2571 }
0x20b7   :  { %3662 = vpow2.f32 %v2581_v25  ;;  %v2576_v27 = vsub.f32 %v2559_v39, %v2572_v52  ;;  %v2791_v39 = vld [vmem:[%s4674_s11 + $0x20] sm:$0xff]  ;;  %v2798_v25 = vld [vmem:[%s4674_s11 + $0x58] sm:$0xff] }
0x20b8   :  { %v3434_v40 = vpack.c.bf16 %v2792_v47, %v2791_v39  ;;  %v3443_v52 = vpack.c.bf16 %v2798_v25, %v2797_v56 }
0x20b9   :  { %v2583_v21 = vmul.f32 1.442695, %v2576_v27  ;;  %v2799_v27 = vld [vmem:[%s4674_s11 + $0x60] sm:$0xff] }
0x20bb   :  { %3664 = vpow2.f32 %v2583_v21  ;;  %v2800_v21 = vld [vmem:[%s4674_s11 + $0x68] sm:$0xff] }
0x20bc   :  { %v3659_v55 = vpop.eup %3658 }
0x20bd   :  { %v3661_v57 = vpop.eup %3660  ;;  %v2588_v30 = vsel %vm2560_vm10, %v3659_v55, 0.0 }
0x20be   :  { %2589 = vadd.xlane.f32.xlu0 %v2588_v30  ;;  %v2585_v2 = vsel %vm2560_vm10, %v3661_v57, 0.0 }
0x20bf   :  { %2586 = vadd.xlane.f32.xlu1 %v2585_v2  ;;  %v2801_v2 = vld [vmem:[%s4674_s11 + $0x70] sm:$0xff] }
0x20c1   :  { %v3663_v59 = vpop.eup %3662 }
0x20c2   :  { %v2591_v37 = vsel %vm2560_vm10, %v3663_v59, 0.0 }
0x20c3   :  { %2592 = vadd.xlane.f32.xlu1 %v2591_v37 }
0x20c5   :  { %v3665_v61 = vpop.eup %3664 }
0x20c6   :  { %v2594_v6 = vsel %vm2560_vm10, %v3665_v61, 0.0 }
0x20c7   :  { %2595 = vadd.xlane.f32.xlu0 %v2594_v6 }
0x214b   :  { %v2590_v62 = vpop.xlane.xlu0 %2589 }
0x214c   :  { %3666 = vrcp.f32 %v2590_v62  ;;  %v2587_v63 = vpop.xlane.xlu1 %2586 }
0x214d   :  { %3668 = vrcp.f32 %v2587_v63 }
0x2150   :  { %v2593_v10 = vpop.xlane.xlu1 %2592 }
0x2151   :  { %3670 = vrcp.f32 %v2593_v10 }
0x2154   :  { %v2596_v4 = vpop.xlane.xlu0 %2595 }
0x2155   :  { %3672 = vrcp.f32 %v2596_v4 }
0x2156   :  { %v3667_v7 = vpop.eup %3666 }
0x2157   :  { %v3669_v8 = vpop.eup %3668  ;;  %v2600_v9 = vmul.f32 %v3667_v7, %v3659_v55  ;;  %v3446_v55 = vpack.c.bf16 %v2800_v21, %v2799_v27 }
0x2158   :  { %v2598_v23 = vmul.f32 %v3669_v8, %v3661_v57 }
0x2159   :  { %v2612_v12 = vrot.slane %v2600_v9, 4 }
0x215a   :  { %v2607_v11 = vrot.slane %v2598_v23, 4 }
0x215b   :  { %v3671_v58 = vpop.eup %3670 }
0x215c   :  { %v2609_v36 = vadd.f32 %v2607_v11, %v2598_v23  ;;  %v2602_v16 = vmul.f32 %v3671_v58, %v3663_v59  ;;  %v2802_v59 = vld [vmem:[%s4674_s11 + $0x78] sm:$0xff] }
0x215d   :  { %v3449_v37 = vpack.c.bf16 %v2802_v59, %v2801_v2 }
0x215e   :  { %v2610_v42 = vadd.f32 %v2609_v36, %v2600_v9  ;;  %v2617_v13 = vrot.slane %v2602_v16, 4 }
0x215f   :  { %v3673_v60 = vpop.eup %3672 }
0x2160   :  { %v2614_v41 = vadd.f32 %v2612_v12, %v2610_v42  ;;  %v2604_v3 = vmul.f32 %v3673_v60, %v3665_v61  ;;  %v2976_v61 = vld [vmem:[#allocation11] ss:$0 sm:$0xff] }
0x2162   :  { %v2615_v1 = vadd.f32 %v2614_v41, %v2602_v16  ;;  %v2622_v43 = vrot.slane %v2604_v3, 4 }
0x2164   :  { %v2619_v5 = vadd.f32 %v2617_v13, %v2615_v1 }
0x2166   :  { %v2620_v17 = vadd.f32 %v2619_v5, %v2604_v3 }
0x2168   :  { %v2624_v22 = vadd.f32 %v2622_v43, %v2620_v17 }
0x216a   :  { %3041 = vmatmul.mubr.msk.f32.vlgmr.msra.gmra.mrb[34].mxu1 %vm2560_vm10, %v2624_v22 }
0x216b   :  { %3417 = vmatpush3.bf16.msra.mxu1 %v3416_v19  ;;  %3059 = vmatprep.mubr.msk.f32.mxu1 %vm3832_vm11, %v3828_v0  ;;  %v2788_v0 = vld [vmem:[%s4674_s11 + $0x8] sm:$0xff] }
0x216c   :  { %3418 = vmatprep.subr.bf16.mxu1 %v3831_v29  ;;  %v3428_v20 = vpack.c.bf16 %v2788_v0, %v2787_v38 }
0x216e   :  { %3429 = vmatpush3.bf16.msra.mxu0 %v3428_v20 }
0x216f   :  { %3420 = vmatpush3.bf16.msra.mxu1 %v3419_v26  ;;  %3430 = vmatprep.subr.bf16.mxu0 %v3831_v29 }
0x2170   :  { %3421 = vmatprep.subr.bf16.mxu1 %v3831_v29 }
0x2172   :  { %3432 = vmatpush3.bf16.msra.mxu0 %v3431_v14 }
0x2173   :  { %3423 = vmatpush3.bf16.msra.mxu1 %v3422_v32  ;;  %3433 = vmatprep.subr.bf16.mxu0 %v3831_v29 }
0x2174   :  { %3424 = vmatprep.subr.bf16.mxu1 %v3831_v29 }
0x2176   :  { %3435 = vmatpush3.bf16.msra.mxu0 %v3434_v40 }
0x2177   :  { %3426 = vmatpush3.bf16.msra.mxu1 %v3425_v35  ;;  %3436 = vmatprep.subr.bf16.mxu0 %v3831_v29 }
0x217a   :  { %3438 = vmatpush3.bf16.msra.mxu0 %v3437_v49 }
0x217b   :  { %3439 = vmatprep.subr.bf16.mxu0 %v3831_v29 }
0x217e   :  { %3441 = vmatpush3.bf16.msra.mxu0 %v3440_v54 }
0x217f   :  { %3442 = vmatprep.subr.bf16.mxu0 %v3831_v29 }
0x2182   :  { %3444 = vmatpush3.bf16.msra.mxu0 %v3443_v52 }
0x2183   :  { %3445 = vmatprep.subr.bf16.mxu0 %v3831_v29 }
0x2186   :  { %3447 = vmatpush3.bf16.msra.mxu0 %v3446_v55 }
0x2187   :  { %3448 = vmatprep.subr.bf16.mxu0 %v3831_v29  ;;  %v2978_v29 = vld [vmem:[#allocation12] ss:$0 sm:$0xff] }
0x218a   :  { %3450 = vmatpush3.bf16.msra.mxu0 %v3449_v37 }
0x223d   :  { %v2694_v57 = vpop.f32.mrb[34].mxu1 }
0x223e   :  { %v3042_v30 = vpop.f32.mrb[35].mxu1  ;;  %3060 = vmatmul.mubr.msk.f32.vlgmr.msra.gmra.mrb[36].mxu1 %vm377_vm6, %v2694_v57 }
0x2311   :  { %v2782_v6 = vpop.f32.mrb[36].mxu1 }
0x2312   :  { %v2783_v62 = vadd.f32 %v2976_v61, %v2782_v6  ;;  %v3061_v63 = vpop.f32.mrb[37].mxu1 }
0x2314   :  { %v2786_v10 = vmax.f32 %v2783_v62, 0.0 }
0x2316   :  { %3095 = vmatmul.mubr.f32.vlgmr.msra.gmra.mrb[34].mxu0 %v2786_v10 }
0x23e9   :  { %v2876_v4 = vpop.f32.mrb[34].mxu0 }
0x23ea   :  { %v2877_v7 = vadd.f32 %v2978_v29, %v2876_v4  ;;  %v3096_v8 = vpop.f32.mrb[35].mxu0 }
0x23ec   :  { %v2881_v23 = vsel %vm2880_vm12, %v2877_v7, -inf }
0x23ed   :  { %2882 = vmax.xlane.f32.xlu1 %v2881_v23 }
0x247a   :  { %v2883_v9 = vpop.xlane.xlu1 %2882 }
0x247b   :  { %v2884_v11 = vsub.f32 %v2877_v7, %v2883_v9 }
0x247d   :  { %v2885_v58 = vmul.f32 1.442695, %v2884_v11 }
0x247f   :  { %3674 = vpow2.f32 %v2885_v58 }
0x2489   :  { %v3675_v36 = vpop.eup %3674 }
0x248a   :  { %v2887_v12 = vsel %vm2880_vm12, %v3675_v36, 0.0 }
0x248b   :  { %2888 = vadd.xlane.f32.xlu0 %v2887_v12 }
0x2518   :  { %v2889_v42 = vpop.xlane.xlu0 %2888 }
0x2519   :  { %3676 = vrcp.f32 %v2889_v42 }
0x2523   :  { %v3677_v16 = vpop.eup %3676 }
0x2524   :  { %v2891_v60 = vmul.f32 %v3677_v16, %v3675_v36 }
0x2526   :  { %2892 = vst.msk [vmem:[%s4677_s14] sm:$0xf] %vm2880_vm12, %v2891_v60 }
0x2527   :  { %2897 = vsyncpa [#allocation5], 1 }
0x2528   :  { %2898 = vsyncpa [#allocation7], 1 }
0x2529   :  { %2899 = vsyncpa [#allocation10], 1 }
0x252a   :  { %2900 = vsyncpa [#allocation13], 1 }

</bundles_post_ra>
